<compile_context>
chip_gen: v6e
topology: v6e:2x2x1
jax: 0.10.0
libtpu: 0.0.40
codegen_flags: <defaults>
</compile_context>

<pallas_src>
import functools
import math

import jax
import jax.numpy as jnp
from jax.experimental import pallas as pl
from jax.experimental.pallas import tpu as pltpu


# ----------------------------------------------------------------------------
# Global configuration
# ----------------------------------------------------------------------------
ACT_DTYPE = jnp.bfloat16          # activation/weight dtype fed to the MXU
NEG_INF = -1e9                    # additive mask value (scores stay in f32)
VMEM_LIMIT = 32 * 1024 * 1024     # fits v5e/v6e/v7x scoped VMEM comfortably

# Matmul tiles (bf16 inputs, f32 accumulator); sized so double-buffered tiles
# stay well under v7x's 64 MiB VMEM while keeping N/K 128/256-aligned.
TM_MM, TN_MM, TK_MM = 512, 512, 512
# Attention tiles (scores are (H, TQ, TKV) f32 per grid step).
TQ_ATTN, TKV_ATTN = 256, 256
# Conv tiles: output-time tile and output-channel tile.
TM_CONV, TN_CONV = 256, 256
# Row tiles for layernorm / masked-mean.
TM_LN, TT_MEAN = 1024, 512


def _round_up(x, m):
    return ((x + m - 1) // m) * m


def _apply_activation(y, activation):
    if activation == "relu":
        return jnp.maximum(y, 0.0)
    if activation == "leaky":
        return jnp.where(y > 0, y, 0.1 * y)
    if activation == "tanh":
        return jnp.tanh(y)
    return y


# ----------------------------------------------------------------------------
# Pallas kernels
# ----------------------------------------------------------------------------
def _matmul_kernel(x_ref, w_ref, b_ref, *rest, activation, has_residual):
    """Tiled matmul: bf16 MXU, f32 accumulator, epilogue bias+act(+residual)."""
    if has_residual:
        r_ref, o_ref, acc_ref = rest
    else:
        o_ref, acc_ref = rest

    @pl.when(pl.program_id(2) == 0)
    def _():
        acc_ref[...] = jnp.zeros_like(acc_ref)

    acc_ref[...] += jnp.dot(x_ref[...], w_ref[...],
                            preferred_element_type=jnp.float32)

    @pl.when(pl.program_id(2) == pl.num_programs(2) - 1)
    def _():
        y = acc_ref[...] + b_ref[...].astype(jnp.float32)
        y = _apply_activation(y, activation)
        if has_residual:
            y = y + r_ref[...].astype(jnp.float32)
        o_ref[...] = y.astype(o_ref.dtype)


def _layernorm_kernel(x_ref, g_ref, b_ref, o_ref, *, eps):
    x = x_ref[...].astype(jnp.float32)
    mu = jnp.mean(x, axis=-1, keepdims=True)
    var = jnp.mean(jnp.square(x - mu), axis=-1, keepdims=True)
    y = (x - mu) * jax.lax.rsqrt(var + eps)
    y = y * g_ref[...].astype(jnp.float32) + b_ref[...].astype(jnp.float32)
    o_ref[...] = y.astype(o_ref.dtype)


def _mha_kernel(q_ref, k_ref, v_ref, bias_ref, o_ref, m_sc, l_sc, acc_sc, *,
                scale):
    """Flash-style attention; all heads packed per grid step (batched einsum)."""
    j = pl.program_id(2)

    @pl.when(j == 0)
    def _():
        m_sc[...] = jnp.full_like(m_sc, -1e30)
        l_sc[...] = jnp.zeros_like(l_sc)
        acc_sc[...] = jnp.zeros_like(acc_sc)

    q = q_ref[0]                         # (H, tq, Dh)  bf16
    k = k_ref[0]                         # (H, tkv, Dh) bf16
    v = v_ref[0]                         # (H, tkv, Dh) bf16
    bias = bias_ref[0]                   # (1, tkv)     f32 additive mask

    # Scores without any in-kernel transpose: contract Dh, batch over heads.
    s = jnp.einsum("hqd,hkd->hqk", q, k,
                   preferred_element_type=jnp.float32) * scale
    s = s + bias[None, :, :]             # (H, tq, tkv)

    m_prev = m_sc[...]
    m_new = jnp.maximum(m_prev, jnp.max(s, axis=-1, keepdims=True))
    alpha = jnp.exp(m_prev - m_new)
    p = jnp.exp(s - m_new)
    l_sc[...] = alpha * l_sc[...] + jnp.sum(p, axis=-1, keepdims=True)
    acc_sc[...] = alpha * acc_sc[...] + jnp.einsum(
        "hqk,hkd->hqd", p.astype(v.dtype), v,
        preferred_element_type=jnp.float32)
    m_sc[...] = m_new

    @pl.when(j == pl.num_programs(2) - 1)
    def _():
        inv = pl.reciprocal(l_sc[...], approx=True)   # EUP, frees VALU cycles
        o_ref[0] = (acc_sc[...] * inv).astype(o_ref.dtype)


def _conv1d_kernel(xc_ref, xn_ref, w_ref, b_ref, o_ref, *, ksize, upsample,
                   offset, tile_t, activation):
    """1-D conv over a haloed time tile: K shifted windows x matmul, no im2col.

    Optionally fuses a nearest-neighbor x`upsample` in time (repeat in VMEM)."""
    cur = xc_ref[0]                      # (tin, Cin)
    nxt = xn_ref[0]                      # (tin, Cin)  (next tile = halo source)
    xcat = jnp.concatenate([cur, nxt], axis=0)          # (2*tin, Cin)
    if upsample > 1:
        n2, cin = xcat.shape
        xcat = jnp.broadcast_to(xcat[:, None, :],
                                (n2, upsample, cin)).reshape(n2 * upsample, cin)
    w = w_ref[...]                       # (K, Cin, tn)
    acc = jnp.zeros((tile_t, w.shape[-1]), jnp.float32)
    for k in range(ksize):               # static unrolled tap loop
        win = jax.lax.slice_in_dim(xcat, offset + k, offset + k + tile_t, axis=0)
        acc = acc + jnp.dot(win, w[k], preferred_element_type=jnp.float32)
    y = acc + b_ref[...].astype(jnp.float32)
    y = _apply_activation(y, activation)
    o_ref[0] = y.astype(o_ref.dtype)


def _masked_mean_kernel(x_ref, m_ref, o_ref, s_sc, c_sc):
    t = pl.program_id(1)

    @pl.when(t == 0)
    def _():
        s_sc[...] = jnp.zeros_like(s_sc)
        c_sc[...] = jnp.zeros_like(c_sc)

    x = x_ref[0].astype(jnp.float32)     # (tt, C)
    m = m_ref[0].astype(jnp.float32)     # (tt, 1)
    s_sc[...] += jnp.sum(x * m, axis=0, keepdims=True)
    c_sc[...] = c_sc[...] + jnp.sum(m)

    @pl.when(t == pl.num_programs(1) - 1)
    def _():
        cnt = jnp.maximum(c_sc[...], 1.0)        # guard all-masked rows
        o_ref[0] = (s_sc[...] / cnt).astype(o_ref.dtype)


# ----------------------------------------------------------------------------
# Pallas-backed ops (wrappers: padding + BlockSpecs, compute in kernels)
# ----------------------------------------------------------------------------
def pallas_linear(x, w, b, activation="none", residual=None, out_dtype=None):
    """y = act(x @ w + b) [+ residual];  x: (..., K), w: (K, N), b: (N,)."""
    if out_dtype is None:
        out_dtype = ACT_DTYPE
    orig_shape = x.shape
    K = orig_shape[-1]
    N = w.shape[1]
    M = int(math.prod(orig_shape[:-1])) if len(orig_shape) > 1 else 1

    tm = min(TM_MM, _round_up(M, 8))
    tn = min(TN_MM, _round_up(N, 128))
    tk = min(TK_MM, _round_up(K, 128))
    Mp, Np, Kp = _round_up(M, tm), _round_up(N, tn), _round_up(K, tk)

    x2 = jnp.pad(x.reshape(M, K).astype(ACT_DTYPE), ((0, Mp - M), (0, Kp - K)))
    w2 = jnp.pad(w.astype(ACT_DTYPE), ((0, Kp - K), (0, Np - N)))
    b2 = jnp.pad(b.astype(jnp.float32).reshape(1, N), ((0, 0), (0, Np - N)))

    args = [x2, w2, b2]
    in_specs = [
        pl.BlockSpec((tm, tk), lambda i, j, k: (i, k)),
        pl.BlockSpec((tk, tn), lambda i, j, k: (k, j)),
        pl.BlockSpec((1, tn), lambda i, j, k: (0, j)),
    ]
    has_res = residual is not None
    if has_res:
        r2 = jnp.pad(residual.reshape(M, N).astype(ACT_DTYPE),
                     ((0, Mp - M), (0, Np - N)))
        args.append(r2)
        in_specs.append(pl.BlockSpec((tm, tn), lambda i, j, k: (i, j)))

    y = pl.pallas_call(
        functools.partial(_matmul_kernel, activation=activation,
                          has_residual=has_res),
        grid=(Mp // tm, Np // tn, Kp // tk),
        in_specs=in_specs,
        out_specs=pl.BlockSpec((tm, tn), lambda i, j, k: (i, j)),
        out_shape=jax.ShapeDtypeStruct((Mp, Np), out_dtype),
        scratch_shapes=[pltpu.VMEM((tm, tn), jnp.float32)],
        compiler_params=pltpu.CompilerParams(
            dimension_semantics=("parallel", "parallel", "arbitrary"),
            vmem_limit_bytes=VMEM_LIMIT),
    )(*args)
    return y[:M, :N].reshape(orig_shape[:-1] + (N,))


def pallas_layernorm(x, gamma, beta, eps=1e-5):
    shape = x.shape
    D = shape[-1]
    x2 = x.reshape(-1, D)
    M = x2.shape[0]
    tm = min(TM_LN, _round_up(M, 8))
    Mp = _round_up(M, tm)
    x2p = jnp.pad(x2.astype(ACT_DTYPE), ((0, Mp - M), (0, 0)))
    y = pl.pallas_call(
        functools.partial(_layernorm_kernel, eps=eps),
        grid=(Mp // tm,),
        in_specs=[
            pl.BlockSpec((tm, D), lambda i: (i, 0)),
            pl.BlockSpec((1, D), lambda i: (0, 0)),
            pl.BlockSpec((1, D), lambda i: (0, 0)),
        ],
        out_specs=pl.BlockSpec((tm, D), lambda i: (i, 0)),
        out_shape=jax.ShapeDtypeStruct((Mp, D), ACT_DTYPE),
        compiler_params=pltpu.CompilerParams(
            dimension_semantics=("parallel",),
            vmem_limit_bytes=VMEM_LIMIT),
    )(x2p, gamma.reshape(1, D), beta.reshape(1, D))
    return y[:M].reshape(shape)


def pallas_conv1d(x, w, b, padding, activation="none", upsample=1,
                  out_dtype=None):
    """Channels-last 1-D conv (stride 1), optional fused x`upsample` (nearest).

    x: (B, T, Cin), w: (Cout, Cin, K), b: (Cout,).  Matches
    Conv1d(pad=padding)(repeat(x, upsample, time)) in channels-last layout."""
    if out_dtype is None:
        out_dtype = ACT_DTYPE
    B, T, Cin = x.shape
    Cout, _, K = w.shape
    r = upsample
    pad_in = -(-padding // r)                 # pad the *original* signal
    off = r * pad_in - padding                # residual offset after upsample
    Tout = r * T + 2 * padding - K + 1

    tm = min(TM_CONV, _round_up(Tout, 8 * r))  # output-time tile
    tin = tm // r
    n_t = -(-Tout // tm)
    Tout_p = n_t * tm
    assert off + K - 1 <= tm
    Tin_total = max((n_t + 1) * tin, T + 2 * pad_in)
    xin = jnp.pad(x.astype(ACT_DTYPE),
                  ((0, 0), (pad_in, Tin_total - T - pad_in), (0, 0)))

    tn = min(TN_CONV, _round_up(Cout, 128))
    Cout_p = _round_up(Cout, tn)
    wt = jnp.transpose(w, (2, 1, 0)).astype(ACT_DTYPE)        # (K, Cin, Cout)
    wt = jnp.pad(wt, ((0, 0), (0, 0), (0, Cout_p - Cout)))
    b2 = jnp.pad(b.astype(jnp.float32).reshape(1, Cout),
                 ((0, 0), (0, Cout_p - Cout)))

    out = pl.pallas_call(
        functools.partial(_conv1d_kernel, ksize=K, upsample=r, offset=off,
                          tile_t=tm, activation=activation),
        grid=(B, n_t, Cout_p // tn),
        in_specs=[
            pl.BlockSpec((1, tin, Cin), lambda bb, i, j: (bb, i, 0)),
            pl.BlockSpec((1, tin, Cin), lambda bb, i, j: (bb, i + 1, 0)),
            pl.BlockSpec((K, Cin, tn), lambda bb, i, j: (0, 0, j)),
            pl.BlockSpec((1, tn), lambda bb, i, j: (0, j)),
        ],
        out_specs=pl.BlockSpec((1, tm, tn), lambda bb, i, j: (bb, i, j)),
        out_shape=jax.ShapeDtypeStruct((B, Tout_p, Cout_p), out_dtype),
        compiler_params=pltpu.CompilerParams(
            dimension_semantics=("parallel", "parallel", "parallel"),
            vmem_limit_bytes=VMEM_LIMIT),
    )(xin, xin, wt, b2)
    return out[:, :Tout, :Cout]


def _attention_core(q, k, v, bias, heads):
    """Flash attention over Lk tiles; heads packed per grid step."""
    B, Lq, D = q.shape
    Lk = k.shape[1]
    Dh = D // heads
    scale = 1.0 / math.sqrt(Dh)

    tq = min(TQ_ATTN, _round_up(Lq, 8))
    tkv = min(TKV_ATTN, _round_up(Lk, 128))
    Lqp = _round_up(Lq, tq)
    Lkp = _round_up(Lk, tkv)

    def split(t, L, Lp):
        t = t.astype(ACT_DTYPE).reshape(B, L, heads, Dh).transpose(0, 2, 1, 3)
        return jnp.pad(t, ((0, 0), (0, 0), (0, Lp - L), (0, 0)))

    qh = split(q, Lq, Lqp)                       # (B, H, Lqp, Dh)
    kh = split(k, Lk, Lkp)
    vh = split(v, Lk, Lkp)
    biasp = jnp.pad(bias.astype(jnp.float32), ((0, 0), (0, 0), (0, Lkp - Lk)),
                    constant_values=NEG_INF)     # padded keys masked out

    out = pl.pallas_call(
        functools.partial(_mha_kernel, scale=scale),
        grid=(B, Lqp // tq, Lkp // tkv),
        in_specs=[
            pl.BlockSpec((1, heads, tq, Dh), lambda b, i, j: (b, 0, i, 0)),
            pl.BlockSpec((1, heads, tkv, Dh), lambda b, i, j: (b, 0, j, 0)),
            pl.BlockSpec((1, heads, tkv, Dh), lambda b, i, j: (b, 0, j, 0)),
            pl.BlockSpec((1, 1, tkv), lambda b, i, j: (b, 0, j)),
        ],
        out_specs=pl.BlockSpec((1, heads, tq, Dh), lambda b, i, j: (b, 0, i, 0)),
        out_shape=jax.ShapeDtypeStruct((B, heads, Lqp, Dh), ACT_DTYPE),
        scratch_shapes=[
            pltpu.VMEM((heads, tq, 1), jnp.float32),    # running max
            pltpu.VMEM((heads, tq, 1), jnp.float32),    # running denom
            pltpu.VMEM((heads, tq, Dh), jnp.float32),   # output accumulator
        ],
        compiler_params=pltpu.CompilerParams(
            dimension_semantics=("parallel", "parallel", "arbitrary"),
            vmem_limit_bytes=VMEM_LIMIT),
    )(qh, kh, vh, biasp)
    return out[:, :, :Lq, :].transpose(0, 2, 1, 3).reshape(B, Lq, D)


def pallas_mha(x, mem, bias, p, heads, residual=None):
    """Multi-head attention with fused KV projection and fused residual on the
    output projection.  x: (B, Lq, D), mem: (B, Lk, D), bias: (B, 1, Lk)."""
    D = x.shape[-1]
    q = pallas_linear(x, p["wq"], p["bq"])
    kv = pallas_linear(mem, p["wkv"], p["bkv"])          # fused K|V projection
    k, v = kv[..., :D], kv[..., D:]
    ctx = _attention_core(q, k, v, bias, heads)
    return pallas_linear(ctx, p["wo"], p["bo"], residual=residual)


def pallas_masked_mean(x, mask_f):
    """x: (B, T, C), mask_f: (B, T, 1) float -> (B, C) (mean over valid frames)."""
    B, T, C = x.shape
    tt = min(TT_MEAN, _round_up(T, 8))
    Tp = _round_up(T, tt)
    xp = jnp.pad(x.astype(jnp.float32), ((0, 0), (0, Tp - T), (0, 0)))
    mp = jnp.pad(mask_f.astype(jnp.float32), ((0, 0), (0, Tp - T), (0, 0)))
    out = pl.pallas_call(
        _masked_mean_kernel,
        grid=(B, Tp // tt),
        in_specs=[
            pl.BlockSpec((1, tt, C), lambda b, t: (b, t, 0)),
            pl.BlockSpec((1, tt, 1), lambda b, t: (b, t, 0)),
        ],
        out_specs=pl.BlockSpec((1, 1, C), lambda b, t: (b, 0, 0)),
        out_shape=jax.ShapeDtypeStruct((B, 1, C), jnp.float32),
        scratch_shapes=[pltpu.VMEM((1, C), jnp.float32),
                        pltpu.VMEM((1, 1), jnp.float32)],
        compiler_params=pltpu.CompilerParams(
            dimension_semantics=("parallel", "arbitrary"),
            vmem_limit_bytes=VMEM_LIMIT),
    )(xp, mp)
    return out[:, 0, :]


# ----------------------------------------------------------------------------
# Model blocks (glue in JAX, compute in Pallas)
# ----------------------------------------------------------------------------
def _mask_to_bias(mask, B, L):
    if mask is None:
        return jnp.zeros((B, 1, L), jnp.float32)
    return ((1.0 - mask.astype(jnp.float32)) * NEG_INF)[:, None, :]


def decoder_layer(x, mem, self_bias, src_bias, p, heads):
    # espnet-style pre-norm decoder layer: self-attn -> src-attn -> FFN.
    # Residual adds are fused into the matmul epilogues (residual=...).
    y = pallas_layernorm(x, p["ln1_g"], p["ln1_b"])
    x = pallas_mha(y, y, self_bias, p["self_attn"], heads, residual=x)
    y = pallas_layernorm(x, p["ln2_g"], p["ln2_b"])
    x = pallas_mha(y, mem, src_bias, p["src_attn"], heads, residual=x)
    y = pallas_layernorm(x, p["ln3_g"], p["ln3_b"])
    ff = pallas_linear(y, p["ff_w1"], p["ff_b1"], activation="relu")
    x = pallas_linear(ff, p["ff_w2"], p["ff_b2"], residual=x)
    return x


def conformer_decoder(x, self_bias, mem, mem_bias, p, heads, input_layer):
    # TODO(synk): real ConformerDecoder adds positional encoding + conformer conv
    #             module + dropout; their definitions were not provided.
    if input_layer == "linear":
        x = pallas_linear(x, p["embed_w"], p["embed_b"])
        x = pallas_layernorm(x, p["embed_ln_g"], p["embed_ln_b"])
    for lp in p["layers"]:
        x = decoder_layer(x, mem, self_bias, mem_bias, lp, heads)
    return pallas_layernorm(x, p["after_ln_g"], p["after_ln_b"])


def frontend_forward(fp, vqvec, prompt, mask, prompt_mask, heads):
    B, L, _ = vqvec.shape
    Lp = prompt.shape[1]
    # prompt_prenet == Conv1d(prompt_channels, adim, kernel_size=5, padding=2)
    prompt_h = pallas_conv1d(prompt, fp["prenet_w"], fp["prenet_b"], padding=2)
    self_bias = _mask_to_bias(mask, B, L)
    mem_bias = _mask_to_bias(prompt_mask, B, Lp)
    enc = conformer_decoder(vqvec, self_bias, prompt_h, mem_bias,
                            fp["encoder1"], heads, "linear")
    h = pallas_linear(enc, fp["hidden_w"], fp["hidden_b"])
    enc2 = conformer_decoder(h, self_bias, prompt_h, mem_bias,
                             fp["encoder2"], heads, None)
    mel = pallas_linear(enc2, fp["mel_w"], fp["mel_b"], out_dtype=jnp.float32)
    return enc2, mel


def backend_forward(bp, h, prompt_avg):
    # TODO(synk): BigVGAN definition not provided; reduced conditioned conv stack
    #             (cond projection + conv_pre + fused x2 upsample conv + conv_post).
    cond = pallas_linear(prompt_avg, bp["cond_w"], bp["cond_b"])        # (B, adim)
    x = h.astype(ACT_DTYPE) + cond[:, None, :]                          # (B, L, adim)
    x = pallas_conv1d(x, bp["pre_w"], bp["pre_b"], padding=3, activation="leaky")
    # x2 nearest-neighbor upsample fused into the conv kernel (no HBM repeat).
    x = pallas_conv1d(x, bp["up_w"], bp["up_b"], padding=1, activation="leaky",
                      upsample=2)
    wav = pallas_conv1d(x, bp["post_w"], bp["post_b"], padding=3,
                        activation="tanh", out_dtype=jnp.float32)
    return jnp.transpose(wav, (0, 2, 1))                                # (B, 1, T_wav)


def vec2wav2_forward(params, vqvec, prompt, mask=None, prompt_mask=None, heads=4):
    h, mel = frontend_forward(params["frontend"], vqvec, prompt, mask,
                              prompt_mask, heads)
    if mask is not None:
        h = h * mask[..., None].astype(h.dtype)       # masked_fill(~mask, 0)
    # (PyTorch transposes h to (B, D, L) here; we keep channels-last internally.)
    if prompt_mask is not None:
        prompt_avg = pallas_masked_mean(
            prompt, prompt_mask.astype(jnp.float32)[..., None])
    else:
        B, Lp, _ = prompt.shape
        prompt_avg = pallas_masked_mean(prompt, jnp.ones((B, Lp, 1), jnp.float32))
    wav = backend_forward(params["backend"], h, prompt_avg)
    return mel, None, wav


# ----------------------------------------------------------------------------
# Deterministic parameter initialization
# ----------------------------------------------------------------------------
def _lin(key, din, dout, scale=0.05):
    kw, kb = jax.random.split(key)
    return (jax.random.normal(kw, (din, dout), jnp.float32) * scale,
            jax.random.normal(kb, (dout,), jnp.float32) * scale)


def _conv(key, cout, cin, k, scale=0.05):
    kw, kb = jax.random.split(key)
    return (jax.random.normal(kw, (cout, cin, k), jnp.float32) * scale,
            jax.random.normal(kb, (cout,), jnp.float32) * scale)


def _attn_params(key, d):
    ks = jax.random.split(key, 3)
    wq, bq = _lin(ks[0], d, d)
    wkv, bkv = _lin(ks[1], d, 2 * d)        # fused K|V projection weight
    wo, bo = _lin(ks[2], d, d)
    return dict(wq=wq, bq=bq, wkv=wkv, bkv=bkv, wo=wo, bo=bo)


def _layer_params(key, d, dff):
    ks = jax.random.split(key, 4)
    w1, b1 = _lin(ks[2], d, dff)
    w2, b2 = _lin(ks[3], dff, d)
    return dict(
        self_attn=_attn_params(ks[0], d),
        src_attn=_attn_params(ks[1], d),
        ln1_g=jnp.ones((d,)), ln1_b=jnp.zeros((d,)),
        ln2_g=jnp.ones((d,)), ln2_b=jnp.zeros((d,)),
        ln3_g=jnp.ones((d,)), ln3_b=jnp.zeros((d,)),
        ff_w1=w1, ff_b1=b1, ff_w2=w2, ff_b2=b2,
    )


def _encoder_params(key, d, dff, nblocks, input_dim=None):
    ks = jax.random.split(key, nblocks + 1)
    p = dict(layers=[_layer_params(ks[i], d, dff) for i in range(nblocks)],
             after_ln_g=jnp.ones((d,)), after_ln_b=jnp.zeros((d,)))
    if input_dim is not None:
        ew, eb = _lin(ks[-1], input_dim, d)
        p.update(embed_w=ew, embed_b=eb,
                 embed_ln_g=jnp.ones((d,)), embed_ln_b=jnp.zeros((d,)))
    return p


def init_params(key, *, vqvec_channels, prompt_channels, num_mels, adim, dff,
                nblocks, backend_ch):
    ks = jax.random.split(key, 10)
    prenet_w, prenet_b = _conv(ks[0], adim, prompt_channels, 5)
    hidden_w, hidden_b = _lin(ks[1], adim, adim)
    mel_w, mel_b = _lin(ks[2], adim, num_mels)
    frontend = dict(
        prenet_w=prenet_w, prenet_b=prenet_b,
        encoder1=_encoder_params(ks[3], adim, dff, nblocks, input_dim=vqvec_channels),
        hidden_w=hidden_w, hidden_b=hidden_b,
        encoder2=_encoder_params(ks[4], adim, dff, nblocks, input_dim=None),
        mel_w=mel_w, mel_b=mel_b,
    )
    cond_w, cond_b = _lin(ks[5], prompt_channels, adim)
    pre_w, pre_b = _conv(ks[6], backend_ch, adim, 7)
    up_w, up_b = _conv(ks[7], backend_ch, backend_ch, 3)
    post_w, post_b = _conv(ks[8], 1, backend_ch, 7)
    backend = dict(cond_w=cond_w, cond_b=cond_b, pre_w=pre_w, pre_b=pre_b,
                   up_w=up_w, up_b=up_b, post_w=post_w, post_b=post_b)
    return dict(frontend=frontend, backend=backend)


# ----------------------------------------------------------------------------
# Main
# ----------------------------------------------------------------------------
if __name__ == "__main__":
    B = 2            # batch
    L = 16           # vqvec sequence length
    Lp = 16          # prompt sequence length
    VQ = 32          # vqvec_channels
    NM = 16          # num_mels == prompt_channels (prompt is a mel spectrogram)
    ADIM = 32        # conformer attention_dim
    HEADS = 4
    DFF = 64
    NBLOCKS = 2
    BCH = 32         # backend channels

    root = jax.random.PRNGKey(0)
    k_param, k_vq, k_pr = jax.random.split(root, 3)

    params = init_params(k_param, vqvec_channels=VQ, prompt_channels=NM,
                         num_mels=NM, adim=ADIM, dff=DFF, nblocks=NBLOCKS,
                         backend_ch=BCH)

    vqvec = jax.random.normal(k_vq, (B, L, VQ), jnp.float32)
    prompt = jax.random.normal(k_pr, (B, Lp, NM), jnp.float32)
    mask = jnp.arange(L)[None, :] < jnp.array([L, L - 4])[:, None]            # (B, L) bool
    prompt_mask = jnp.arange(Lp)[None, :] < jnp.array([Lp, Lp - 6])[:, None]  # (B, Lp) bool

    fwd = jax.jit(functools.partial(vec2wav2_forward, heads=HEADS))
    mel, _none, wav = fwd(params, vqvec, prompt, mask, prompt_mask)
    jax.block_until_ready((mel, wav))

    assert mel.shape == (B, L, NM)
    assert wav.shape == (B, 1, 2 * L)
    assert bool(jnp.all(jnp.isfinite(mel))) and bool(jnp.all(jnp.isfinite(wav)))
    print("KERNEL_OK")
</pallas_src>

<mosaic_0001>
module attributes {stable_mosaic.version = 11 : i64} {
  func.func @_matmul_kernel(%arg0: i32, %arg1: i32, %arg2: i32, %arg3: memref<32x128xbf16, #tpu.memory_space<vmem>>, %arg4: memref<128x128xbf16, #tpu.memory_space<vmem>>, %arg5: memref<1x128xf32, #tpu.memory_space<vmem>>, %arg6: memref<32x128xbf16, #tpu.memory_space<vmem>>, %arg7: memref<32x128xf32, #tpu.memory_space<vmem>>) attributes {dimension_semantics = [#tpu.dimension_semantics<parallel>, #tpu.dimension_semantics<parallel>, #tpu.dimension_semantics<arbitrary>], iteration_bounds = array<i64: 1, 1, 1>, scalar_prefetch = 0 : i64, scratch_operands = 1 : i64, tpu.core_type = #tpu.core_type<tc>, window_params = [{transform_indices = @transform_0, window_bounds = array<i64: 32, 128>}, {transform_indices = @transform_1, window_bounds = array<i64: 128, 128>}, {transform_indices = @transform_2, window_bounds = array<i64: 1, 128>}, {transform_indices = @transform_3, window_bounds = array<i64: 32, 128>}]} {
    %c0_i32 = arith.constant 0 : i32
    %0 = arith.cmpi eq, %arg2, %c0_i32 : i32
    %1 = arith.extui %0 : i1 to i32
    %c0_i32_0 = arith.constant 0 : i32
    %2 = arith.cmpi ne, %1, %c0_i32_0 : i32
    scf.if %2 {
      %cst_10 = arith.constant 0.000000e+00 : f32
      %12 = vector.broadcast %cst_10 : f32 to vector<32x128xf32>
      %c0_11 = arith.constant 0 : index
      %c0_12 = arith.constant 0 : index
      %13 = vector.load %arg7[%c0_11, %c0_12] : memref<32x128xf32, #tpu.memory_space<vmem>>, vector<32x128xf32>
      tpu.vector_store %arg7[%c0_11, %c0_12], %12 {strides = array<i32>} : memref<32x128xf32, #tpu.memory_space<vmem>>, vector<32x128xf32>,
    } else {
    }
    %c0 = arith.constant 0 : index
    %c0_1 = arith.constant 0 : index
    %3 = vector.load %arg7[%c0, %c0_1] : memref<32x128xf32, #tpu.memory_space<vmem>>, vector<32x128xf32>
    %c0_2 = arith.constant 0 : index
    %c0_3 = arith.constant 0 : index
    %4 = vector.load %arg3[%c0_2, %c0_3] : memref<32x128xbf16, #tpu.memory_space<vmem>>, vector<32x128xbf16>
    %c0_4 = arith.constant 0 : index
    %c0_5 = arith.constant 0 : index
    %5 = vector.load %arg4[%c0_4, %c0_5] : memref<128x128xbf16, #tpu.memory_space<vmem>>, vector<128x128xbf16>
    %cst = arith.constant dense<0.000000e+00> : vector<32x128xf32>
    %6 = tpu.matmul %4, %5, %cst {dimension_numbers = #tpu.dot_dimension_numbers<[1], [0], [0], [1], [0, 0, 1, 1], [], []>} : vector<32x128xbf16>, vector<128x128xbf16>, vector<32x128xf32> -> vector<32x128xf32>
    %7 = arith.addf %3, %6 : vector<32x128xf32>
    %c0_6 = arith.constant 0 : index
    %c0_7 = arith.constant 0 : index
    %8 = vector.load %arg7[%c0_6, %c0_7] : memref<32x128xf32, #tpu.memory_space<vmem>>, vector<32x128xf32>
    tpu.vector_store %arg7[%c0_6, %c0_7], %7 {strides = array<i32>} : memref<32x128xf32, #tpu.memory_space<vmem>>, vector<32x128xf32>,
    %c0_i32_8 = arith.constant 0 : i32
    %9 = arith.cmpi eq, %arg2, %c0_i32_8 : i32
    %10 = arith.extui %9 : i1 to i32
    %c0_i32_9 = arith.constant 0 : i32
    %11 = arith.cmpi ne, %10, %c0_i32_9 : i32
    scf.if %11 {
      %c0_10 = arith.constant 0 : index
      %c0_11 = arith.constant 0 : index
      %12 = vector.load %arg7[%c0_10, %c0_11] : memref<32x128xf32, #tpu.memory_space<vmem>>, vector<32x128xf32>
      %c0_12 = arith.constant 0 : index
      %c0_13 = arith.constant 0 : index
      %13 = vector.load %arg5[%c0_12, %c0_13] : memref<1x128xf32, #tpu.memory_space<vmem>>, vector<1x128xf32>
      %14 = vector.broadcast %13 : vector<1x128xf32> to vector<32x128xf32>
      %15 = arith.addf %12, %14 : vector<32x128xf32>
      %16 = arith.truncf %15 : vector<32x128xf32> to vector<32x128xbf16>
      %c0_14 = arith.constant 0 : index
      %c0_15 = arith.constant 0 : index
      %17 = vector.load %arg6[%c0_14, %c0_15] : memref<32x128xbf16, #tpu.memory_space<vmem>>, vector<32x128xbf16>
      tpu.vector_store %arg6[%c0_14, %c0_15], %16 {strides = array<i32>} : memref<32x128xbf16, #tpu.memory_space<vmem>>, vector<32x128xbf16>,
    } else {
    }
    return
  }
  func.func @transform_0(%arg0: i32, %arg1: i32, %arg2: i32) -> (i32, i32) {
    %c0_i32 = arith.constant 0 : i32
    return %arg0, %arg2 : i32, i32
  }
  func.func @transform_1(%arg0: i32, %arg1: i32, %arg2: i32) -> (i32, i32) {
    %c0_i32 = arith.constant 0 : i32
    return %arg2, %arg1 : i32, i32
  }
  func.func @transform_2(%arg0: i32, %arg1: i32, %arg2: i32) -> (i32, i32) {
    %c0_i32 = arith.constant 0 : i32
    %c0_i32_0 = arith.constant 0 : i32
    return %c0_i32, %arg1 : i32, i32
  }
  func.func @transform_3(%arg0: i32, %arg1: i32, %arg2: i32) -> (i32, i32) {
    %c0_i32 = arith.constant 0 : i32
    return %arg0, %arg1 : i32, i32
  }
}

module attributes {stable_mosaic.version = 11 : i64} {
  func.func @_layernorm_kernel(%arg0: i32, %arg1: memref<32x32xbf16, #tpu.memory_space<vmem>>, %arg2: memref<1x32xf32, #tpu.memory_space<vmem>>, %arg3: memref<1x32xf32, #tpu.memory_space<vmem>>, %arg4: memref<32x32xbf16, #tpu.memory_space<vmem>>) attributes {dimension_semantics = [#tpu.dimension_semantics<parallel>], iteration_bounds = array<i64: 1>, scalar_prefetch = 0 : i64, scratch_operands = 0 : i64, tpu.core_type = #tpu.core_type<tc>, window_params = [{transform_indices = @transform_0, window_bounds = array<i64: 32, 32>}, {pipeline_mode = #tpu.pipeline_mode<synchronous>, transform_indices = @transform_1, window_bounds = array<i64: 1, 32>}, {pipeline_mode = #tpu.pipeline_mode<synchronous>, transform_indices = @transform_2, window_bounds = array<i64: 1, 32>}, {transform_indices = @transform_3, window_bounds = array<i64: 32, 32>}]} {
    %c0 = arith.constant 0 : index
    %c0_0 = arith.constant 0 : index
    %0 = vector.load %arg1[%c0, %c0_0] : memref<32x32xbf16, #tpu.memory_space<vmem>>, vector<32x32xbf16>
    %1 = arith.extf %0 : vector<32x32xbf16> to vector<32x32xf32>
    %cst = arith.constant dense<0.000000e+00> : vector<32xf32>
    %2 = vector.multi_reduction <add>, %1, %cst [1] : vector<32x32xf32> to vector<32xf32>
    %3 = vector.shape_cast %2 : vector<32xf32> to vector<32x1xf32>
    %cst_1 = arith.constant 3.200000e+01 : f32
    %4 = vector.broadcast %cst_1 : f32 to vector<32x1xf32>
    %5 = arith.divf %3, %4 : vector<32x1xf32>
    %6 = vector.broadcast %5 : vector<32x1xf32> to vector<32x32xf32>
    %7 = arith.subf %1, %6 : vector<32x32xf32>
    %8 = arith.mulf %7, %7 : vector<32x32xf32>
    %cst_2 = arith.constant dense<0.000000e+00> : vector<32xf32>
    %9 = vector.multi_reduction <add>, %8, %cst_2 [1] : vector<32x32xf32> to vector<32xf32>
    %10 = vector.shape_cast %9 : vector<32xf32> to vector<32x1xf32>
    %cst_3 = arith.constant 3.200000e+01 : f32
    %11 = vector.broadcast %cst_3 : f32 to vector<32x1xf32>
    %12 = arith.divf %10, %11 : vector<32x1xf32>
    %13 = vector.broadcast %5 : vector<32x1xf32> to vector<32x32xf32>
    %14 = arith.subf %1, %13 : vector<32x32xf32>
    %cst_4 = arith.constant 9.99999974E-6 : f32
    %15 = vector.broadcast %cst_4 : f32 to vector<32x1xf32>
    %16 = arith.addf %12, %15 : vector<32x1xf32>
    %17 = math.rsqrt %16 : vector<32x1xf32>
    %18 = vector.broadcast %17 : vector<32x1xf32> to vector<32x32xf32>
    %19 = arith.mulf %14, %18 : vector<32x32xf32>
    %c0_5 = arith.constant 0 : index
    %c0_6 = arith.constant 0 : index
    %20 = vector.load %arg2[%c0_5, %c0_6] : memref<1x32xf32, #tpu.memory_space<vmem>>, vector<1x32xf32>
    %21 = vector.broadcast %20 : vector<1x32xf32> to vector<32x32xf32>
    %22 = arith.mulf %19, %21 : vector<32x32xf32>
    %c0_7 = arith.constant 0 : index
    %c0_8 = arith.constant 0 : index
    %23 = vector.load %arg3[%c0_7, %c0_8] : memref<1x32xf32, #tpu.memory_space<vmem>>, vector<1x32xf32>
    %24 = vector.broadcast %23 : vector<1x32xf32> to vector<32x32xf32>
    %25 = arith.addf %22, %24 : vector<32x32xf32>
    %26 = arith.truncf %25 : vector<32x32xf32> to vector<32x32xbf16>
    %c0_9 = arith.constant 0 : index
    %c0_10 = arith.constant 0 : index
    %27 = vector.load %arg4[%c0_9, %c0_10] : memref<32x32xbf16, #tpu.memory_space<vmem>>, vector<32x32xbf16>
    tpu.vector_store %arg4[%c0_9, %c0_10], %26 {strides = array<i32>} : memref<32x32xbf16, #tpu.memory_space<vmem>>, vector<32x32xbf16>,
    return
  }
  func.func @transform_0(%arg0: i32) -> (i32, i32) {
    %c0_i32 = arith.constant 0 : i32
    %c0_i32_0 = arith.constant 0 : i32
    return %arg0, %c0_i32 : i32, i32
  }
  func.func @transform_1(%arg0: i32) -> (i32, i32) {
    %c0_i32 = arith.constant 0 : i32
    %c0_i32_0 = arith.constant 0 : i32
    %c0_i32_1 = arith.constant 0 : i32
    return %c0_i32, %c0_i32_0 : i32, i32
  }
  func.func @transform_2(%arg0: i32) -> (i32, i32) {
    %c0_i32 = arith.constant 0 : i32
    %c0_i32_0 = arith.constant 0 : i32
    %c0_i32_1 = arith.constant 0 : i32
    return %c0_i32, %c0_i32_0 : i32, i32
  }
  func.func @transform_3(%arg0: i32) -> (i32, i32) {
    %c0_i32 = arith.constant 0 : i32
    %c0_i32_0 = arith.constant 0 : i32
    return %arg0, %c0_i32 : i32, i32
  }
}

module attributes {stable_mosaic.version = 11 : i64} {
  func.func @_matmul_kernel(%arg0: i32, %arg1: i32, %arg2: i32, %arg3: memref<32x128xbf16, #tpu.memory_space<vmem>>, %arg4: memref<128x128xbf16, #tpu.memory_space<vmem>>, %arg5: memref<1x128xf32, #tpu.memory_space<vmem>>, %arg6: memref<32x128xbf16, #tpu.memory_space<vmem>>, %arg7: memref<32x128xbf16, #tpu.memory_space<vmem>>, %arg8: memref<32x128xf32, #tpu.memory_space<vmem>>) attributes {dimension_semantics = [#tpu.dimension_semantics<parallel>, #tpu.dimension_semantics<parallel>, #tpu.dimension_semantics<arbitrary>], iteration_bounds = array<i64: 1, 1, 1>, scalar_prefetch = 0 : i64, scratch_operands = 1 : i64, tpu.core_type = #tpu.core_type<tc>, window_params = [{transform_indices = @transform_0, window_bounds = array<i64: 32, 128>}, {transform_indices = @transform_1, window_bounds = array<i64: 128, 128>}, {transform_indices = @transform_2, window_bounds = array<i64: 1, 128>}, {transform_indices = @transform_3, window_bounds = array<i64: 32, 128>}, {transform_indices = @transform_4, window_bounds = array<i64: 32, 128>}]} {
    %c0_i32 = arith.constant 0 : i32
    %0 = arith.cmpi eq, %arg2, %c0_i32 : i32
    %1 = arith.extui %0 : i1 to i32
    %c0_i32_0 = arith.constant 0 : i32
    %2 = arith.cmpi ne, %1, %c0_i32_0 : i32
    scf.if %2 {
      %cst_10 = arith.constant 0.000000e+00 : f32
      %12 = vector.broadcast %cst_10 : f32 to vector<32x128xf32>
      %c0_11 = arith.constant 0 : index
      %c0_12 = arith.constant 0 : index
      %13 = vector.load %arg8[%c0_11, %c0_12] : memref<32x128xf32, #tpu.memory_space<vmem>>, vector<32x128xf32>
      tpu.vector_store %arg8[%c0_11, %c0_12], %12 {strides = array<i32>} : memref<32x128xf32, #tpu.memory_space<vmem>>, vector<32x128xf32>,
    } else {
    }
    %c0 = arith.constant 0 : index
    %c0_1 = arith.constant 0 : index
    %3 = vector.load %arg8[%c0, %c0_1] : memref<32x128xf32, #tpu.memory_space<vmem>>, vector<32x128xf32>
    %c0_2 = arith.constant 0 : index
    %c0_3 = arith.constant 0 : index
    %4 = vector.load %arg3[%c0_2, %c0_3] : memref<32x128xbf16, #tpu.memory_space<vmem>>, vector<32x128xbf16>
    %c0_4 = arith.constant 0 : index
    %c0_5 = arith.constant 0 : index
    %5 = vector.load %arg4[%c0_4, %c0_5] : memref<128x128xbf16, #tpu.memory_space<vmem>>, vector<128x128xbf16>
    %cst = arith.constant dense<0.000000e+00> : vector<32x128xf32>
    %6 = tpu.matmul %4, %5, %cst {dimension_numbers = #tpu.dot_dimension_numbers<[1], [0], [0], [1], [0, 0, 1, 1], [], []>} : vector<32x128xbf16>, vector<128x128xbf16>, vector<32x128xf32> -> vector<32x128xf32>
    %7 = arith.addf %3, %6 : vector<32x128xf32>
    %c0_6 = arith.constant 0 : index
    %c0_7 = arith.constant 0 : index
    %8 = vector.load %arg8[%c0_6, %c0_7] : memref<32x128xf32, #tpu.memory_space<vmem>>, vector<32x128xf32>
    tpu.vector_store %arg8[%c0_6, %c0_7], %7 {strides = array<i32>} : memref<32x128xf32, #tpu.memory_space<vmem>>, vector<32x128xf32>,
    %c0_i32_8 = arith.constant 0 : i32
    %9 = arith.cmpi eq, %arg2, %c0_i32_8 : i32
    %10 = arith.extui %9 : i1 to i32
    %c0_i32_9 = arith.constant 0 : i32
    %11 = arith.cmpi ne, %10, %c0_i32_9 : i32
    scf.if %11 {
      %c0_10 = arith.constant 0 : index
      %c0_11 = arith.constant 0 : index
      %12 = vector.load %arg8[%c0_10, %c0_11] : memref<32x128xf32, #tpu.memory_space<vmem>>, vector<32x128xf32>
      %c0_12 = arith.constant 0 : index
      %c0_13 = arith.constant 0 : index
      %13 = vector.load %arg5[%c0_12, %c0_13] : memref<1x128xf32, #tpu.memory_space<vmem>>, vector<1x128xf32>
      %14 = vector.broadcast %13 : vector<1x128xf32> to vector<32x128xf32>
      %15 = arith.addf %12, %14 : vector<32x128xf32>
      %c0_14 = arith.constant 0 : index
      %c0_15 = arith.constant 0 : index
      %16 = vector.load %arg6[%c0_14, %c0_15] : memref<32x128xbf16, #tpu.memory_space<vmem>>, vector<32x128xbf16>
      %17 = arith.extf %16 : vector<32x128xbf16> to vector<32x128xf32>
      %18 = arith.addf %15, %17 : vector<32x128xf32>
      %19 = arith.truncf %18 : vector<32x128xf32> to vector<32x128xbf16>
      %c0_16 = arith.constant 0 : index
      %c0_17 = arith.constant 0 : index
      %20 = vector.load %arg7[%c0_16, %c0_17] : memref<32x128xbf16, #tpu.memory_space<vmem>>, vector<32x128xbf16>
      tpu.vector_store %arg7[%c0_16, %c0_17], %19 {strides = array<i32>} : memref<32x128xbf16, #tpu.memory_space<vmem>>, vector<32x128xbf16>,
    } else {
    }
    return
  }
  func.func @transform_0(%arg0: i32, %arg1: i32, %arg2: i32) -> (i32, i32) {
    %c0_i32 = arith.constant 0 : i32
    return %arg0, %arg2 : i32, i32
  }
  func.func @transform_1(%arg0: i32, %arg1: i32, %arg2: i32) -> (i32, i32) {
    %c0_i32 = arith.constant 0 : i32
    return %arg2, %arg1 : i32, i32
  }
  func.func @transform_2(%arg0: i32, %arg1: i32, %arg2: i32) -> (i32, i32) {
    %c0_i32 = arith.constant 0 : i32
    %c0_i32_0 = arith.constant 0 : i32
    return %c0_i32, %arg1 : i32, i32
  }
  func.func @transform_3(%arg0: i32, %arg1: i32, %arg2: i32) -> (i32, i32) {
    %c0_i32 = arith.constant 0 : i32
    return %arg0, %arg1 : i32, i32
  }
  func.func @transform_4(%arg0: i32, %arg1: i32, %arg2: i32) -> (i32, i32) {
    %c0_i32 = arith.constant 0 : i32
    return %arg0, %arg1 : i32, i32
  }
}

module attributes {stable_mosaic.version = 11 : i64} {
  func.func @_mha_kernel(%arg0: i32, %arg1: i32, %arg2: i32, %arg3: memref<1x4x16x8xbf16, #tpu.memory_space<vmem>>, %arg4: memref<1x4x128x8xbf16, #tpu.memory_space<vmem>>, %arg5: memref<1x4x128x8xbf16, #tpu.memory_space<vmem>>, %arg6: memref<1x1x128xf32, #tpu.memory_space<vmem>>, %arg7: memref<1x4x16x8xbf16, #tpu.memory_space<vmem>>, %arg8: memref<4x16x1xf32, #tpu.memory_space<vmem>>, %arg9: memref<4x16x1xf32, #tpu.memory_space<vmem>>, %arg10: memref<4x16x8xf32, #tpu.memory_space<vmem>>) attributes {dimension_semantics = [#tpu.dimension_semantics<parallel>, #tpu.dimension_semantics<parallel>, #tpu.dimension_semantics<arbitrary>], iteration_bounds = array<i64: 2, 1, 1>, scalar_prefetch = 0 : i64, scratch_operands = 3 : i64, tpu.core_type = #tpu.core_type<tc>, window_params = [{transform_indices = @transform_0, window_bounds = array<i64: 1, 4, 16, 8>}, {transform_indices = @transform_1, window_bounds = array<i64: 1, 4, 128, 8>}, {transform_indices = @transform_2, window_bounds = array<i64: 1, 4, 128, 8>}, {transform_indices = @transform_3, window_bounds = array<i64: 1, 1, 128>}, {transform_indices = @transform_4, window_bounds = array<i64: 1, 4, 16, 8>}]} {
    %c0_i32 = arith.constant 0 : i32
    %0 = arith.cmpi eq, %arg2, %c0_i32 : i32
    %1 = arith.extui %0 : i1 to i32
    %c0_i32_0 = arith.constant 0 : i32
    %2 = arith.cmpi ne, %1, %c0_i32_0 : i32
    scf.if %2 {
      %cst_39 = arith.constant -1.000000e+30 : f32
      %43 = vector.broadcast %cst_39 : f32 to vector<4x16x1xf32>
      %c0_40 = arith.constant 0 : index
      %c0_41 = arith.constant 0 : index
      %c0_42 = arith.constant 0 : index
      %44 = vector.load %arg8[%c0_40, %c0_41, %c0_42] : memref<4x16x1xf32, #tpu.memory_space<vmem>>, vector<4x16x1xf32>
      tpu.vector_store %arg8[%c0_40, %c0_41, %c0_42], %43 {strides = array<i32>} : memref<4x16x1xf32, #tpu.memory_space<vmem>>, vector<4x16x1xf32>,
      %cst_43 = arith.constant 0.000000e+00 : f32
      %45 = vector.broadcast %cst_43 : f32 to vector<4x16x1xf32>
      %c0_44 = arith.constant 0 : index
      %c0_45 = arith.constant 0 : index
      %c0_46 = arith.constant 0 : index
      %46 = vector.load %arg9[%c0_44, %c0_45, %c0_46] : memref<4x16x1xf32, #tpu.memory_space<vmem>>, vector<4x16x1xf32>
      tpu.vector_store %arg9[%c0_44, %c0_45, %c0_46], %45 {strides = array<i32>} : memref<4x16x1xf32, #tpu.memory_space<vmem>>, vector<4x16x1xf32>,
      %cst_47 = arith.constant 0.000000e+00 : f32
      %47 = vector.broadcast %cst_47 : f32 to vector<4x16x8xf32>
      %c0_48 = arith.constant 0 : index
      %c0_49 = arith.constant 0 : index
      %c0_50 = arith.constant 0 : index
      %48 = vector.load %arg10[%c0_48, %c0_49, %c0_50] : memref<4x16x8xf32, #tpu.memory_space<vmem>>, vector<4x16x8xf32>
      tpu.vector_store %arg10[%c0_48, %c0_49, %c0_50], %47 {strides = array<i32>} : memref<4x16x8xf32, #tpu.memory_space<vmem>>, vector<4x16x8xf32>,
    } else {
    }
    %c0 = arith.constant 0 : index
    %c0_1 = arith.constant 0 : index
    %c0_2 = arith.constant 0 : index
    %c0_3 = arith.constant 0 : index
    %3 = vector.load %arg3[%c0, %c0_1, %c0_2, %c0_3] : memref<1x4x16x8xbf16, #tpu.memory_space<vmem>>, vector<1x4x16x8xbf16>
    %4 = vector.shape_cast %3 : vector<1x4x16x8xbf16> to vector<4x16x8xbf16>
    %c0_4 = arith.constant 0 : index
    %c0_5 = arith.constant 0 : index
    %c0_6 = arith.constant 0 : index
    %c0_7 = arith.constant 0 : index
    %5 = vector.load %arg4[%c0_4, %c0_5, %c0_6, %c0_7] : memref<1x4x128x8xbf16, #tpu.memory_space<vmem>>, vector<1x4x128x8xbf16>
    %6 = vector.shape_cast %5 : vector<1x4x128x8xbf16> to vector<4x128x8xbf16>
    %c0_8 = arith.constant 0 : index
    %c0_9 = arith.constant 0 : index
    %c0_10 = arith.constant 0 : index
    %c0_11 = arith.constant 0 : index
    %7 = vector.load %arg5[%c0_8, %c0_9, %c0_10, %c0_11] : memref<1x4x128x8xbf16, #tpu.memory_space<vmem>>, vector<1x4x128x8xbf16>
    %8 = vector.shape_cast %7 : vector<1x4x128x8xbf16> to vector<4x128x8xbf16>
    %c0_12 = arith.constant 0 : index
    %c0_13 = arith.constant 0 : index
    %c0_14 = arith.constant 0 : index
    %9 = vector.load %arg6[%c0_12, %c0_13, %c0_14] : memref<1x1x128xf32, #tpu.memory_space<vmem>>, vector<1x1x128xf32>
    %10 = vector.shape_cast %9 : vector<1x1x128xf32> to vector<1x128xf32>
    "tpu.trace_start"() <{level = 10 : i32, message = "hqd,hkd->hqk"}> : () -> ()
    %cst = arith.constant dense<0.000000e+00> : vector<4x16x128xf32>
    %11 = tpu.matmul %4, %6, %cst {dimension_numbers = #tpu.dot_dimension_numbers<[2], [2], [1], [1], [0, 0, 0, 1, 1, 1], [0], [0]>} : vector<4x16x8xbf16>, vector<4x128x8xbf16>, vector<4x16x128xf32> -> vector<4x16x128xf32>
    "tpu.trace_stop"() : () -> ()
    %cst_15 = arith.constant 0.353553385 : f32
    %12 = vector.broadcast %cst_15 : f32 to vector<4x16x128xf32>
    %13 = arith.mulf %11, %12 : vector<4x16x128xf32>
    %14 = vector.shape_cast %10 : vector<1x128xf32> to vector<1x1x128xf32>
    %15 = vector.broadcast %14 : vector<1x1x128xf32> to vector<4x16x128xf32>
    %16 = arith.addf %13, %15 : vector<4x16x128xf32>
    %c0_16 = arith.constant 0 : index
    %c0_17 = arith.constant 0 : index
    %c0_18 = arith.constant 0 : index
    %17 = vector.load %arg8[%c0_16, %c0_17, %c0_18] : memref<4x16x1xf32, #tpu.memory_space<vmem>>, vector<4x16x1xf32>
    %cst_19 = arith.constant dense<0xFF800000> : vector<4x16xf32>
    %18 = vector.multi_reduction <maximumf>, %16, %cst_19 [2] : vector<4x16x128xf32> to vector<4x16xf32>
    %19 = vector.shape_cast %18 : vector<4x16xf32> to vector<4x16x1xf32>
    %20 = arith.maximumf %17, %19 : vector<4x16x1xf32>
    %21 = arith.subf %17, %20 : vector<4x16x1xf32>
    %22 = math.exp %21 : vector<4x16x1xf32>
    %23 = vector.broadcast %20 : vector<4x16x1xf32> to vector<4x16x128xf32>
    %24 = arith.subf %16, %23 : vector<4x16x128xf32>
    %25 = math.exp %24 : vector<4x16x128xf32>
    %c0_20 = arith.constant 0 : index
    %c0_21 = arith.constant 0 : index
    %c0_22 = arith.constant 0 : index
    %26 = vector.load %arg9[%c0_20, %c0_21, %c0_22] : memref<4x16x1xf32, #tpu.memory_space<vmem>>, vector<4x16x1xf32>
    %27 = arith.mulf %22, %26 : vector<4x16x1xf32>
    %cst_23 = arith.constant dense<0.000000e+00> : vector<4x16xf32>
    %28 = vector.multi_reduction <add>, %25, %cst_23 [2] : vector<4x16x128xf32> to vector<4x16xf32>
    %29 = vector.shape_cast %28 : vector<4x16xf32> to vector<4x16x1xf32>
    %30 = arith.addf %27, %29 : vector<4x16x1xf32>
    %c0_24 = arith.constant 0 : index
    %c0_25 = arith.constant 0 : index
    %c0_26 = arith.constant 0 : index
    %31 = vector.load %arg9[%c0_24, %c0_25, %c0_26] : memref<4x16x1xf32, #tpu.memory_space<vmem>>, vector<4x16x1xf32>
    tpu.vector_store %arg9[%c0_24, %c0_25, %c0_26], %30 {strides = array<i32>} : memref<4x16x1xf32, #tpu.memory_space<vmem>>, vector<4x16x1xf32>,
    %c0_27 = arith.constant 0 : index
    %c0_28 = arith.constant 0 : index
    %c0_29 = arith.constant 0 : index
    %32 = vector.load %arg10[%c0_27, %c0_28, %c0_29] : memref<4x16x8xf32, #tpu.memory_space<vmem>>, vector<4x16x8xf32>
    %33 = vector.broadcast %22 : vector<4x16x1xf32> to vector<4x16x8xf32>
    %34 = arith.mulf %33, %32 : vector<4x16x8xf32>
    %35 = arith.truncf %25 : vector<4x16x128xf32> to vector<4x16x128xbf16>
    "tpu.trace_start"() <{level = 10 : i32, message = "hqk,hkd->hqd"}> : () -> ()
    %cst_30 = arith.constant dense<0.000000e+00> : vector<4x16x8xf32>
    %36 = tpu.matmul %35, %8, %cst_30 {dimension_numbers = #tpu.dot_dimension_numbers<[2], [1], [1], [2], [0, 0, 0, 1, 1, 2], [0], [0]>} : vector<4x16x128xbf16>, vector<4x128x8xbf16>, vector<4x16x8xf32> -> vector<4x16x8xf32>
    "tpu.trace_stop"() : () -> ()
    %37 = arith.addf %34, %36 : vector<4x16x8xf32>
    %c0_31 = arith.constant 0 : index
    %c0_32 = arith.constant 0 : index
    %c0_33 = arith.constant 0 : index
    %38 = vector.load %arg10[%c0_31, %c0_32, %c0_33] : memref<4x16x8xf32, #tpu.memory_space<vmem>>, vector<4x16x8xf32>
    tpu.vector_store %arg10[%c0_31, %c0_32, %c0_33], %37 {strides = array<i32>} : memref<4x16x8xf32, #tpu.memory_space<vmem>>, vector<4x16x8xf32>,
    %c0_34 = arith.constant 0 : index
    %c0_35 = arith.constant 0 : index
    %c0_36 = arith.constant 0 : index
    %39 = vector.load %arg8[%c0_34, %c0_35, %c0_36] : memref<4x16x1xf32, #tpu.memory_space<vmem>>, vector<4x16x1xf32>
    tpu.vector_store %arg8[%c0_34, %c0_35, %c0_36], %20 {strides = array<i32>} : memref<4x16x1xf32, #tpu.memory_space<vmem>>, vector<4x16x1xf32>,
    %c0_i32_37 = arith.constant 0 : i32
    %40 = arith.cmpi eq, %arg2, %c0_i32_37 : i32
    %41 = arith.extui %40 : i1 to i32
    %c0_i32_38 = arith.constant 0 : i32
    %42 = arith.cmpi ne, %41, %c0_i32_38 : i32
    scf.if %42 {
      %c0_39 = arith.constant 0 : index
      %c0_40 = arith.constant 0 : index
      %c0_41 = arith.constant 0 : index
      %43 = vector.load %arg9[%c0_39, %c0_40, %c0_41] : memref<4x16x1xf32, #tpu.memory_space<vmem>>, vector<4x16x1xf32>
      %44 = tpu.reciprocal %43 {approx = true} : vector<4x16x1xf32> -> vector<4x16x1xf32>
      %c0_42 = arith.constant 0 : index
      %c0_43 = arith.constant 0 : index
      %c0_44 = arith.constant 0 : index
      %45 = vector.load %arg10[%c0_42, %c0_43, %c0_44] : memref<4x16x8xf32, #tpu.memory_space<vmem>>, vector<4x16x8xf32>
      %46 = vector.broadcast %44 : vector<4x16x1xf32> to vector<4x16x8xf32>
      %47 = arith.mulf %45, %46 : vector<4x16x8xf32>
      %48 = arith.truncf %47 : vector<4x16x8xf32> to vector<4x16x8xbf16>
      %c0_45 = arith.constant 0 : index
      %c0_46 = arith.constant 0 : index
      %c0_47 = arith.constant 0 : index
      %c0_48 = arith.constant 0 : index
      %49 = vector.load %arg7[%c0_45, %c0_46, %c0_47, %c0_48] : memref<1x4x16x8xbf16, #tpu.memory_space<vmem>>, vector<1x4x16x8xbf16>
      %50 = vector.shape_cast %49 : vector<1x4x16x8xbf16> to vector<4x16x8xbf16>
      %51 = vector.shape_cast %48 : vector<4x16x8xbf16> to vector<1x4x16x8xbf16>
      tpu.vector_store %arg7[%c0_45, %c0_46, %c0_47, %c0_48], %51 {strides = array<i32>} : memref<1x4x16x8xbf16, #tpu.memory_space<vmem>>, vector<1x4x16x8xbf16>,
    } else {
    }
    return
  }
  func.func @transform_0(%arg0: i32, %arg1: i32, %arg2: i32) -> (i32, i32, i32, i32) {
    %c0_i32 = arith.constant 0 : i32
    %c0_i32_0 = arith.constant 0 : i32
    %c0_i32_1 = arith.constant 0 : i32
    return %arg0, %c0_i32, %arg1, %c0_i32_0 : i32, i32, i32, i32
  }
  func.func @transform_1(%arg0: i32, %arg1: i32, %arg2: i32) -> (i32, i32, i32, i32) {
    %c0_i32 = arith.constant 0 : i32
    %c0_i32_0 = arith.constant 0 : i32
    %c0_i32_1 = arith.constant 0 : i32
    return %arg0, %c0_i32, %arg2, %c0_i32_0 : i32, i32, i32, i32
  }
  func.func @transform_2(%arg0: i32, %arg1: i32, %arg2: i32) -> (i32, i32, i32, i32) {
    %c0_i32 = arith.constant 0 : i32
    %c0_i32_0 = arith.constant 0 : i32
    %c0_i32_1 = arith.constant 0 : i32
    return %arg0, %c0_i32, %arg2, %c0_i32_0 : i32, i32, i32, i32
  }
  func.func @transform_3(%arg0: i32, %arg1: i32, %arg2: i32) -> (i32, i32, i32) {
    %c0_i32 = arith.constant 0 : i32
    %c0_i32_0 = arith.constant 0 : i32
    return %arg0, %c0_i32, %arg2 : i32, i32, i32
  }
  func.func @transform_4(%arg0: i32, %arg1: i32, %arg2: i32) -> (i32, i32, i32, i32) {
    %c0_i32 = arith.constant 0 : i32
    %c0_i32_0 = arith.constant 0 : i32
    %c0_i32_1 = arith.constant 0 : i32
    return %arg0, %c0_i32, %arg1, %c0_i32_0 : i32, i32, i32, i32
  }
}

module attributes {stable_mosaic.version = 11 : i64} {
  func.func @_conv1d_kernel(%arg0: i32, %arg1: i32, %arg2: i32, %arg3: memref<1x16x16xbf16, #tpu.memory_space<vmem>>, %arg4: memref<1x16x16xbf16, #tpu.memory_space<vmem>>, %arg5: memref<5x16x128xbf16, #tpu.memory_space<vmem>>, %arg6: memref<1x128xf32, #tpu.memory_space<vmem>>, %arg7: memref<1x16x128xbf16, #tpu.memory_space<vmem>>) attributes {dimension_semantics = [#tpu.dimension_semantics<parallel>, #tpu.dimension_semantics<parallel>, #tpu.dimension_semantics<parallel>], iteration_bounds = array<i64: 2, 1, 1>, scalar_prefetch = 0 : i64, scratch_operands = 0 : i64, tpu.core_type = #tpu.core_type<tc>, window_params = [{transform_indices = @transform_0, window_bounds = array<i64: 1, 16, 16>}, {transform_indices = @transform_1, window_bounds = array<i64: 1, 16, 16>}, {transform_indices = @transform_2, window_bounds = array<i64: 5, 16, 128>}, {transform_indices = @transform_3, window_bounds = array<i64: 1, 128>}, {transform_indices = @transform_4, window_bounds = array<i64: 1, 16, 128>}]} {
    %c0 = arith.constant 0 : index
    %c0_0 = arith.constant 0 : index
    %c0_1 = arith.constant 0 : index
    %0 = vector.load %arg3[%c0, %c0_0, %c0_1] : memref<1x16x16xbf16, #tpu.memory_space<vmem>>, vector<1x16x16xbf16>
    %1 = vector.shape_cast %0 : vector<1x16x16xbf16> to vector<16x16xbf16>
    %c0_2 = arith.constant 0 : index
    %c0_3 = arith.constant 0 : index
    %c0_4 = arith.constant 0 : index
    %2 = vector.load %arg4[%c0_2, %c0_3, %c0_4] : memref<1x16x16xbf16, #tpu.memory_space<vmem>>, vector<1x16x16xbf16>
    %3 = vector.shape_cast %2 : vector<1x16x16xbf16> to vector<16x16xbf16>
    %4 = tpu.concatenate %1, %3 in 0 : vector<16x16xbf16>, vector<16x16xbf16> -> vector<32x16xbf16>
    %c0_5 = arith.constant 0 : index
    %c0_6 = arith.constant 0 : index
    %c0_7 = arith.constant 0 : index
    %5 = vector.load %arg5[%c0_5, %c0_6, %c0_7] : memref<5x16x128xbf16, #tpu.memory_space<vmem>>, vector<5x16x128xbf16>
    %cst = arith.constant 0.000000e+00 : f32
    %6 = vector.broadcast %cst : f32 to vector<16x128xf32>
    %7 = vector.extract_strided_slice %4 {offsets = [0, 0], sizes = [16, 16], strides = [1, 1]} : vector<32x16xbf16> to vector<16x16xbf16>
    %8 = vector.extract_strided_slice %5 {offsets = [0, 0, 0], sizes = [1, 16, 128], strides = [1, 1, 1]} : vector<5x16x128xbf16> to vector<1x16x128xbf16>
    %9 = vector.shape_cast %8 : vector<1x16x128xbf16> to vector<16x128xbf16>
    %cst_8 = arith.constant dense<0.000000e+00> : vector<16x128xf32>
    %10 = tpu.matmul %7, %9, %cst_8 {dimension_numbers = #tpu.dot_dimension_numbers<[1], [0], [0], [1], [0, 0, 1, 1], [], []>} : vector<16x16xbf16>, vector<16x128xbf16>, vector<16x128xf32> -> vector<16x128xf32>
    %11 = arith.addf %6, %10 : vector<16x128xf32>
    %12 = vector.extract_strided_slice %4 {offsets = [1, 0], sizes = [16, 16], strides = [1, 1]} : vector<32x16xbf16> to vector<16x16xbf16>
    %13 = vector.extract_strided_slice %5 {offsets = [1, 0, 0], sizes = [1, 16, 128], strides = [1, 1, 1]} : vector<5x16x128xbf16> to vector<1x16x128xbf16>
    %14 = vector.shape_cast %13 : vector<1x16x128xbf16> to vector<16x128xbf16>
    %cst_9 = arith.constant dense<0.000000e+00> : vector<16x128xf32>
    %15 = tpu.matmul %12, %14, %cst_9 {dimension_numbers = #tpu.dot_dimension_numbers<[1], [0], [0], [1], [0, 0, 1, 1], [], []>} : vector<16x16xbf16>, vector<16x128xbf16>, vector<16x128xf32> -> vector<16x128xf32>
    %16 = arith.addf %11, %15 : vector<16x128xf32>
    %17 = vector.extract_strided_slice %4 {offsets = [2, 0], sizes = [16, 16], strides = [1, 1]} : vector<32x16xbf16> to vector<16x16xbf16>
    %18 = vector.extract_strided_slice %5 {offsets = [2, 0, 0], sizes = [1, 16, 128], strides = [1, 1, 1]} : vector<5x16x128xbf16> to vector<1x16x128xbf16>
    %19 = vector.shape_cast %18 : vector<1x16x128xbf16> to vector<16x128xbf16>
    %cst_10 = arith.constant dense<0.000000e+00> : vector<16x128xf32>
    %20 = tpu.matmul %17, %19, %cst_10 {dimension_numbers = #tpu.dot_dimension_numbers<[1], [0], [0], [1], [0, 0, 1, 1], [], []>} : vector<16x16xbf16>, vector<16x128xbf16>, vector<16x128xf32> -> vector<16x128xf32>
    %21 = arith.addf %16, %20 : vector<16x128xf32>
    %22 = vector.extract_strided_slice %4 {offsets = [3, 0], sizes = [16, 16], strides = [1, 1]} : vector<32x16xbf16> to vector<16x16xbf16>
    %23 = vector.extract_strided_slice %5 {offsets = [3, 0, 0], sizes = [1, 16, 128], strides = [1, 1, 1]} : vector<5x16x128xbf16> to vector<1x16x128xbf16>
    %24 = vector.shape_cast %23 : vector<1x16x128xbf16> to vector<16x128xbf16>
    %cst_11 = arith.constant dense<0.000000e+00> : vector<16x128xf32>
    %25 = tpu.matmul %22, %24, %cst_11 {dimension_numbers = #tpu.dot_dimension_numbers<[1], [0], [0], [1], [0, 0, 1, 1], [], []>} : vector<16x16xbf16>, vector<16x128xbf16>, vector<16x128xf32> -> vector<16x128xf32>
    %26 = arith.addf %21, %25 : vector<16x128xf32>
    %27 = vector.extract_strided_slice %4 {offsets = [4, 0], sizes = [16, 16], strides = [1, 1]} : vector<32x16xbf16> to vector<16x16xbf16>
    %28 = vector.extract_strided_slice %5 {offsets = [4, 0, 0], sizes = [1, 16, 128], strides = [1, 1, 1]} : vector<5x16x128xbf16> to vector<1x16x128xbf16>
    %29 = vector.shape_cast %28 : vector<1x16x128xbf16> to vector<16x128xbf16>
    %cst_12 = arith.constant dense<0.000000e+00> : vector<16x128xf32>
    %30 = tpu.matmul %27, %29, %cst_12 {dimension_numbers = #tpu.dot_dimension_numbers<[1], [0], [0], [1], [0, 0, 1, 1], [], []>} : vector<16x16xbf16>, vector<16x128xbf16>, vector<16x128xf32> -> vector<16x128xf32>
    %31 = arith.addf %26, %30 : vector<16x128xf32>
    %c0_13 = arith.constant 0 : index
    %c0_14 = arith.constant 0 : index
    %32 = vector.load %arg6[%c0_13, %c0_14] : memref<1x128xf32, #tpu.memory_space<vmem>>, vector<1x128xf32>
    %33 = vector.broadcast %32 : vector<1x128xf32> to vector<16x128xf32>
    %34 = arith.addf %31, %33 : vector<16x128xf32>
    %35 = arith.truncf %34 : vector<16x128xf32> to vector<16x128xbf16>
    %c0_15 = arith.constant 0 : index
    %c0_16 = arith.constant 0 : index
    %c0_17 = arith.constant 0 : index
    %36 = vector.load %arg7[%c0_15, %c0_16, %c0_17] : memref<1x16x128xbf16, #tpu.memory_space<vmem>>, vector<1x16x128xbf16>
    %37 = vector.shape_cast %36 : vector<1x16x128xbf16> to vector<16x128xbf16>
    %38 = vector.shape_cast %35 : vector<16x128xbf16> to vector<1x16x128xbf16>
    tpu.vector_store %arg7[%c0_15, %c0_16, %c0_17], %38 {strides = array<i32>} : memref<1x16x128xbf16, #tpu.memory_space<vmem>>, vector<1x16x128xbf16>,
    return
  }
  func.func @transform_0(%arg0: i32, %arg1: i32, %arg2: i32) -> (i32, i32, i32) {
    %c0_i32 = arith.constant 0 : i32
    %c0_i32_0 = arith.constant 0 : i32
    return %arg0, %arg1, %c0_i32 : i32, i32, i32
  }
  func.func @transform_1(%arg0: i32, %arg1: i32, %arg2: i32) -> (i32, i32, i32) {
    %c1_i32 = arith.constant 1 : i32
    %0 = arith.addi %arg1, %c1_i32 : i32
    %c0_i32 = arith.constant 0 : i32
    %c0_i32_0 = arith.constant 0 : i32
    return %arg0, %0, %c0_i32 : i32, i32, i32
  }
  func.func @transform_2(%arg0: i32, %arg1: i32, %arg2: i32) -> (i32, i32, i32) {
    %c0_i32 = arith.constant 0 : i32
    %c0_i32_0 = arith.constant 0 : i32
    %c0_i32_1 = arith.constant 0 : i32
    return %c0_i32, %c0_i32_0, %arg2 : i32, i32, i32
  }
  func.func @transform_3(%arg0: i32, %arg1: i32, %arg2: i32) -> (i32, i32) {
    %c0_i32 = arith.constant 0 : i32
    %c0_i32_0 = arith.constant 0 : i32
    return %c0_i32, %arg2 : i32, i32
  }
  func.func @transform_4(%arg0: i32, %arg1: i32, %arg2: i32) -> (i32, i32, i32) {
    %c0_i32 = arith.constant 0 : i32
    return %arg0, %arg1, %arg2 : i32, i32, i32
  }
}

module attributes {stable_mosaic.version = 11 : i64} {
  func.func @_matmul_kernel(%arg0: i32, %arg1: i32, %arg2: i32, %arg3: memref<32x128xbf16, #tpu.memory_space<vmem>>, %arg4: memref<128x128xbf16, #tpu.memory_space<vmem>>, %arg5: memref<1x128xf32, #tpu.memory_space<vmem>>, %arg6: memref<32x128xbf16, #tpu.memory_space<vmem>>, %arg7: memref<32x128xf32, #tpu.memory_space<vmem>>) attributes {dimension_semantics = [#tpu.dimension_semantics<parallel>, #tpu.dimension_semantics<parallel>, #tpu.dimension_semantics<arbitrary>], iteration_bounds = array<i64: 1, 1, 1>, scalar_prefetch = 0 : i64, scratch_operands = 1 : i64, tpu.core_type = #tpu.core_type<tc>, window_params = [{transform_indices = @transform_0, window_bounds = array<i64: 32, 128>}, {transform_indices = @transform_1, window_bounds = array<i64: 128, 128>}, {transform_indices = @transform_2, window_bounds = array<i64: 1, 128>}, {transform_indices = @transform_3, window_bounds = array<i64: 32, 128>}]} {
    %c0_i32 = arith.constant 0 : i32
    %0 = arith.cmpi eq, %arg2, %c0_i32 : i32
    %1 = arith.extui %0 : i1 to i32
    %c0_i32_0 = arith.constant 0 : i32
    %2 = arith.cmpi ne, %1, %c0_i32_0 : i32
    scf.if %2 {
      %cst_10 = arith.constant 0.000000e+00 : f32
      %12 = vector.broadcast %cst_10 : f32 to vector<32x128xf32>
      %c0_11 = arith.constant 0 : index
      %c0_12 = arith.constant 0 : index
      %13 = vector.load %arg7[%c0_11, %c0_12] : memref<32x128xf32, #tpu.memory_space<vmem>>, vector<32x128xf32>
      tpu.vector_store %arg7[%c0_11, %c0_12], %12 {strides = array<i32>} : memref<32x128xf32, #tpu.memory_space<vmem>>, vector<32x128xf32>,
    } else {
    }
    %c0 = arith.constant 0 : index
    %c0_1 = arith.constant 0 : index
    %3 = vector.load %arg7[%c0, %c0_1] : memref<32x128xf32, #tpu.memory_space<vmem>>, vector<32x128xf32>
    %c0_2 = arith.constant 0 : index
    %c0_3 = arith.constant 0 : index
    %4 = vector.load %arg3[%c0_2, %c0_3] : memref<32x128xbf16, #tpu.memory_space<vmem>>, vector<32x128xbf16>
    %c0_4 = arith.constant 0 : index
    %c0_5 = arith.constant 0 : index
    %5 = vector.load %arg4[%c0_4, %c0_5] : memref<128x128xbf16, #tpu.memory_space<vmem>>, vector<128x128xbf16>
    %cst = arith.constant dense<0.000000e+00> : vector<32x128xf32>
    %6 = tpu.matmul %4, %5, %cst {dimension_numbers = #tpu.dot_dimension_numbers<[1], [0], [0], [1], [0, 0, 1, 1], [], []>} : vector<32x128xbf16>, vector<128x128xbf16>, vector<32x128xf32> -> vector<32x128xf32>
    %7 = arith.addf %3, %6 : vector<32x128xf32>
    %c0_6 = arith.constant 0 : index
    %c0_7 = arith.constant 0 : index
    %8 = vector.load %arg7[%c0_6, %c0_7] : memref<32x128xf32, #tpu.memory_space<vmem>>, vector<32x128xf32>
    tpu.vector_store %arg7[%c0_6, %c0_7], %7 {strides = array<i32>} : memref<32x128xf32, #tpu.memory_space<vmem>>, vector<32x128xf32>,
    %c0_i32_8 = arith.constant 0 : i32
    %9 = arith.cmpi eq, %arg2, %c0_i32_8 : i32
    %10 = arith.extui %9 : i1 to i32
    %c0_i32_9 = arith.constant 0 : i32
    %11 = arith.cmpi ne, %10, %c0_i32_9 : i32
    scf.if %11 {
      %c0_10 = arith.constant 0 : index
      %c0_11 = arith.constant 0 : index
      %12 = vector.load %arg7[%c0_10, %c0_11] : memref<32x128xf32, #tpu.memory_space<vmem>>, vector<32x128xf32>
      %c0_12 = arith.constant 0 : index
      %c0_13 = arith.constant 0 : index
      %13 = vector.load %arg5[%c0_12, %c0_13] : memref<1x128xf32, #tpu.memory_space<vmem>>, vector<1x128xf32>
      %14 = vector.broadcast %13 : vector<1x128xf32> to vector<32x128xf32>
      %15 = arith.addf %12, %14 : vector<32x128xf32>
      %cst_14 = arith.constant 0.000000e+00 : f32
      %16 = vector.broadcast %cst_14 : f32 to vector<32x128xf32>
      %17 = arith.maximumf %15, %16 : vector<32x128xf32>
      %18 = arith.truncf %17 : vector<32x128xf32> to vector<32x128xbf16>
      %c0_15 = arith.constant 0 : index
      %c0_16 = arith.constant 0 : index
      %19 = vector.load %arg6[%c0_15, %c0_16] : memref<32x128xbf16, #tpu.memory_space<vmem>>, vector<32x128xbf16>
      tpu.vector_store %arg6[%c0_15, %c0_16], %18 {strides = array<i32>} : memref<32x128xbf16, #tpu.memory_space<vmem>>, vector<32x128xbf16>,
    } else {
    }
    return
  }
  func.func @transform_0(%arg0: i32, %arg1: i32, %arg2: i32) -> (i32, i32) {
    %c0_i32 = arith.constant 0 : i32
    return %arg0, %arg2 : i32, i32
  }
  func.func @transform_1(%arg0: i32, %arg1: i32, %arg2: i32) -> (i32, i32) {
    %c0_i32 = arith.constant 0 : i32
    return %arg2, %arg1 : i32, i32
  }
  func.func @transform_2(%arg0: i32, %arg1: i32, %arg2: i32) -> (i32, i32) {
    %c0_i32 = arith.constant 0 : i32
    %c0_i32_0 = arith.constant 0 : i32
    return %c0_i32, %arg1 : i32, i32
  }
  func.func @transform_3(%arg0: i32, %arg1: i32, %arg2: i32) -> (i32, i32) {
    %c0_i32 = arith.constant 0 : i32
    return %arg0, %arg1 : i32, i32
  }
}

module attributes {stable_mosaic.version = 11 : i64} {
  func.func @_masked_mean_kernel(%arg0: i32, %arg1: i32, %arg2: memref<1x16x16xf32, #tpu.memory_space<vmem>>, %arg3: memref<1x16x1xf32, #tpu.memory_space<vmem>>, %arg4: memref<1x1x16xf32, #tpu.memory_space<vmem>>, %arg5: memref<1x16xf32, #tpu.memory_space<vmem>>, %arg6: memref<1x1xf32, #tpu.memory_space<vmem>>) attributes {dimension_semantics = [#tpu.dimension_semantics<parallel>, #tpu.dimension_semantics<arbitrary>], iteration_bounds = array<i64: 2, 1>, scalar_prefetch = 0 : i64, scratch_operands = 2 : i64, tpu.core_type = #tpu.core_type<tc>, window_params = [{transform_indices = @transform_0, window_bounds = array<i64: 1, 16, 16>}, {transform_indices = @transform_1, window_bounds = array<i64: 1, 16, 1>}, {transform_indices = @transform_2, window_bounds = array<i64: 1, 1, 16>}]} {
    %c0_i32 = arith.constant 0 : i32
    %0 = arith.cmpi eq, %arg1, %c0_i32 : i32
    %1 = arith.extui %0 : i1 to i32
    %c0_i32_0 = arith.constant 0 : i32
    %2 = arith.cmpi ne, %1, %c0_i32_0 : i32
    scf.if %2 {
      %cst_17 = arith.constant 0.000000e+00 : f32
      %25 = vector.broadcast %cst_17 : f32 to vector<1x16xf32>
      %c0_18 = arith.constant 0 : index
      %c0_19 = arith.constant 0 : index
      %26 = vector.load %arg5[%c0_18, %c0_19] : memref<1x16xf32, #tpu.memory_space<vmem>>, vector<1x16xf32>
      tpu.vector_store %arg5[%c0_18, %c0_19], %25 {strides = array<i32>} : memref<1x16xf32, #tpu.memory_space<vmem>>, vector<1x16xf32>,
      %cst_20 = arith.constant 0.000000e+00 : f32
      %27 = vector.broadcast %cst_20 : f32 to vector<1x1xf32>
      %c0_21 = arith.constant 0 : index
      %c0_22 = arith.constant 0 : index
      %28 = vector.load %arg6[%c0_21, %c0_22] : memref<1x1xf32, #tpu.memory_space<vmem>>, vector<1x1xf32>
      tpu.vector_store %arg6[%c0_21, %c0_22], %27 {strides = array<i32>} : memref<1x1xf32, #tpu.memory_space<vmem>>, vector<1x1xf32>,
    } else {
    }
    %c0 = arith.constant 0 : index
    %c0_1 = arith.constant 0 : index
    %c0_2 = arith.constant 0 : index
    %3 = vector.load %arg2[%c0, %c0_1, %c0_2] : memref<1x16x16xf32, #tpu.memory_space<vmem>>, vector<1x16x16xf32>
    %4 = vector.shape_cast %3 : vector<1x16x16xf32> to vector<16x16xf32>
    %c0_3 = arith.constant 0 : index
    %c0_4 = arith.constant 0 : index
    %c0_5 = arith.constant 0 : index
    %5 = vector.load %arg3[%c0_3, %c0_4, %c0_5] : memref<1x16x1xf32, #tpu.memory_space<vmem>>, vector<1x16x1xf32>
    %6 = vector.shape_cast %5 : vector<1x16x1xf32> to vector<16x1xf32>
    %c0_6 = arith.constant 0 : index
    %c0_7 = arith.constant 0 : index
    %7 = vector.load %arg5[%c0_6, %c0_7] : memref<1x16xf32, #tpu.memory_space<vmem>>, vector<1x16xf32>
    %8 = vector.broadcast %6 : vector<16x1xf32> to vector<16x16xf32>
    %9 = arith.mulf %4, %8 : vector<16x16xf32>
    %cst = arith.constant dense<0.000000e+00> : vector<16xf32>
    %10 = vector.multi_reduction <add>, %9, %cst [0] : vector<16x16xf32> to vector<16xf32>
    %11 = vector.shape_cast %10 : vector<16xf32> to vector<1x16xf32>
    %12 = arith.addf %7, %11 : vector<1x16xf32>
    %c0_8 = arith.constant 0 : index
    %c0_9 = arith.constant 0 : index
    %13 = vector.load %arg5[%c0_8, %c0_9] : memref<1x16xf32, #tpu.memory_space<vmem>>, vector<1x16xf32>
    tpu.vector_store %arg5[%c0_8, %c0_9], %12 {strides = array<i32>} : memref<1x16xf32, #tpu.memory_space<vmem>>, vector<1x16xf32>,
    %c0_10 = arith.constant 0 : index
    %c0_11 = arith.constant 0 : index
    %14 = vector.load %arg6[%c0_10, %c0_11] : memref<1x1xf32, #tpu.memory_space<vmem>>, vector<1x1xf32>
    %15 = vector.shape_cast %6 : vector<16x1xf32> to vector<1x16x1xf32>
    %cst_12 = arith.constant dense<0.000000e+00> : vector<1xf32>
    %16 = vector.multi_reduction <add>, %15, %cst_12 [1, 2] : vector<1x16x1xf32> to vector<1xf32>
    %17 = vector.shape_cast %16 : vector<1xf32> to vector<1x1x1xf32>
    %18 = vector.extract %17[0, 0, 0] : f32 from vector<1x1x1xf32>
    %19 = vector.broadcast %18 : f32 to vector<1x1xf32>
    %20 = arith.addf %14, %19 : vector<1x1xf32>
    %c0_13 = arith.constant 0 : index
    %c0_14 = arith.constant 0 : index
    %21 = vector.load %arg6[%c0_13, %c0_14] : memref<1x1xf32, #tpu.memory_space<vmem>>, vector<1x1xf32>
    tpu.vector_store %arg6[%c0_13, %c0_14], %20 {strides = array<i32>} : memref<1x1xf32, #tpu.memory_space<vmem>>, vector<1x1xf32>,
    %c0_i32_15 = arith.constant 0 : i32
    %22 = arith.cmpi eq, %arg1, %c0_i32_15 : i32
    %23 = arith.extui %22 : i1 to i32
    %c0_i32_16 = arith.constant 0 : i32
    %24 = arith.cmpi ne, %23, %c0_i32_16 : i32
    scf.if %24 {
      %c0_17 = arith.constant 0 : index
      %c0_18 = arith.constant 0 : index
      %25 = vector.load %arg6[%c0_17, %c0_18] : memref<1x1xf32, #tpu.memory_space<vmem>>, vector<1x1xf32>
      %cst_19 = arith.constant 1.000000e+00 : f32
      %26 = vector.broadcast %cst_19 : f32 to vector<1x1xf32>
      %27 = arith.maximumf %25, %26 : vector<1x1xf32>
      %c0_20 = arith.constant 0 : index
      %c0_21 = arith.constant 0 : index
      %28 = vector.load %arg5[%c0_20, %c0_21] : memref<1x16xf32, #tpu.memory_space<vmem>>, vector<1x16xf32>
      %29 = vector.broadcast %27 : vector<1x1xf32> to vector<1x16xf32>
      %30 = arith.divf %28, %29 : vector<1x16xf32>
      %c0_22 = arith.constant 0 : index
      %c0_23 = arith.constant 0 : index
      %c0_24 = arith.constant 0 : index
      %31 = vector.load %arg4[%c0_22, %c0_23, %c0_24] : memref<1x1x16xf32, #tpu.memory_space<vmem>>, vector<1x1x16xf32>
      %32 = vector.shape_cast %31 : vector<1x1x16xf32> to vector<1x16xf32>
      %33 = vector.shape_cast %30 : vector<1x16xf32> to vector<1x1x16xf32>
      tpu.vector_store %arg4[%c0_22, %c0_23, %c0_24], %33 {strides = array<i32>} : memref<1x1x16xf32, #tpu.memory_space<vmem>>, vector<1x1x16xf32>,
    } else {
    }
    return
  }
  func.func @transform_0(%arg0: i32, %arg1: i32) -> (i32, i32, i32) {
    %c0_i32 = arith.constant 0 : i32
    %c0_i32_0 = arith.constant 0 : i32
    return %arg0, %arg1, %c0_i32 : i32, i32, i32
  }
  func.func @transform_1(%arg0: i32, %arg1: i32) -> (i32, i32, i32) {
    %c0_i32 = arith.constant 0 : i32
    %c0_i32_0 = arith.constant 0 : i32
    return %arg0, %arg1, %c0_i32 : i32, i32, i32
  }
  func.func @transform_2(%arg0: i32, %arg1: i32) -> (i32, i32, i32) {
    %c0_i32 = arith.constant 0 : i32
    %c0_i32_0 = arith.constant 0 : i32
    %c0_i32_1 = arith.constant 0 : i32
    return %arg0, %c0_i32, %c0_i32_0 : i32, i32, i32
  }
}

module attributes {stable_mosaic.version = 11 : i64} {
  func.func @_matmul_kernel(%arg0: i32, %arg1: i32, %arg2: i32, %arg3: memref<8x128xbf16, #tpu.memory_space<vmem>>, %arg4: memref<128x128xbf16, #tpu.memory_space<vmem>>, %arg5: memref<1x128xf32, #tpu.memory_space<vmem>>, %arg6: memref<8x128xbf16, #tpu.memory_space<vmem>>, %arg7: memref<8x128xf32, #tpu.memory_space<vmem>>) attributes {dimension_semantics = [#tpu.dimension_semantics<parallel>, #tpu.dimension_semantics<parallel>, #tpu.dimension_semantics<arbitrary>], iteration_bounds = array<i64: 1, 1, 1>, scalar_prefetch = 0 : i64, scratch_operands = 1 : i64, tpu.core_type = #tpu.core_type<tc>, window_params = [{transform_indices = @transform_0, window_bounds = array<i64: 8, 128>}, {transform_indices = @transform_1, window_bounds = array<i64: 128, 128>}, {transform_indices = @transform_2, window_bounds = array<i64: 1, 128>}, {transform_indices = @transform_3, window_bounds = array<i64: 8, 128>}]} {
    %c0_i32 = arith.constant 0 : i32
    %0 = arith.cmpi eq, %arg2, %c0_i32 : i32
    %1 = arith.extui %0 : i1 to i32
    %c0_i32_0 = arith.constant 0 : i32
    %2 = arith.cmpi ne, %1, %c0_i32_0 : i32
    scf.if %2 {
      %cst_10 = arith.constant 0.000000e+00 : f32
      %12 = vector.broadcast %cst_10 : f32 to vector<8x128xf32>
      %c0_11 = arith.constant 0 : index
      %c0_12 = arith.constant 0 : index
      %13 = vector.load %arg7[%c0_11, %c0_12] : memref<8x128xf32, #tpu.memory_space<vmem>>, vector<8x128xf32>
      tpu.vector_store %arg7[%c0_11, %c0_12], %12 {strides = array<i32>} : memref<8x128xf32, #tpu.memory_space<vmem>>, vector<8x128xf32>,
    } else {
    }
    %c0 = arith.constant 0 : index
    %c0_1 = arith.constant 0 : index
    %3 = vector.load %arg7[%c0, %c0_1] : memref<8x128xf32, #tpu.memory_space<vmem>>, vector<8x128xf32>
    %c0_2 = arith.constant 0 : index
    %c0_3 = arith.constant 0 : index
    %4 = vector.load %arg3[%c0_2, %c0_3] : memref<8x128xbf16, #tpu.memory_space<vmem>>, vector<8x128xbf16>
    %c0_4 = arith.constant 0 : index
    %c0_5 = arith.constant 0 : index
    %5 = vector.load %arg4[%c0_4, %c0_5] : memref<128x128xbf16, #tpu.memory_space<vmem>>, vector<128x128xbf16>
    %cst = arith.constant dense<0.000000e+00> : vector<8x128xf32>
    %6 = tpu.matmul %4, %5, %cst {dimension_numbers = #tpu.dot_dimension_numbers<[1], [0], [0], [1], [0, 0, 1, 1], [], []>} : vector<8x128xbf16>, vector<128x128xbf16>, vector<8x128xf32> -> vector<8x128xf32>
    %7 = arith.addf %3, %6 : vector<8x128xf32>
    %c0_6 = arith.constant 0 : index
    %c0_7 = arith.constant 0 : index
    %8 = vector.load %arg7[%c0_6, %c0_7] : memref<8x128xf32, #tpu.memory_space<vmem>>, vector<8x128xf32>
    tpu.vector_store %arg7[%c0_6, %c0_7], %7 {strides = array<i32>} : memref<8x128xf32, #tpu.memory_space<vmem>>, vector<8x128xf32>,
    %c0_i32_8 = arith.constant 0 : i32
    %9 = arith.cmpi eq, %arg2, %c0_i32_8 : i32
    %10 = arith.extui %9 : i1 to i32
    %c0_i32_9 = arith.constant 0 : i32
    %11 = arith.cmpi ne, %10, %c0_i32_9 : i32
    scf.if %11 {
      %c0_10 = arith.constant 0 : index
      %c0_11 = arith.constant 0 : index
      %12 = vector.load %arg7[%c0_10, %c0_11] : memref<8x128xf32, #tpu.memory_space<vmem>>, vector<8x128xf32>
      %c0_12 = arith.constant 0 : index
      %c0_13 = arith.constant 0 : index
      %13 = vector.load %arg5[%c0_12, %c0_13] : memref<1x128xf32, #tpu.memory_space<vmem>>, vector<1x128xf32>
      %14 = vector.broadcast %13 : vector<1x128xf32> to vector<8x128xf32>
      %15 = arith.addf %12, %14 : vector<8x128xf32>
      %16 = arith.truncf %15 : vector<8x128xf32> to vector<8x128xbf16>
      %c0_14 = arith.constant 0 : index
      %c0_15 = arith.constant 0 : index
      %17 = vector.load %arg6[%c0_14, %c0_15] : memref<8x128xbf16, #tpu.memory_space<vmem>>, vector<8x128xbf16>
      tpu.vector_store %arg6[%c0_14, %c0_15], %16 {strides = array<i32>} : memref<8x128xbf16, #tpu.memory_space<vmem>>, vector<8x128xbf16>,
    } else {
    }
    return
  }
  func.func @transform_0(%arg0: i32, %arg1: i32, %arg2: i32) -> (i32, i32) {
    %c0_i32 = arith.constant 0 : i32
    return %arg0, %arg2 : i32, i32
  }
  func.func @transform_1(%arg0: i32, %arg1: i32, %arg2: i32) -> (i32, i32) {
    %c0_i32 = arith.constant 0 : i32
    return %arg2, %arg1 : i32, i32
  }
  func.func @transform_2(%arg0: i32, %arg1: i32, %arg2: i32) -> (i32, i32) {
    %c0_i32 = arith.constant 0 : i32
    %c0_i32_0 = arith.constant 0 : i32
    return %c0_i32, %arg1 : i32, i32
  }
  func.func @transform_3(%arg0: i32, %arg1: i32, %arg2: i32) -> (i32, i32) {
    %c0_i32 = arith.constant 0 : i32
    return %arg0, %arg1 : i32, i32
  }
}

module attributes {stable_mosaic.version = 11 : i64} {
  func.func @_conv1d_kernel(%arg0: i32, %arg1: i32, %arg2: i32, %arg3: memref<1x16x32xbf16, #tpu.memory_space<vmem>>, %arg4: memref<1x16x32xbf16, #tpu.memory_space<vmem>>, %arg5: memref<7x32x128xbf16, #tpu.memory_space<vmem>>, %arg6: memref<1x128xf32, #tpu.memory_space<vmem>>, %arg7: memref<1x16x128xbf16, #tpu.memory_space<vmem>>) attributes {dimension_semantics = [#tpu.dimension_semantics<parallel>, #tpu.dimension_semantics<parallel>, #tpu.dimension_semantics<parallel>], iteration_bounds = array<i64: 2, 1, 1>, scalar_prefetch = 0 : i64, scratch_operands = 0 : i64, tpu.core_type = #tpu.core_type<tc>, window_params = [{transform_indices = @transform_0, window_bounds = array<i64: 1, 16, 32>}, {transform_indices = @transform_1, window_bounds = array<i64: 1, 16, 32>}, {transform_indices = @transform_2, window_bounds = array<i64: 7, 32, 128>}, {transform_indices = @transform_3, window_bounds = array<i64: 1, 128>}, {transform_indices = @transform_4, window_bounds = array<i64: 1, 16, 128>}]} {
    %c0 = arith.constant 0 : index
    %c0_0 = arith.constant 0 : index
    %c0_1 = arith.constant 0 : index
    %0 = vector.load %arg3[%c0, %c0_0, %c0_1] : memref<1x16x32xbf16, #tpu.memory_space<vmem>>, vector<1x16x32xbf16>
    %1 = vector.shape_cast %0 : vector<1x16x32xbf16> to vector<16x32xbf16>
    %c0_2 = arith.constant 0 : index
    %c0_3 = arith.constant 0 : index
    %c0_4 = arith.constant 0 : index
    %2 = vector.load %arg4[%c0_2, %c0_3, %c0_4] : memref<1x16x32xbf16, #tpu.memory_space<vmem>>, vector<1x16x32xbf16>
    %3 = vector.shape_cast %2 : vector<1x16x32xbf16> to vector<16x32xbf16>
    %4 = tpu.concatenate %1, %3 in 0 : vector<16x32xbf16>, vector<16x32xbf16> -> vector<32x32xbf16>
    %c0_5 = arith.constant 0 : index
    %c0_6 = arith.constant 0 : index
    %c0_7 = arith.constant 0 : index
    %5 = vector.load %arg5[%c0_5, %c0_6, %c0_7] : memref<7x32x128xbf16, #tpu.memory_space<vmem>>, vector<7x32x128xbf16>
    %cst = arith.constant 0.000000e+00 : f32
    %6 = vector.broadcast %cst : f32 to vector<16x128xf32>
    %7 = vector.extract_strided_slice %4 {offsets = [0, 0], sizes = [16, 32], strides = [1, 1]} : vector<32x32xbf16> to vector<16x32xbf16>
    %8 = vector.extract_strided_slice %5 {offsets = [0, 0, 0], sizes = [1, 32, 128], strides = [1, 1, 1]} : vector<7x32x128xbf16> to vector<1x32x128xbf16>
    %9 = vector.shape_cast %8 : vector<1x32x128xbf16> to vector<32x128xbf16>
    %cst_8 = arith.constant dense<0.000000e+00> : vector<16x128xf32>
    %10 = tpu.matmul %7, %9, %cst_8 {dimension_numbers = #tpu.dot_dimension_numbers<[1], [0], [0], [1], [0, 0, 1, 1], [], []>} : vector<16x32xbf16>, vector<32x128xbf16>, vector<16x128xf32> -> vector<16x128xf32>
    %11 = arith.addf %6, %10 : vector<16x128xf32>
    %12 = vector.extract_strided_slice %4 {offsets = [1, 0], sizes = [16, 32], strides = [1, 1]} : vector<32x32xbf16> to vector<16x32xbf16>
    %13 = vector.extract_strided_slice %5 {offsets = [1, 0, 0], sizes = [1, 32, 128], strides = [1, 1, 1]} : vector<7x32x128xbf16> to vector<1x32x128xbf16>
    %14 = vector.shape_cast %13 : vector<1x32x128xbf16> to vector<32x128xbf16>
    %cst_9 = arith.constant dense<0.000000e+00> : vector<16x128xf32>
    %15 = tpu.matmul %12, %14, %cst_9 {dimension_numbers = #tpu.dot_dimension_numbers<[1], [0], [0], [1], [0, 0, 1, 1], [], []>} : vector<16x32xbf16>, vector<32x128xbf16>, vector<16x128xf32> -> vector<16x128xf32>
    %16 = arith.addf %11, %15 : vector<16x128xf32>
    %17 = vector.extract_strided_slice %4 {offsets = [2, 0], sizes = [16, 32], strides = [1, 1]} : vector<32x32xbf16> to vector<16x32xbf16>
    %18 = vector.extract_strided_slice %5 {offsets = [2, 0, 0], sizes = [1, 32, 128], strides = [1, 1, 1]} : vector<7x32x128xbf16> to vector<1x32x128xbf16>
    %19 = vector.shape_cast %18 : vector<1x32x128xbf16> to vector<32x128xbf16>
    %cst_10 = arith.constant dense<0.000000e+00> : vector<16x128xf32>
    %20 = tpu.matmul %17, %19, %cst_10 {dimension_numbers = #tpu.dot_dimension_numbers<[1], [0], [0], [1], [0, 0, 1, 1], [], []>} : vector<16x32xbf16>, vector<32x128xbf16>, vector<16x128xf32> -> vector<16x128xf32>
    %21 = arith.addf %16, %20 : vector<16x128xf32>
    %22 = vector.extract_strided_slice %4 {offsets = [3, 0], sizes = [16, 32], strides = [1, 1]} : vector<32x32xbf16> to vector<16x32xbf16>
    %23 = vector.extract_strided_slice %5 {offsets = [3, 0, 0], sizes = [1, 32, 128], strides = [1, 1, 1]} : vector<7x32x128xbf16> to vector<1x32x128xbf16>
    %24 = vector.shape_cast %23 : vector<1x32x128xbf16> to vector<32x128xbf16>
    %cst_11 = arith.constant dense<0.000000e+00> : vector<16x128xf32>
    %25 = tpu.matmul %22, %24, %cst_11 {dimension_numbers = #tpu.dot_dimension_numbers<[1], [0], [0], [1], [0, 0, 1, 1], [], []>} : vector<16x32xbf16>, vector<32x128xbf16>, vector<16x128xf32> -> vector<16x128xf32>
    %26 = arith.addf %21, %25 : vector<16x128xf32>
    %27 = vector.extract_strided_slice %4 {offsets = [4, 0], sizes = [16, 32], strides = [1, 1]} : vector<32x32xbf16> to vector<16x32xbf16>
    %28 = vector.extract_strided_slice %5 {offsets = [4, 0, 0], sizes = [1, 32, 128], strides = [1, 1, 1]} : vector<7x32x128xbf16> to vector<1x32x128xbf16>
    %29 = vector.shape_cast %28 : vector<1x32x128xbf16> to vector<32x128xbf16>
    %cst_12 = arith.constant dense<0.000000e+00> : vector<16x128xf32>
    %30 = tpu.matmul %27, %29, %cst_12 {dimension_numbers = #tpu.dot_dimension_numbers<[1], [0], [0], [1], [0, 0, 1, 1], [], []>} : vector<16x32xbf16>, vector<32x128xbf16>, vector<16x128xf32> -> vector<16x128xf32>
    %31 = arith.addf %26, %30 : vector<16x128xf32>
    %32 = vector.extract_strided_slice %4 {offsets = [5, 0], sizes = [16, 32], strides = [1, 1]} : vector<32x32xbf16> to vector<16x32xbf16>
    %33 = vector.extract_strided_slice %5 {offsets = [5, 0, 0], sizes = [1, 32, 128], strides = [1, 1, 1]} : vector<7x32x128xbf16> to vector<1x32x128xbf16>
    %34 = vector.shape_cast %33 : vector<1x32x128xbf16> to vector<32x128xbf16>
    %cst_13 = arith.constant dense<0.000000e+00> : vector<16x128xf32>
    %35 = tpu.matmul %32, %34, %cst_13 {dimension_numbers = #tpu.dot_dimension_numbers<[1], [0], [0], [1], [0, 0, 1, 1], [], []>} : vector<16x32xbf16>, vector<32x128xbf16>, vector<16x128xf32> -> vector<16x128xf32>
    %36 = arith.addf %31, %35 : vector<16x128xf32>
    %37 = vector.extract_strided_slice %4 {offsets = [6, 0], sizes = [16, 32], strides = [1, 1]} : vector<32x32xbf16> to vector<16x32xbf16>
    %38 = vector.extract_strided_slice %5 {offsets = [6, 0, 0], sizes = [1, 32, 128], strides = [1, 1, 1]} : vector<7x32x128xbf16> to vector<1x32x128xbf16>
    %39 = vector.shape_cast %38 : vector<1x32x128xbf16> to vector<32x128xbf16>
    %cst_14 = arith.constant dense<0.000000e+00> : vector<16x128xf32>
    %40 = tpu.matmul %37, %39, %cst_14 {dimension_numbers = #tpu.dot_dimension_numbers<[1], [0], [0], [1], [0, 0, 1, 1], [], []>} : vector<16x32xbf16>, vector<32x128xbf16>, vector<16x128xf32> -> vector<16x128xf32>
    %41 = arith.addf %36, %40 : vector<16x128xf32>
    %c0_15 = arith.constant 0 : index
    %c0_16 = arith.constant 0 : index
    %42 = vector.load %arg6[%c0_15, %c0_16] : memref<1x128xf32, #tpu.memory_space<vmem>>, vector<1x128xf32>
    %43 = vector.broadcast %42 : vector<1x128xf32> to vector<16x128xf32>
    %44 = arith.addf %41, %43 : vector<16x128xf32>
    %cst_17 = arith.constant 0.000000e+00 : f32
    %45 = vector.broadcast %cst_17 : f32 to vector<16x128xf32>
    %46 = arith.cmpf ogt, %44, %45 : vector<16x128xf32>
    %cst_18 = arith.constant 1.000000e-01 : f32
    %47 = vector.broadcast %cst_18 : f32 to vector<16x128xf32>
    %48 = arith.mulf %47, %44 : vector<16x128xf32>
    %49 = arith.select %46, %44, %48 : vector<16x128xi1>, vector<16x128xf32>
    %50 = arith.truncf %49 : vector<16x128xf32> to vector<16x128xbf16>
    %c0_19 = arith.constant 0 : index
    %c0_20 = arith.constant 0 : index
    %c0_21 = arith.constant 0 : index
    %51 = vector.load %arg7[%c0_19, %c0_20, %c0_21] : memref<1x16x128xbf16, #tpu.memory_space<vmem>>, vector<1x16x128xbf16>
    %52 = vector.shape_cast %51 : vector<1x16x128xbf16> to vector<16x128xbf16>
    %53 = vector.shape_cast %50 : vector<16x128xbf16> to vector<1x16x128xbf16>
    tpu.vector_store %arg7[%c0_19, %c0_20, %c0_21], %53 {strides = array<i32>} : memref<1x16x128xbf16, #tpu.memory_space<vmem>>, vector<1x16x128xbf16>,
    return
  }
  func.func @transform_0(%arg0: i32, %arg1: i32, %arg2: i32) -> (i32, i32, i32) {
    %c0_i32 = arith.constant 0 : i32
    %c0_i32_0 = arith.constant 0 : i32
    return %arg0, %arg1, %c0_i32 : i32, i32, i32
  }
  func.func @transform_1(%arg0: i32, %arg1: i32, %arg2: i32) -> (i32, i32, i32) {
    %c1_i32 = arith.constant 1 : i32
    %0 = arith.addi %arg1, %c1_i32 : i32
    %c0_i32 = arith.constant 0 : i32
    %c0_i32_0 = arith.constant 0 : i32
    return %arg0, %0, %c0_i32 : i32, i32, i32
  }
  func.func @transform_2(%arg0: i32, %arg1: i32, %arg2: i32) -> (i32, i32, i32) {
    %c0_i32 = arith.constant 0 : i32
    %c0_i32_0 = arith.constant 0 : i32
    %c0_i32_1 = arith.constant 0 : i32
    return %c0_i32, %c0_i32_0, %arg2 : i32, i32, i32
  }
  func.func @transform_3(%arg0: i32, %arg1: i32, %arg2: i32) -> (i32, i32) {
    %c0_i32 = arith.constant 0 : i32
    %c0_i32_0 = arith.constant 0 : i32
    return %c0_i32, %arg2 : i32, i32
  }
  func.func @transform_4(%arg0: i32, %arg1: i32, %arg2: i32) -> (i32, i32, i32) {
    %c0_i32 = arith.constant 0 : i32
    return %arg0, %arg1, %arg2 : i32, i32, i32
  }
}

module attributes {stable_mosaic.version = 11 : i64} {
  func.func @_conv1d_kernel(%arg0: i32, %arg1: i32, %arg2: i32, %arg3: memref<1x16x32xbf16, #tpu.memory_space<vmem>>, %arg4: memref<1x16x32xbf16, #tpu.memory_space<vmem>>, %arg5: memref<3x32x128xbf16, #tpu.memory_space<vmem>>, %arg6: memref<1x128xf32, #tpu.memory_space<vmem>>, %arg7: memref<1x32x128xbf16, #tpu.memory_space<vmem>>) attributes {dimension_semantics = [#tpu.dimension_semantics<parallel>, #tpu.dimension_semantics<parallel>, #tpu.dimension_semantics<parallel>], iteration_bounds = array<i64: 2, 1, 1>, scalar_prefetch = 0 : i64, scratch_operands = 0 : i64, tpu.core_type = #tpu.core_type<tc>, window_params = [{transform_indices = @transform_0, window_bounds = array<i64: 1, 16, 32>}, {transform_indices = @transform_1, window_bounds = array<i64: 1, 16, 32>}, {transform_indices = @transform_2, window_bounds = array<i64: 3, 32, 128>}, {transform_indices = @transform_3, window_bounds = array<i64: 1, 128>}, {transform_indices = @transform_4, window_bounds = array<i64: 1, 32, 128>}]} {
    %c0 = arith.constant 0 : index
    %c0_0 = arith.constant 0 : index
    %c0_1 = arith.constant 0 : index
    %0 = vector.load %arg3[%c0, %c0_0, %c0_1] : memref<1x16x32xbf16, #tpu.memory_space<vmem>>, vector<1x16x32xbf16>
    %1 = vector.shape_cast %0 : vector<1x16x32xbf16> to vector<16x32xbf16>
    %c0_2 = arith.constant 0 : index
    %c0_3 = arith.constant 0 : index
    %c0_4 = arith.constant 0 : index
    %2 = vector.load %arg4[%c0_2, %c0_3, %c0_4] : memref<1x16x32xbf16, #tpu.memory_space<vmem>>, vector<1x16x32xbf16>
    %3 = vector.shape_cast %2 : vector<1x16x32xbf16> to vector<16x32xbf16>
    %4 = tpu.concatenate %1, %3 in 0 : vector<16x32xbf16>, vector<16x32xbf16> -> vector<32x32xbf16>
    %5 = vector.shape_cast %4 : vector<32x32xbf16> to vector<32x1x32xbf16>
    %6 = vector.shape_cast %5 : vector<32x1x32xbf16> to vector<32x1x32xbf16>
    %7 = vector.broadcast %6 : vector<32x1x32xbf16> to vector<32x2x32xbf16>
    %8 = vector.shape_cast %7 : vector<32x2x32xbf16> to vector<64x32xbf16>
    %c0_5 = arith.constant 0 : index
    %c0_6 = arith.constant 0 : index
    %c0_7 = arith.constant 0 : index
    %9 = vector.load %arg5[%c0_5, %c0_6, %c0_7] : memref<3x32x128xbf16, #tpu.memory_space<vmem>>, vector<3x32x128xbf16>
    %cst = arith.constant 0.000000e+00 : f32
    %10 = vector.broadcast %cst : f32 to vector<32x128xf32>
    %11 = vector.extract_strided_slice %8 {offsets = [1, 0], sizes = [32, 32], strides = [1, 1]} : vector<64x32xbf16> to vector<32x32xbf16>
    %12 = vector.extract_strided_slice %9 {offsets = [0, 0, 0], sizes = [1, 32, 128], strides = [1, 1, 1]} : vector<3x32x128xbf16> to vector<1x32x128xbf16>
    %13 = vector.shape_cast %12 : vector<1x32x128xbf16> to vector<32x128xbf16>
    %cst_8 = arith.constant dense<0.000000e+00> : vector<32x128xf32>
    %14 = tpu.matmul %11, %13, %cst_8 {dimension_numbers = #tpu.dot_dimension_numbers<[1], [0], [0], [1], [0, 0, 1, 1], [], []>} : vector<32x32xbf16>, vector<32x128xbf16>, vector<32x128xf32> -> vector<32x128xf32>
    %15 = arith.addf %10, %14 : vector<32x128xf32>
    %16 = vector.extract_strided_slice %8 {offsets = [2, 0], sizes = [32, 32], strides = [1, 1]} : vector<64x32xbf16> to vector<32x32xbf16>
    %17 = vector.extract_strided_slice %9 {offsets = [1, 0, 0], sizes = [1, 32, 128], strides = [1, 1, 1]} : vector<3x32x128xbf16> to vector<1x32x128xbf16>
    %18 = vector.shape_cast %17 : vector<1x32x128xbf16> to vector<32x128xbf16>
    %cst_9 = arith.constant dense<0.000000e+00> : vector<32x128xf32>
    %19 = tpu.matmul %16, %18, %cst_9 {dimension_numbers = #tpu.dot_dimension_numbers<[1], [0], [0], [1], [0, 0, 1, 1], [], []>} : vector<32x32xbf16>, vector<32x128xbf16>, vector<32x128xf32> -> vector<32x128xf32>
    %20 = arith.addf %15, %19 : vector<32x128xf32>
    %21 = vector.extract_strided_slice %8 {offsets = [3, 0], sizes = [32, 32], strides = [1, 1]} : vector<64x32xbf16> to vector<32x32xbf16>
    %22 = vector.extract_strided_slice %9 {offsets = [2, 0, 0], sizes = [1, 32, 128], strides = [1, 1, 1]} : vector<3x32x128xbf16> to vector<1x32x128xbf16>
    %23 = vector.shape_cast %22 : vector<1x32x128xbf16> to vector<32x128xbf16>
    %cst_10 = arith.constant dense<0.000000e+00> : vector<32x128xf32>
    %24 = tpu.matmul %21, %23, %cst_10 {dimension_numbers = #tpu.dot_dimension_numbers<[1], [0], [0], [1], [0, 0, 1, 1], [], []>} : vector<32x32xbf16>, vector<32x128xbf16>, vector<32x128xf32> -> vector<32x128xf32>
    %25 = arith.addf %20, %24 : vector<32x128xf32>
    %c0_11 = arith.constant 0 : index
    %c0_12 = arith.constant 0 : index
    %26 = vector.load %arg6[%c0_11, %c0_12] : memref<1x128xf32, #tpu.memory_space<vmem>>, vector<1x128xf32>
    %27 = vector.broadcast %26 : vector<1x128xf32> to vector<32x128xf32>
    %28 = arith.addf %25, %27 : vector<32x128xf32>
    %cst_13 = arith.constant 0.000000e+00 : f32
    %29 = vector.broadcast %cst_13 : f32 to vector<32x128xf32>
    %30 = arith.cmpf ogt, %28, %29 : vector<32x128xf32>
    %cst_14 = arith.constant 1.000000e-01 : f32
    %31 = vector.broadcast %cst_14 : f32 to vector<32x128xf32>
    %32 = arith.mulf %31, %28 : vector<32x128xf32>
    %33 = arith.select %30, %28, %32 : vector<32x128xi1>, vector<32x128xf32>
    %34 = arith.truncf %33 : vector<32x128xf32> to vector<32x128xbf16>
    %c0_15 = arith.constant 0 : index
    %c0_16 = arith.constant 0 : index
    %c0_17 = arith.constant 0 : index
    %35 = vector.load %arg7[%c0_15, %c0_16, %c0_17] : memref<1x32x128xbf16, #tpu.memory_space<vmem>>, vector<1x32x128xbf16>
    %36 = vector.shape_cast %35 : vector<1x32x128xbf16> to vector<32x128xbf16>
    %37 = vector.shape_cast %34 : vector<32x128xbf16> to vector<1x32x128xbf16>
    tpu.vector_store %arg7[%c0_15, %c0_16, %c0_17], %37 {strides = array<i32>} : memref<1x32x128xbf16, #tpu.memory_space<vmem>>, vector<1x32x128xbf16>,
    return
  }
  func.func @transform_0(%arg0: i32, %arg1: i32, %arg2: i32) -> (i32, i32, i32) {
    %c0_i32 = arith.constant 0 : i32
    %c0_i32_0 = arith.constant 0 : i32
    return %arg0, %arg1, %c0_i32 : i32, i32, i32
  }
  func.func @transform_1(%arg0: i32, %arg1: i32, %arg2: i32) -> (i32, i32, i32) {
    %c1_i32 = arith.constant 1 : i32
    %0 = arith.addi %arg1, %c1_i32 : i32
    %c0_i32 = arith.constant 0 : i32
    %c0_i32_0 = arith.constant 0 : i32
    return %arg0, %0, %c0_i32 : i32, i32, i32
  }
  func.func @transform_2(%arg0: i32, %arg1: i32, %arg2: i32) -> (i32, i32, i32) {
    %c0_i32 = arith.constant 0 : i32
    %c0_i32_0 = arith.constant 0 : i32
    %c0_i32_1 = arith.constant 0 : i32
    return %c0_i32, %c0_i32_0, %arg2 : i32, i32, i32
  }
  func.func @transform_3(%arg0: i32, %arg1: i32, %arg2: i32) -> (i32, i32) {
    %c0_i32 = arith.constant 0 : i32
    %c0_i32_0 = arith.constant 0 : i32
    return %c0_i32, %arg2 : i32, i32
  }
  func.func @transform_4(%arg0: i32, %arg1: i32, %arg2: i32) -> (i32, i32, i32) {
    %c0_i32 = arith.constant 0 : i32
    return %arg0, %arg1, %arg2 : i32, i32, i32
  }
}

module attributes {stable_mosaic.version = 11 : i64} {
  func.func @_conv1d_kernel(%arg0: i32, %arg1: i32, %arg2: i32, %arg3: memref<1x32x32xbf16, #tpu.memory_space<vmem>>, %arg4: memref<1x32x32xbf16, #tpu.memory_space<vmem>>, %arg5: memref<7x32x128xbf16, #tpu.memory_space<vmem>>, %arg6: memref<1x128xf32, #tpu.memory_space<vmem>>, %arg7: memref<1x32x128xf32, #tpu.memory_space<vmem>>) attributes {dimension_semantics = [#tpu.dimension_semantics<parallel>, #tpu.dimension_semantics<parallel>, #tpu.dimension_semantics<parallel>], iteration_bounds = array<i64: 2, 1, 1>, scalar_prefetch = 0 : i64, scratch_operands = 0 : i64, tpu.core_type = #tpu.core_type<tc>, window_params = [{transform_indices = @transform_0, window_bounds = array<i64: 1, 32, 32>}, {transform_indices = @transform_1, window_bounds = array<i64: 1, 32, 32>}, {transform_indices = @transform_2, window_bounds = array<i64: 7, 32, 128>}, {transform_indices = @transform_3, window_bounds = array<i64: 1, 128>}, {transform_indices = @transform_4, window_bounds = array<i64: 1, 32, 128>}]} {
    %c0 = arith.constant 0 : index
    %c0_0 = arith.constant 0 : index
    %c0_1 = arith.constant 0 : index
    %0 = vector.load %arg3[%c0, %c0_0, %c0_1] : memref<1x32x32xbf16, #tpu.memory_space<vmem>>, vector<1x32x32xbf16>
    %1 = vector.shape_cast %0 : vector<1x32x32xbf16> to vector<32x32xbf16>
    %c0_2 = arith.constant 0 : index
    %c0_3 = arith.constant 0 : index
    %c0_4 = arith.constant 0 : index
    %2 = vector.load %arg4[%c0_2, %c0_3, %c0_4] : memref<1x32x32xbf16, #tpu.memory_space<vmem>>, vector<1x32x32xbf16>
    %3 = vector.shape_cast %2 : vector<1x32x32xbf16> to vector<32x32xbf16>
    %4 = tpu.concatenate %1, %3 in 0 : vector<32x32xbf16>, vector<32x32xbf16> -> vector<64x32xbf16>
    %c0_5 = arith.constant 0 : index
    %c0_6 = arith.constant 0 : index
    %c0_7 = arith.constant 0 : index
    %5 = vector.load %arg5[%c0_5, %c0_6, %c0_7] : memref<7x32x128xbf16, #tpu.memory_space<vmem>>, vector<7x32x128xbf16>
    %cst = arith.constant 0.000000e+00 : f32
    %6 = vector.broadcast %cst : f32 to vector<32x128xf32>
    %7 = vector.extract_strided_slice %4 {offsets = [0, 0], sizes = [32, 32], strides = [1, 1]} : vector<64x32xbf16> to vector<32x32xbf16>
    %8 = vector.extract_strided_slice %5 {offsets = [0, 0, 0], sizes = [1, 32, 128], strides = [1, 1, 1]} : vector<7x32x128xbf16> to vector<1x32x128xbf16>
    %9 = vector.shape_cast %8 : vector<1x32x128xbf16> to vector<32x128xbf16>
    %cst_8 = arith.constant dense<0.000000e+00> : vector<32x128xf32>
    %10 = tpu.matmul %7, %9, %cst_8 {dimension_numbers = #tpu.dot_dimension_numbers<[1], [0], [0], [1], [0, 0, 1, 1], [], []>} : vector<32x32xbf16>, vector<32x128xbf16>, vector<32x128xf32> -> vector<32x128xf32>
    %11 = arith.addf %6, %10 : vector<32x128xf32>
    %12 = vector.extract_strided_slice %4 {offsets = [1, 0], sizes = [32, 32], strides = [1, 1]} : vector<64x32xbf16> to vector<32x32xbf16>
    %13 = vector.extract_strided_slice %5 {offsets = [1, 0, 0], sizes = [1, 32, 128], strides = [1, 1, 1]} : vector<7x32x128xbf16> to vector<1x32x128xbf16>
    %14 = vector.shape_cast %13 : vector<1x32x128xbf16> to vector<32x128xbf16>
    %cst_9 = arith.constant dense<0.000000e+00> : vector<32x128xf32>
    %15 = tpu.matmul %12, %14, %cst_9 {dimension_numbers = #tpu.dot_dimension_numbers<[1], [0], [0], [1], [0, 0, 1, 1], [], []>} : vector<32x32xbf16>, vector<32x128xbf16>, vector<32x128xf32> -> vector<32x128xf32>
    %16 = arith.addf %11, %15 : vector<32x128xf32>
    %17 = vector.extract_strided_slice %4 {offsets = [2, 0], sizes = [32, 32], strides = [1, 1]} : vector<64x32xbf16> to vector<32x32xbf16>
    %18 = vector.extract_strided_slice %5 {offsets = [2, 0, 0], sizes = [1, 32, 128], strides = [1, 1, 1]} : vector<7x32x128xbf16> to vector<1x32x128xbf16>
    %19 = vector.shape_cast %18 : vector<1x32x128xbf16> to vector<32x128xbf16>
    %cst_10 = arith.constant dense<0.000000e+00> : vector<32x128xf32>
    %20 = tpu.matmul %17, %19, %cst_10 {dimension_numbers = #tpu.dot_dimension_numbers<[1], [0], [0], [1], [0, 0, 1, 1], [], []>} : vector<32x32xbf16>, vector<32x128xbf16>, vector<32x128xf32> -> vector<32x128xf32>
    %21 = arith.addf %16, %20 : vector<32x128xf32>
    %22 = vector.extract_strided_slice %4 {offsets = [3, 0], sizes = [32, 32], strides = [1, 1]} : vector<64x32xbf16> to vector<32x32xbf16>
    %23 = vector.extract_strided_slice %5 {offsets = [3, 0, 0], sizes = [1, 32, 128], strides = [1, 1, 1]} : vector<7x32x128xbf16> to vector<1x32x128xbf16>
    %24 = vector.shape_cast %23 : vector<1x32x128xbf16> to vector<32x128xbf16>
    %cst_11 = arith.constant dense<0.000000e+00> : vector<32x128xf32>
    %25 = tpu.matmul %22, %24, %cst_11 {dimension_numbers = #tpu.dot_dimension_numbers<[1], [0], [0], [1], [0, 0, 1, 1], [], []>} : vector<32x32xbf16>, vector<32x128xbf16>, vector<32x128xf32> -> vector<32x128xf32>
    %26 = arith.addf %21, %25 : vector<32x128xf32>
    %27 = vector.extract_strided_slice %4 {offsets = [4, 0], sizes = [32, 32], strides = [1, 1]} : vector<64x32xbf16> to vector<32x32xbf16>
    %28 = vector.extract_strided_slice %5 {offsets = [4, 0, 0], sizes = [1, 32, 128], strides = [1, 1, 1]} : vector<7x32x128xbf16> to vector<1x32x128xbf16>
    %29 = vector.shape_cast %28 : vector<1x32x128xbf16> to vector<32x128xbf16>
    %cst_12 = arith.constant dense<0.000000e+00> : vector<32x128xf32>
    %30 = tpu.matmul %27, %29, %cst_12 {dimension_numbers = #tpu.dot_dimension_numbers<[1], [0], [0], [1], [0, 0, 1, 1], [], []>} : vector<32x32xbf16>, vector<32x128xbf16>, vector<32x128xf32> -> vector<32x128xf32>
    %31 = arith.addf %26, %30 : vector<32x128xf32>
    %32 = vector.extract_strided_slice %4 {offsets = [5, 0], sizes = [32, 32], strides = [1, 1]} : vector<64x32xbf16> to vector<32x32xbf16>
    %33 = vector.extract_strided_slice %5 {offsets = [5, 0, 0], sizes = [1, 32, 128], strides = [1, 1, 1]} : vector<7x32x128xbf16> to vector<1x32x128xbf16>
    %34 = vector.shape_cast %33 : vector<1x32x128xbf16> to vector<32x128xbf16>
    %cst_13 = arith.constant dense<0.000000e+00> : vector<32x128xf32>
    %35 = tpu.matmul %32, %34, %cst_13 {dimension_numbers = #tpu.dot_dimension_numbers<[1], [0], [0], [1], [0, 0, 1, 1], [], []>} : vector<32x32xbf16>, vector<32x128xbf16>, vector<32x128xf32> -> vector<32x128xf32>
    %36 = arith.addf %31, %35 : vector<32x128xf32>
    %37 = vector.extract_strided_slice %4 {offsets = [6, 0], sizes = [32, 32], strides = [1, 1]} : vector<64x32xbf16> to vector<32x32xbf16>
    %38 = vector.extract_strided_slice %5 {offsets = [6, 0, 0], sizes = [1, 32, 128], strides = [1, 1, 1]} : vector<7x32x128xbf16> to vector<1x32x128xbf16>
    %39 = vector.shape_cast %38 : vector<1x32x128xbf16> to vector<32x128xbf16>
    %cst_14 = arith.constant dense<0.000000e+00> : vector<32x128xf32>
    %40 = tpu.matmul %37, %39, %cst_14 {dimension_numbers = #tpu.dot_dimension_numbers<[1], [0], [0], [1], [0, 0, 1, 1], [], []>} : vector<32x32xbf16>, vector<32x128xbf16>, vector<32x128xf32> -> vector<32x128xf32>
    %41 = arith.addf %36, %40 : vector<32x128xf32>
    %c0_15 = arith.constant 0 : index
    %c0_16 = arith.constant 0 : index
    %42 = vector.load %arg6[%c0_15, %c0_16] : memref<1x128xf32, #tpu.memory_space<vmem>>, vector<1x128xf32>
    %43 = vector.broadcast %42 : vector<1x128xf32> to vector<32x128xf32>
    %44 = arith.addf %41, %43 : vector<32x128xf32>
    %45 = math.tanh %44 : vector<32x128xf32>
    %c0_17 = arith.constant 0 : index
    %c0_18 = arith.constant 0 : index
    %c0_19 = arith.constant 0 : index
    %46 = vector.load %arg7[%c0_17, %c0_18, %c0_19] : memref<1x32x128xf32, #tpu.memory_space<vmem>>, vector<1x32x128xf32>
    %47 = vector.shape_cast %46 : vector<1x32x128xf32> to vector<32x128xf32>
    %48 = vector.shape_cast %45 : vector<32x128xf32> to vector<1x32x128xf32>
    tpu.vector_store %arg7[%c0_17, %c0_18, %c0_19], %48 {strides = array<i32>} : memref<1x32x128xf32, #tpu.memory_space<vmem>>, vector<1x32x128xf32>,
    return
  }
  func.func @transform_0(%arg0: i32, %arg1: i32, %arg2: i32) -> (i32, i32, i32) {
    %c0_i32 = arith.constant 0 : i32
    %c0_i32_0 = arith.constant 0 : i32
    return %arg0, %arg1, %c0_i32 : i32, i32, i32
  }
  func.func @transform_1(%arg0: i32, %arg1: i32, %arg2: i32) -> (i32, i32, i32) {
    %c1_i32 = arith.constant 1 : i32
    %0 = arith.addi %arg1, %c1_i32 : i32
    %c0_i32 = arith.constant 0 : i32
    %c0_i32_0 = arith.constant 0 : i32
    return %arg0, %0, %c0_i32 : i32, i32, i32
  }
  func.func @transform_2(%arg0: i32, %arg1: i32, %arg2: i32) -> (i32, i32, i32) {
    %c0_i32 = arith.constant 0 : i32
    %c0_i32_0 = arith.constant 0 : i32
    %c0_i32_1 = arith.constant 0 : i32
    return %c0_i32, %c0_i32_0, %arg2 : i32, i32, i32
  }
  func.func @transform_3(%arg0: i32, %arg1: i32, %arg2: i32) -> (i32, i32) {
    %c0_i32 = arith.constant 0 : i32
    %c0_i32_0 = arith.constant 0 : i32
    return %c0_i32, %arg2 : i32, i32
  }
  func.func @transform_4(%arg0: i32, %arg1: i32, %arg2: i32) -> (i32, i32, i32) {
    %c0_i32 = arith.constant 0 : i32
    return %arg0, %arg1, %arg2 : i32, i32, i32
  }
}

module attributes {stable_mosaic.version = 11 : i64} {
  func.func @_matmul_kernel(%arg0: i32, %arg1: i32, %arg2: i32, %arg3: memref<32x128xbf16, #tpu.memory_space<vmem>>, %arg4: memref<128x128xbf16, #tpu.memory_space<vmem>>, %arg5: memref<1x128xf32, #tpu.memory_space<vmem>>, %arg6: memref<32x128xf32, #tpu.memory_space<vmem>>, %arg7: memref<32x128xf32, #tpu.memory_space<vmem>>) attributes {dimension_semantics = [#tpu.dimension_semantics<parallel>, #tpu.dimension_semantics<parallel>, #tpu.dimension_semantics<arbitrary>], iteration_bounds = array<i64: 1, 1, 1>, scalar_prefetch = 0 : i64, scratch_operands = 1 : i64, tpu.core_type = #tpu.core_type<tc>, window_params = [{transform_indices = @transform_0, window_bounds = array<i64: 32, 128>}, {transform_indices = @transform_1, window_bounds = array<i64: 128, 128>}, {transform_indices = @transform_2, window_bounds = array<i64: 1, 128>}, {transform_indices = @transform_3, window_bounds = array<i64: 32, 128>}]} {
    %c0_i32 = arith.constant 0 : i32
    %0 = arith.cmpi eq, %arg2, %c0_i32 : i32
    %1 = arith.extui %0 : i1 to i32
    %c0_i32_0 = arith.constant 0 : i32
    %2 = arith.cmpi ne, %1, %c0_i32_0 : i32
    scf.if %2 {
      %cst_10 = arith.constant 0.000000e+00 : f32
      %12 = vector.broadcast %cst_10 : f32 to vector<32x128xf32>
      %c0_11 = arith.constant 0 : index
      %c0_12 = arith.constant 0 : index
      %13 = vector.load %arg7[%c0_11, %c0_12] : memref<32x128xf32, #tpu.memory_space<vmem>>, vector<32x128xf32>
      tpu.vector_store %arg7[%c0_11, %c0_12], %12 {strides = array<i32>} : memref<32x128xf32, #tpu.memory_space<vmem>>, vector<32x128xf32>,
    } else {
    }
    %c0 = arith.constant 0 : index
    %c0_1 = arith.constant 0 : index
    %3 = vector.load %arg7[%c0, %c0_1] : memref<32x128xf32, #tpu.memory_space<vmem>>, vector<32x128xf32>
    %c0_2 = arith.constant 0 : index
    %c0_3 = arith.constant 0 : index
    %4 = vector.load %arg3[%c0_2, %c0_3] : memref<32x128xbf16, #tpu.memory_space<vmem>>, vector<32x128xbf16>
    %c0_4 = arith.constant 0 : index
    %c0_5 = arith.constant 0 : index
    %5 = vector.load %arg4[%c0_4, %c0_5] : memref<128x128xbf16, #tpu.memory_space<vmem>>, vector<128x128xbf16>
    %cst = arith.constant dense<0.000000e+00> : vector<32x128xf32>
    %6 = tpu.matmul %4, %5, %cst {dimension_numbers = #tpu.dot_dimension_numbers<[1], [0], [0], [1], [0, 0, 1, 1], [], []>} : vector<32x128xbf16>, vector<128x128xbf16>, vector<32x128xf32> -> vector<32x128xf32>
    %7 = arith.addf %3, %6 : vector<32x128xf32>
    %c0_6 = arith.constant 0 : index
    %c0_7 = arith.constant 0 : index
    %8 = vector.load %arg7[%c0_6, %c0_7] : memref<32x128xf32, #tpu.memory_space<vmem>>, vector<32x128xf32>
    tpu.vector_store %arg7[%c0_6, %c0_7], %7 {strides = array<i32>} : memref<32x128xf32, #tpu.memory_space<vmem>>, vector<32x128xf32>,
    %c0_i32_8 = arith.constant 0 : i32
    %9 = arith.cmpi eq, %arg2, %c0_i32_8 : i32
    %10 = arith.extui %9 : i1 to i32
    %c0_i32_9 = arith.constant 0 : i32
    %11 = arith.cmpi ne, %10, %c0_i32_9 : i32
    scf.if %11 {
      %c0_10 = arith.constant 0 : index
      %c0_11 = arith.constant 0 : index
      %12 = vector.load %arg7[%c0_10, %c0_11] : memref<32x128xf32, #tpu.memory_space<vmem>>, vector<32x128xf32>
      %c0_12 = arith.constant 0 : index
      %c0_13 = arith.constant 0 : index
      %13 = vector.load %arg5[%c0_12, %c0_13] : memref<1x128xf32, #tpu.memory_space<vmem>>, vector<1x128xf32>
      %14 = vector.broadcast %13 : vector<1x128xf32> to vector<32x128xf32>
      %15 = arith.addf %12, %14 : vector<32x128xf32>
      %c0_14 = arith.constant 0 : index
      %c0_15 = arith.constant 0 : index
      %16 = vector.load %arg6[%c0_14, %c0_15] : memref<32x128xf32, #tpu.memory_space<vmem>>, vector<32x128xf32>
      tpu.vector_store %arg6[%c0_14, %c0_15], %15 {strides = array<i32>} : memref<32x128xf32, #tpu.memory_space<vmem>>, vector<32x128xf32>,
    } else {
    }
    return
  }
  func.func @transform_0(%arg0: i32, %arg1: i32, %arg2: i32) -> (i32, i32) {
    %c0_i32 = arith.constant 0 : i32
    return %arg0, %arg2 : i32, i32
  }
  func.func @transform_1(%arg0: i32, %arg1: i32, %arg2: i32) -> (i32, i32) {
    %c0_i32 = arith.constant 0 : i32
    return %arg2, %arg1 : i32, i32
  }
  func.func @transform_2(%arg0: i32, %arg1: i32, %arg2: i32) -> (i32, i32) {
    %c0_i32 = arith.constant 0 : i32
    %c0_i32_0 = arith.constant 0 : i32
    return %c0_i32, %arg1 : i32, i32
  }
  func.func @transform_3(%arg0: i32, %arg1: i32, %arg2: i32) -> (i32, i32) {
    %c0_i32 = arith.constant 0 : i32
    return %arg0, %arg1 : i32, i32
  }
}

</mosaic_0001>

<bundles_post_ra>
// kernel: vec2wav2_forward.65
= control target key start
LH: loop header
LB: loop body
LE: loop exit
PB: predicated region body
PF: predicated region fallthrough
CT: control target
= control target key end

     0   :  { %s335_s1 = inlined_call_operand.vmem [shape: bf16[128,128], index: 1, kind: input, shape index: {}]   ;;  %s336_s0 = inlined_call_operand.vmem [shape: bf16[32,128], index: 0, kind: input, shape index: {}]   ;;  %s337_s2 = inlined_call_operand.vmem [shape: f32[1,128], index: 2, kind: input, shape index: {}]   ;;  %s338_s3 = inlined_call_operand.vmem [shape: bf16[32,128], index: 3, kind: output, shape index: {}]  }
   0x1   :  { %v266_v0 = vld [vmem:[%s335_s1 + $0x38] sm:$0xff]   ;;  %v267_v1 = vld [vmem:[%s335_s1 + $0x30] sm:$0xff]   ;;  %v268_v2 = vld [vmem:[%s335_s1 + $0x28] sm:$0xff]  }
   0x2   :  { %246 = vmatprep.subr.bf16.mxu0 %v266_v0  ;;  %v269_v3 = vld [vmem:[%s335_s1 + $0x20] sm:$0xff]   ;;  %v270_v5 = vld [vmem:[%s335_s1 + $0x18] sm:$0xff]   ;;  %v271_v6 = vld [vmem:[%s335_s1 + $0x10] sm:$0xff]  }
   0x3   :  { %247 = vmatpush3.bf16.msra.mxu0 %v266_v0  ;;  %v274_v4 = vld [vmem:[%s336_s0] sm:$0xff]   ;;  %v272_v7 = vld [vmem:[%s335_s1 + $0x8] sm:$0xff]  }
   0x4   :  { %248 = vmatprep.subr.bf16.mxu0 %v267_v1  ;;  %262 = vmatprep.mubr.bf16.mxu0 %v274_v4  ;;  %v273_v8 = vld [vmem:[%s335_s1] sm:$0xff]   ;;  %v275_v9 = vld [vmem:[%s336_s0 + $0x8] sm:$0xff]  }
   0x5   :  { %v216_v11 = vld [vmem:[%s337_s2] ss:$0 sm:$0xff] }
   0x7   :  { %249 = vmatpush3.bf16.msra.mxu0 %v267_v1 }
   0x8   :  { %250 = vmatprep.subr.bf16.mxu0 %v268_v2 }
   0xb   :  { %251 = vmatpush3.bf16.msra.mxu0 %v268_v2 }
   0xc   :  { %252 = vmatprep.subr.bf16.mxu0 %v269_v3 }
   0xf   :  { %253 = vmatpush3.bf16.msra.mxu0 %v269_v3 }
  0x10   :  { %254 = vmatprep.subr.bf16.mxu0 %v270_v5 }
  0x13   :  { %255 = vmatpush3.bf16.msra.mxu0 %v270_v5 }
  0x14   :  { %256 = vmatprep.subr.bf16.mxu0 %v271_v6 }
  0x17   :  { %257 = vmatpush3.bf16.msra.mxu0 %v271_v6 }
  0x18   :  { %258 = vmatprep.subr.bf16.mxu0 %v272_v7 }
  0x1b   :  { %259 = vmatpush3.bf16.msra.mxu0 %v272_v7 }
  0x1c   :  { %260 = vmatprep.subr.bf16.mxu0 %v273_v8 }
  0x1f   :  { %261 = vmatpush3.bf16.msra.mxu0 %v273_v8 }
  0x22   :  { %263 = vmatmul.mubr.bf16.vlgmr.msra.gmra.mxu0 %v275_v9 }
  0xe2   :  { %v264_v10 = vpop.f32.mrf.mxu0 }
  0xe3   :  { %v180_v14 = vadd.f32 %v264_v10, %v216_v11 }
  0xe4   :  { %v141_v12 = vpop.f32.mrf.mxu0 }
  0xe5   :  { %v178_v17 = vadd.f32 %v216_v11, %v141_v12 }
  0xe6   :  { %v265_v13 = vpop.f32.mrf.mxu0 }
  0xe7   :  { %v181_v15 = vadd.f32 %v265_v13, %v216_v11 }
  0xe8   :  { %v144_v16 = vpop.f32.mrf.mxu0 }
  0xe9   :  { %v233_v18 = vpack.c.bf16 %v181_v15, %v180_v14  ;;  %v179_v19 = vadd.f32 %v216_v11, %v144_v16 }
  0xeb   :  { %235 = vst [vmem:[%s338_s3 + $0x8] sm:$0xff] %v233_v18   ;;  %v228_v20 = vpack.c.bf16 %v179_v19, %v178_v17 }
  0xed   :  { %229 = vst [vmem:[%s338_s3] sm:$0xff] %v228_v20  }

// kernel: vec2wav2_forward.66
= control target key start
LH: loop header
LB: loop body
LE: loop exit
PB: predicated region body
PF: predicated region fallthrough
CT: control target
= control target key end

     0   :  { %vm22_vm0 = vcmask 261120   ;;  %vm114_vm1 = vcmask 257024   ;;  %s206_s0 = inlined_call_operand.vmem [shape: bf16[32,32], index: 0, kind: input, shape index: {}]   ;;  %s207_s1 = inlined_call_operand.vmem [shape: f32[1,32], index: 1, kind: input, shape index: {}]   ;;  %s208_s2 = inlined_call_operand.vmem [shape: f32[1,32], index: 2, kind: input, shape index: {}]   ;;  %s209_s3 = inlined_call_operand.vmem [shape: bf16[32,32], index: 3, kind: output, shape index: {}]  }
   0x1   :  { %v134_v0 = vld [vmem:[%s206_s0] sm:$0xff]   ;;  %v141_v1 = vld [vmem:[%s206_s0 + $0x8] sm:$0xff]  }
   0x2   :  { %v135_v2 = vunpack.c.l.bf16 %v134_v0  ;;  %v139_v3 = vunpack.c.l.bf16 %v141_v1  ;;  %v136_v4 = vunpack.c.h.bf16 %v134_v0  ;;  %v140_v5 = vunpack.c.h.bf16 %v141_v1  ;;  %v123_v43 = vld [vmem:[%s207_s1] ss:$0 sm:$0xff] }
   0x3   :  { %v124_v45 = vld [vmem:[%s208_s2] ss:$0 sm:$0xff] }
   0x4   :  { %v23_v6 = vsel %vm22_vm0, %v135_v2, 0.0  ;;  %v29_v7 = vsel %vm22_vm0, %v139_v3, 0.0  ;;  %v26_v8 = vsel %vm22_vm0, %v136_v4, 0.0  ;;  %v32_v9 = vsel %vm22_vm0, %v140_v5, 0.0 }
   0x5   :  { %24 = vadd.xlane.f32.xlu0 %v23_v6  ;;  %30 = vadd.xlane.f32.xlu1 %v29_v7 }
   0x9   :  { %27 = vadd.xlane.f32.xlu0 %v26_v8  ;;  %33 = vadd.xlane.f32.xlu1 %v32_v9 }
  0x8e   :  { %v25_v10 = vpop.xlane.xlu0 %24  ;;  %v31_v11 = vpop.xlane.xlu1 %30 }
  0x8f   :  { %v36_v12 = vmul.f32 0.03125, %v25_v10  ;;  %v38_v13 = vmul.f32 0.03125, %v31_v11 }
  0x91   :  { %v40_v14 = vsub.f32 %v135_v2, %v36_v12  ;;  %v42_v15 = vsub.f32 %v139_v3, %v38_v13 }
  0x92   :  { %v28_v16 = vpop.xlane.xlu0 %27  ;;  %v34_v17 = vpop.xlane.xlu1 %33 }
  0x93   :  { %v37_v18 = vmul.f32 0.03125, %v28_v16  ;;  %v39_v19 = vmul.f32 0.03125, %v34_v17  ;;  %v44_v20 = vmul.f32 %v40_v14, %v40_v14  ;;  %v46_v21 = vmul.f32 %v42_v15, %v42_v15 }
  0x95   :  { %v41_v22 = vsub.f32 %v136_v4, %v37_v18  ;;  %v43_v23 = vsub.f32 %v140_v5, %v39_v19  ;;  %v48_v24 = vsel %vm22_vm0, %v44_v20, 0.0  ;;  %v54_v25 = vsel %vm22_vm0, %v46_v21, 0.0 }
  0x96   :  { %49 = vadd.xlane.f32.xlu0 %v48_v24 }
  0x97   :  { %v45_v26 = vmul.f32 %v41_v22, %v41_v22  ;;  %v47_v27 = vmul.f32 %v43_v23, %v43_v23 }
  0x99   :  { %v51_v28 = vsel %vm22_vm0, %v45_v26, 0.0  ;;  %v57_v29 = vsel %vm22_vm0, %v47_v27, 0.0 }
  0x9a   :  { %55 = vadd.xlane.f32.xlu0 %v54_v25  ;;  %52 = vadd.xlane.f32.xlu1 %v51_v28 }
  0x9e   :  { %58 = vadd.xlane.f32.xlu1 %v57_v29 }
 0x11f   :  { %v50_v30 = vpop.xlane.xlu0 %49 }
 0x120   :  { %v60_v31 = vmul.f32 0.03125, %v50_v30 }
 0x122   :  { %v64_v32 = vadd.f32 1e-05, %v60_v31 }
 0x123   :  { %v53_v33 = vpop.xlane.xlu1 %52  ;;  %v56_v34 = vpop.xlane.xlu0 %55 }
 0x124   :  { %142 = vrsqrt.f32 %v64_v32  ;;  %v61_v35 = vmul.f32 0.03125, %v53_v33  ;;  %v62_v36 = vmul.f32 0.03125, %v56_v34 }
 0x126   :  { %v65_v37 = vadd.f32 1e-05, %v61_v35  ;;  %v66_v38 = vadd.f32 1e-05, %v62_v36 }
 0x127   :  { %v59_v39 = vpop.xlane.xlu1 %58 }
 0x128   :  { %144 = vrsqrt.f32 %v65_v37  ;;  %v63_v40 = vmul.f32 0.03125, %v59_v39 }
 0x129   :  { %146 = vrsqrt.f32 %v66_v38 }
 0x12a   :  { %v67_v41 = vadd.f32 1e-05, %v63_v40 }
 0x12c   :  { %148 = vrsqrt.f32 %v67_v41 }
 0x131   :  { %v143_v42 = vpop.eup %142 }
 0x132   :  { %v72_v44 = vmul.f32 %v143_v42, %v40_v14 }
 0x134   :  { %v83_v46 = vmul.f32 %v123_v43, %v72_v44 }
 0x135   :  { %v145_v47 = vpop.eup %144 }
 0x136   :  { %v147_v48 = vpop.eup %146  ;;  %v94_v49 = vadd.f32 %v124_v45, %v83_v46  ;;  %v73_v50 = vmul.f32 %v145_v47, %v41_v22 }
 0x137   :  { %v74_v51 = vmul.f32 %v147_v48, %v42_v15 }
 0x138   :  { %v129_v52 = vpack.c.bf16 %v94_v49, %v94_v49  ;;  %v84_v53 = vmul.f32 %v123_v43, %v73_v50 }
 0x139   :  { %v149_v54 = vpop.eup %148  ;;  %v85_v55 = vmul.f32 %v123_v43, %v74_v51 }
 0x13a   :  { %115 = vst.msk [vmem:[%s209_s3] sm:$0xf] %vm114_vm1, %v129_v52  ;;  %v95_v56 = vadd.f32 %v124_v45, %v84_v53  ;;  %v75_v57 = vmul.f32 %v149_v54, %v43_v23 }
 0x13b   :  { %v96_v58 = vadd.f32 %v124_v45, %v85_v55 }
 0x13c   :  { %v130_v59 = vpack.c.bf16 %v95_v56, %v95_v56  ;;  %v86_v60 = vmul.f32 %v123_v43, %v75_v57 }
 0x13d   :  { %v131_v61 = vpack.c.bf16 %v96_v58, %v96_v58 }
 0x13e   :  { %116 = vst.msk [vmem:[%s209_s3 + $0x4] sm:$0xf] %vm114_vm1, %v130_v59  ;;  %v97_v62 = vadd.f32 %v124_v45, %v86_v60 }
 0x13f   :  { %117 = vst.msk [vmem:[%s209_s3 + $0x8] sm:$0xf] %vm114_vm1, %v131_v61 }
 0x140   :  { %v132_v63 = vpack.c.bf16 %v97_v62, %v97_v62 }
 0x142   :  { %118 = vst.msk [vmem:[%s209_s3 + $0xc] sm:$0xf] %vm114_vm1, %v132_v63 }

// kernel: vec2wav2_forward.71
= control target key start
LH: loop header
LB: loop body
LE: loop exit
PB: predicated region body
PF: predicated region fallthrough
CT: control target
= control target key end

     0   :  { %s370_s1 = inlined_call_operand.vmem [shape: bf16[128,128], index: 1, kind: input, shape index: {}]   ;;  %s371_s0 = inlined_call_operand.vmem [shape: bf16[32,128], index: 0, kind: input, shape index: {}]   ;;  %s372_s2 = inlined_call_operand.vmem [shape: f32[1,128], index: 2, kind: input, shape index: {}]   ;;  %s373_s3 = inlined_call_operand.vmem [shape: bf16[32,128], index: 3, kind: input, shape index: {}]   ;;  %s374_s4 = inlined_call_operand.vmem [shape: bf16[32,128], index: 4, kind: output, shape index: {}]  }
   0x1   :  { %v290_v0 = vld [vmem:[%s370_s1 + $0x38] sm:$0xff]   ;;  %v291_v1 = vld [vmem:[%s370_s1 + $0x30] sm:$0xff]   ;;  %v292_v2 = vld [vmem:[%s370_s1 + $0x28] sm:$0xff]  }
   0x2   :  { %270 = vmatprep.subr.bf16.mxu0 %v290_v0  ;;  %v293_v3 = vld [vmem:[%s370_s1 + $0x20] sm:$0xff]   ;;  %v294_v5 = vld [vmem:[%s370_s1 + $0x18] sm:$0xff]   ;;  %v295_v6 = vld [vmem:[%s370_s1 + $0x10] sm:$0xff]  }
   0x3   :  { %271 = vmatpush3.bf16.msra.mxu0 %v290_v0  ;;  %v298_v4 = vld [vmem:[%s371_s0] sm:$0xff]   ;;  %v296_v7 = vld [vmem:[%s370_s1 + $0x8] sm:$0xff]  }
   0x4   :  { %272 = vmatprep.subr.bf16.mxu0 %v291_v1  ;;  %286 = vmatprep.mubr.bf16.mxu0 %v298_v4  ;;  %v297_v8 = vld [vmem:[%s370_s1] sm:$0xff]   ;;  %v299_v9 = vld [vmem:[%s371_s0 + $0x8] sm:$0xff]  }
   0x5   :  { %v231_v11 = vld [vmem:[%s372_s2] ss:$0 sm:$0xff]  ;;  %v258_v12 = vld [vmem:[%s373_s3 + $0x8] sm:$0xff]  }
   0x6   :  { %v241_v14 = vld [vmem:[%s373_s3] sm:$0xff]   ;;  %v246_v16 = vunpack.c.l.bf16 %v258_v12  ;;  %v247_v17 = vunpack.c.h.bf16 %v258_v12 }
   0x7   :  { %273 = vmatpush3.bf16.msra.mxu0 %v291_v1  ;;  %v242_v20 = vunpack.c.l.bf16 %v241_v14  ;;  %v243_v22 = vunpack.c.h.bf16 %v241_v14 }
   0x8   :  { %274 = vmatprep.subr.bf16.mxu0 %v292_v2 }
   0xb   :  { %275 = vmatpush3.bf16.msra.mxu0 %v292_v2 }
   0xc   :  { %276 = vmatprep.subr.bf16.mxu0 %v293_v3 }
   0xf   :  { %277 = vmatpush3.bf16.msra.mxu0 %v293_v3 }
  0x10   :  { %278 = vmatprep.subr.bf16.mxu0 %v294_v5 }
  0x13   :  { %279 = vmatpush3.bf16.msra.mxu0 %v294_v5 }
  0x14   :  { %280 = vmatprep.subr.bf16.mxu0 %v295_v6 }
  0x17   :  { %281 = vmatpush3.bf16.msra.mxu0 %v295_v6 }
  0x18   :  { %282 = vmatprep.subr.bf16.mxu0 %v296_v7 }
  0x1b   :  { %283 = vmatpush3.bf16.msra.mxu0 %v296_v7 }
  0x1c   :  { %284 = vmatprep.subr.bf16.mxu0 %v297_v8 }
  0x1f   :  { %285 = vmatpush3.bf16.msra.mxu0 %v297_v8 }
  0x22   :  { %287 = vmatmul.mubr.bf16.vlgmr.msra.gmra.mxu0 %v299_v9 }
  0xe2   :  { %v288_v10 = vpop.f32.mrf.mxu0 }
  0xe3   :  { %v183_v15 = vadd.f32 %v288_v10, %v231_v11 }
  0xe4   :  { %v144_v13 = vpop.f32.mrf.mxu0 }
  0xe5   :  { %v181_v19 = vadd.f32 %v231_v11, %v144_v13  ;;  %v195_v24 = vadd.f32 %v246_v16, %v183_v15 }
  0xe6   :  { %v289_v18 = vpop.f32.mrf.mxu0 }
  0xe7   :  { %v184_v21 = vadd.f32 %v289_v18, %v231_v11  ;;  %v193_v27 = vadd.f32 %v242_v20, %v181_v19 }
  0xe8   :  { %v147_v23 = vpop.f32.mrf.mxu0 }
  0xe9   :  { %v196_v25 = vadd.f32 %v247_v17, %v184_v21  ;;  %v182_v26 = vadd.f32 %v231_v11, %v147_v23 }
  0xeb   :  { %v256_v28 = vpack.c.bf16 %v196_v25, %v195_v24  ;;  %v194_v29 = vadd.f32 %v243_v22, %v182_v26 }
  0xed   :  { %259 = vst [vmem:[%s374_s4 + $0x8] sm:$0xff] %v256_v28   ;;  %v251_v30 = vpack.c.bf16 %v194_v29, %v193_v27 }
  0xef   :  { %252 = vst [vmem:[%s374_s4] sm:$0xff] %v251_v30  }

// kernel: vec2wav2_forward.64
= control target key start
LH: loop header
LB: loop body
LE: loop exit
PB: predicated region body
PF: predicated region fallthrough
CT: control target
= control target key end

     0   :  { %s968_s15 = smov 0   ;;  %s970_s16 = smov 0   ;;  %s1036_s0 = inlined_call_operand.vmem [shape: bf16[2,32,16], index: 0, kind: input, shape index: {}, may-alias: {0,1}]   ;;  %s1037_s1 = inlined_call_operand.vmem [shape: bf16[2,32,16], index: 1, kind: input, shape index: {}, may-alias: {0,1}]   ;;  %s1038_s2 = inlined_call_operand.vmem [shape: bf16[5,16,128], index: 2, kind: input, shape index: {}]   ;;  %s1039_s3 = inlined_call_operand.vmem [shape: f32[1,128], index: 3, kind: input, shape index: {}]   ;;  %s1040_s4 = inlined_call_operand.vmem [shape: bf16[2,16,128], index: 4, kind: output, shape index: {}]  }
   0x1   :  { %s972_s17 = smov 0  }
   0x2 LB: > { %s33_s18 = sadd.s32 1, %s935_s16  ;;  %p808_p0 = scmp.ge.s32.totalorder %s939_s17, 1  ;;  %s939_s17 = sphi %s972_s17, %s14_s17   ;;  %s935_s16 = sphi %s970_s16, %s1042_s16   ;;  %s931_s15 = sphi %s968_s15, %s1041_s15  }
   0x3   : > { %p35_p1 = scmp.ge.s32.totalorder %s33_s18, 2  ;;  %p230_p2 = scmp.lt.s32.totalorder %s939_s17, 3 }
   0x5   : > { %s1044_s18 = smov (%p35_p1, %s33_s18), 0  ;;  %p231_p3 = pnand %p808_p0, %p230_p2 }
   0x6   : > { %p285_p4 = scmp.lt.s32.totalorder (!%p231_p3), %s931_s15, 1 }
   0x7   : > { %234 = sbr.rel (%p231_p3) target bundleno = 243 (0xf3), region = 36 }
   0xc   : > { %v910_v0 = vld [vmem:[%s1038_s2 + $0x8] sm:$0xff]   ;;  %v941_v1 = vmov 0.0   ;;  %v911_v2 = vld [vmem:[%s1038_s2] sm:$0xff]   ;;  %vm942_vm0 = vmmov 0   ;;  %s1046_s15 = smov (!%p285_p4, %s931_s15), 1  ;;  %vm370_vm1 = vcmask 130048  }
   0xd   : > { %854 = vmatprep.subr.bf16.mxu0 %v941_v1  ;;  %860 = vmatprep.subr.bf16.mxu1 %v941_v1  ;;  %s832_s23 = sshll.u32 %s1046_s15, 4  ;;  %v915_v3 = vld [vmem:[%s1038_s2 + $0x18] sm:$0xff]   ;;  %vm351_vm2 = vsmask.f32 7424  ;;  %v914_v17 = vld [vmem:[%s1038_s2 + $0x10] sm:$0xff]   ;;  %vm464_vm4 = vcmask 1046528  }
   0xe   : > { %855 = vmatpush3.bf16.msra.mxu0 %v910_v0  ;;  %856 = vmatprep.mubr.msk.bf16.mxu0 %vm942_vm0, %v941_v1  ;;  %s292_s26 = scalar_lea.vmem %s1036_s0, %s832_s23  ;;  %s834_s27 = sadd.s32 8, %s832_s23  ;;  %vm520_vm3 = vsmask.f32 6400  ;;  %v916_v25 = vld [vmem:[%s1038_s2 + $0x20] sm:$0xff]   ;;  %vm582_vm5 = vcmask 1045504  }
   0xf   : > { %861 = vmatpush3.bf16.msra.mxu1 %v911_v2  ;;  %862 = vmatprep.mubr.msk.bf16.mxu1 %vm942_vm0, %v941_v1  ;;  %s303_s6 = scalar_lea.vmem %s1037_s1, %s834_s27  ;;  %v912_v4 = vld [vmem:[%s292_s26] sm:$0xff]   ;;  %s835_s13 = sshll.u32 %s1046_s15, 3 }
  0x10   : > { %866 = vmatprep.subr.bf16.mxu0 %v941_v1  ;;  %872 = vmatprep.subr.bf16.mxu1 %v941_v1  ;;  %v913_v5 = vld [vmem:[%s303_s6] sm:$0xff]   ;;  %v353_v6 = vshrl.u32 %v912_v4, 16  ;;  %v355_v7 = vshll.u32 %v912_v4, 16  ;;  %v465_v22 = vrot.slane %v912_v4, 1  ;;  %v583_v26 = vrot.slane %v912_v4, 2  ;;  %s324_s20 = scalar_lea.vmem %s1040_s4, %s835_s13 }
  0x11   : > { %v360_v8 = vshll.u32 %v913_v5, 16  ;;  %v524_v9 = vshrl.u32 %v913_v5, 16  ;;  %v466_v23 = vrot.slane %v913_v5, 1  ;;  %v584_v27 = vrot.slane %v913_v5, 2  ;;  %v827_v54 = vld [vmem:[%s1039_s3] ss:$0 sm:$0xff] }
  0x12   : > { %863 = vmatmul.mubr.msk.bf16.vlgmr.msra.gmra.mxu1 %vm370_vm1, %v912_v4  ;;  %v357_v10 = vrot.slane %v355_v7, 1  ;;  %v521_v11 = vrot.slane %v353_v6, 1  ;;  %v522_v12 = vrot.slane %v355_v7, 2 }
  0x13   : > { %873 = vmatpush3.bf16.msra.mxu1 %v915_v3  ;;  %874 = vmatprep.mubr.msk.bf16.mxu1 %vm942_vm0, %v941_v1  ;;  %v362_v13 = vrot.slane %v360_v8, 1  ;;  %v527_v14 = vrot.slane %v360_v8, 2  ;;  %v526_v15 = vrot.slane %v524_v9, 1  ;;  %v467_v24 = vsel %vm464_vm4, %v465_v22, %v466_v23 }
  0x14   : > { %v358_v16 = vor.u32 %v357_v10, %v353_v6  ;;  %v523_v18 = vor.u32 %v522_v12, %v521_v11  ;;  %v585_v28 = vsel %vm582_vm5, %v583_v26, %v584_v27 }
  0x15   : > { %v528_v19 = vor.u32 %v527_v14, %v526_v15 }
  0x16   : > { %v363_v20 = vsel %vm351_vm2, %v358_v16, %v362_v13 }
  0x17   : > { %857 = vmatmul.mubr.msk.bf16.vlgmr.msra.gmra.mxu0 %vm370_vm1, %v363_v20  ;;  %v529_v21 = vsel %vm520_vm3, %v523_v18, %v528_v19 }
  0x18   : > { %867 = vmatpush3.bf16.msra.mxu0 %v914_v17  ;;  %868 = vmatprep.mubr.msk.bf16.mxu0 %vm942_vm0, %v941_v1 }
  0x19   : > { %878 = vmatprep.subr.bf16.mxu0 %v941_v1 }
  0x1a   : > { %875 = vmatmul.mubr.msk.bf16.vlgmr.msra.gmra.mxu1 %vm370_vm1, %v529_v21 }
  0x1f   : > { %869 = vmatmul.mubr.msk.bf16.vlgmr.msra.gmra.mxu0 %vm370_vm1, %v467_v24 }
  0x20   : > { %879 = vmatpush3.bf16.msra.mxu0 %v916_v25  ;;  %880 = vmatprep.mubr.msk.bf16.mxu0 %vm942_vm0, %v941_v1 }
  0x27   : > { %881 = vmatmul.mubr.msk.bf16.vlgmr.msra.gmra.mxu0 %vm370_vm1, %v585_v28 }
  0xd2   : > { %v457_v29 = vpop.f32.mrf.mxu1 }
  0xd4   : > { %v864_v30 = vpop.f32.mrf.mxu1 }
  0xd6   : > { %v460_v31 = vpop.f32.mrf.mxu1 }
  0xd7   : > { %v408_v33 = vpop.f32.mrf.mxu0 }
  0xd8   : > { %v865_v32 = vpop.f32.mrf.mxu1  ;;  %v458_v43 = vadd.f32 %v457_v29, %v408_v33 }
  0xd9   : > { %v858_v34 = vpop.f32.mrf.mxu0 }
  0xda   : > { %v573_v35 = vpop.f32.mrf.mxu1 }
  0xdb   : > { %v411_v36 = vpop.f32.mrf.mxu0 }
  0xdc   : > { %v876_v37 = vpop.f32.mrf.mxu1  ;;  %v461_v45 = vadd.f32 %v460_v31, %v411_v36 }
  0xdd   : > { %v859_v38 = vpop.f32.mrf.mxu0 }
  0xde   : > { %v576_v39 = vpop.f32.mrf.mxu1 }
  0xdf   : > { %v511_v40 = vpop.f32.mrf.mxu0 }
  0xe0   : > { %v877_v41 = vpop.f32.mrf.mxu1  ;;  %v518_v46 = vadd.f32 %v511_v40, %v458_v43 }
  0xe1   : > { %v870_v42 = vpop.f32.mrf.mxu0 }
  0xe2   : > { %v580_v50 = vadd.f32 %v573_v35, %v518_v46 }
  0xe3   : > { %v514_v44 = vpop.f32.mrf.mxu0 }
  0xe4   : > { %v519_v48 = vadd.f32 %v514_v44, %v461_v45 }
  0xe5   : > { %v871_v47 = vpop.f32.mrf.mxu0 }
  0xe6   : > { %v581_v52 = vadd.f32 %v576_v39, %v519_v48 }
  0xe7   : > { %v629_v49 = vpop.f32.mrf.mxu0 }
  0xe8   : > { %v636_v53 = vadd.f32 %v629_v49, %v580_v50 }
  0xe9   : > { %v882_v51 = vpop.f32.mrf.mxu0 }
  0xea   : > { %v645_v58 = vadd.f32 %v827_v54, %v636_v53 }
  0xeb   : > { %v632_v55 = vpop.f32.mrf.mxu0 }
  0xec   : > { %v637_v56 = vadd.f32 %v632_v55, %v581_v52 }
  0xed   : > { %v883_v57 = vpop.f32.mrf.mxu0 }
  0xee   : > { %v646_v59 = vadd.f32 %v827_v54, %v637_v56 }
  0xf0   : > { %v841_v60 = vpack.c.bf16 %v646_v59, %v645_v58 }
  0xf2   : > { %842 = vst [vmem:[%s324_s20] sm:$0xff] %v841_v60  }
  0xf3 PF: > { %s14_s17 = sadd.s32 1, %s939_s17   ;;  %s1041_s15 = smov %s935_s16 }
  0xf4   : > { %p11_p5 = scmp.ge.s32.totalorder %s14_s17, 4   ;;  %s1042_s16 = smov %s1044_s18 }
  0xf6   :  { %13 = sbr.rel (!%p11_p5) target bundleno = 2 (0x2), region = 75 }

// kernel: vec2wav2_forward.78
= control target key start
LH: loop header
LB: loop body
LE: loop exit
PB: predicated region body
PF: predicated region fallthrough
CT: control target
= control target key end

     0   :  { %s339_s1 = inlined_call_operand.vmem [shape: bf16[128,128], index: 1, kind: input, shape index: {}]   ;;  %s340_s0 = inlined_call_operand.vmem [shape: bf16[32,128], index: 0, kind: input, shape index: {}]   ;;  %s341_s2 = inlined_call_operand.vmem [shape: f32[1,128], index: 2, kind: input, shape index: {}]   ;;  %s342_s3 = inlined_call_operand.vmem [shape: bf16[32,128], index: 3, kind: output, shape index: {}]  }
   0x1   :  { %v270_v0 = vld [vmem:[%s339_s1 + $0x38] sm:$0xff]   ;;  %v271_v1 = vld [vmem:[%s339_s1 + $0x30] sm:$0xff]   ;;  %v272_v2 = vld [vmem:[%s339_s1 + $0x28] sm:$0xff]  }
   0x2   :  { %250 = vmatprep.subr.bf16.mxu0 %v270_v0  ;;  %v273_v3 = vld [vmem:[%s339_s1 + $0x20] sm:$0xff]   ;;  %v274_v5 = vld [vmem:[%s339_s1 + $0x18] sm:$0xff]   ;;  %v275_v6 = vld [vmem:[%s339_s1 + $0x10] sm:$0xff]  }
   0x3   :  { %251 = vmatpush3.bf16.msra.mxu0 %v270_v0  ;;  %v278_v4 = vld [vmem:[%s340_s0] sm:$0xff]   ;;  %v276_v7 = vld [vmem:[%s339_s1 + $0x8] sm:$0xff]  }
   0x4   :  { %252 = vmatprep.subr.bf16.mxu0 %v271_v1  ;;  %266 = vmatprep.mubr.bf16.mxu0 %v278_v4  ;;  %v277_v8 = vld [vmem:[%s339_s1] sm:$0xff]   ;;  %v279_v9 = vld [vmem:[%s340_s0 + $0x8] sm:$0xff]  }
   0x5   :  { %v220_v11 = vld [vmem:[%s341_s2] ss:$0 sm:$0xff] }
   0x7   :  { %253 = vmatpush3.bf16.msra.mxu0 %v271_v1 }
   0x8   :  { %254 = vmatprep.subr.bf16.mxu0 %v272_v2 }
   0xb   :  { %255 = vmatpush3.bf16.msra.mxu0 %v272_v2 }
   0xc   :  { %256 = vmatprep.subr.bf16.mxu0 %v273_v3 }
   0xf   :  { %257 = vmatpush3.bf16.msra.mxu0 %v273_v3 }
  0x10   :  { %258 = vmatprep.subr.bf16.mxu0 %v274_v5 }
  0x13   :  { %259 = vmatpush3.bf16.msra.mxu0 %v274_v5 }
  0x14   :  { %260 = vmatprep.subr.bf16.mxu0 %v275_v6 }
  0x17   :  { %261 = vmatpush3.bf16.msra.mxu0 %v275_v6 }
  0x18   :  { %262 = vmatprep.subr.bf16.mxu0 %v276_v7 }
  0x1b   :  { %263 = vmatpush3.bf16.msra.mxu0 %v276_v7 }
  0x1c   :  { %264 = vmatprep.subr.bf16.mxu0 %v277_v8 }
  0x1f   :  { %265 = vmatpush3.bf16.msra.mxu0 %v277_v8 }
  0x22   :  { %267 = vmatmul.mubr.bf16.vlgmr.msra.gmra.mxu0 %v279_v9 }
  0xe2   :  { %v268_v10 = vpop.f32.mrf.mxu0 }
  0xe3   :  { %v180_v13 = vadd.f32 %v268_v10, %v220_v11 }
  0xe4   :  { %v141_v12 = vpop.f32.mrf.mxu0 }
  0xe5   :  { %v178_v15 = vadd.f32 %v220_v11, %v141_v12  ;;  %v184_v18 = vmax.f32 %v180_v13, 0.0 }
  0xe6   :  { %v269_v14 = vpop.f32.mrf.mxu0 }
  0xe7   :  { %v181_v16 = vadd.f32 %v269_v14, %v220_v11  ;;  %v182_v21 = vmax.f32 %v178_v15, 0.0 }
  0xe8   :  { %v144_v17 = vpop.f32.mrf.mxu0 }
  0xe9   :  { %v185_v19 = vmax.f32 %v181_v16, 0.0  ;;  %v179_v20 = vadd.f32 %v220_v11, %v144_v17 }
  0xeb   :  { %v237_v22 = vpack.c.bf16 %v185_v19, %v184_v18  ;;  %v183_v23 = vmax.f32 %v179_v20, 0.0 }
  0xed   :  { %239 = vst [vmem:[%s342_s3 + $0x8] sm:$0xff] %v237_v22   ;;  %v232_v24 = vpack.c.bf16 %v183_v23, %v182_v21 }
  0xef   :  { %233 = vst [vmem:[%s342_s3] sm:$0xff] %v232_v24  }

// kernel: vec2wav2_forward.70
= control target key start
LH: loop header
LB: loop body
LE: loop exit
PB: predicated region body
PF: predicated region fallthrough
CT: control target
= control target key end

     0   :  { %s2386_s15 = smov 0   ;;  %s2388_s16 = smov 0   ;;  %s2845_s0 = inlined_call_operand.vmem [shape: bf16[2,4,16,8], index: 0, kind: input, shape index: {}]   ;;  %s2846_s1 = inlined_call_operand.vmem [shape: bf16[2,4,128,8], index: 1, kind: input, shape index: {}]   ;;  %s2847_s2 = inlined_call_operand.vmem [shape: bf16[2,4,128,8], index: 2, kind: input, shape index: {}]   ;;  %s2848_s3 = inlined_call_operand.vmem [shape: f32[2,1,128], index: 3, kind: input, shape index: {}]   ;;  %s2849_s4 = inlined_call_operand.vmem [shape: bf16[2,4,16,8], index: 4, kind: output, shape index: {}]  }
   0x1   :  { %s2390_s17 = smov 0  }
   0x2 LB: > { %s33_s18 = sadd.s32 1, %s2351_s16  ;;  %p1851_p0 = scmp.ge.s32.totalorder %s2355_s17, 1  ;;  %s2355_s17 = sphi %s2390_s17, %s14_s17   ;;  %s2351_s16 = sphi %s2388_s16, %s2851_s16   ;;  %s2347_s15 = sphi %s2386_s15, %s2850_s15  }
   0x3   : > { %p35_p1 = scmp.ge.s32.totalorder %s33_s18, 2  ;;  %p237_p2 = scmp.lt.s32.totalorder %s2355_s17, 3 }
   0x5   : > { %s2853_s18 = smov (%p35_p1, %s33_s18), 0  ;;  %p238_p3 = pnand %p1851_p0, %p237_p2 }
   0x6   : > { %p296_p4 = scmp.lt.s32.totalorder (!%p238_p3), %s2347_s15, 1 }
   0x7   : > { %241 = sbr.rel (%p238_p3) target bundleno = 926 (0x39e), region = 36 }
   0xc   : > { %vm363_vm0 = vcmask 64512   ;;  %v2357_v0 = vmov 0.0   ;;  %s2855_s15 = smov (!%p296_p4, %s2347_s15), 1  ;;  %vm2358_vm1 = vmmov 0   ;;  %vm346_vm2 = vcmask 7168  }
   0xd   : > { %2027 = vmatprep.subr.bf16.mxu0 %v2357_v0  ;;  %2047 = vmatprep.subr.bf16.mxu1 %v2357_v0  ;;  %364 = vst.msk [vmem:[#allocation4] sm:$0xff] %vm363_vm0, %v2357_v0  ;;  %365 = vst.msk [vmem:[#allocation4 + $0x8] sm:$0xff] %vm363_vm0, %v2357_v0  ;;  %s1944_s19 = sshll.u32 %s2855_s15, 8  ;;  %s1943_s23 = sshll.u32 %s2855_s15, 5  ;;  %vm1700_vm3 = vcmask 60416  }
   0xe   : > { %366 = vst.msk [vmem:[#allocation4 + $0x10] sm:$0xff] %vm363_vm0, %v2357_v0  ;;  %367 = vst.msk [vmem:[#allocation4 + $0x18] sm:$0xff] %vm363_vm0, %v2357_v0  ;;  %2043 = vmatprep.mubr.msk.bf16.mxu0 %vm2358_vm1, %v2357_v0  ;;  %2063 = vmatprep.mubr.msk.bf16.mxu1 %vm2358_vm1, %v2357_v0  ;;  %s2434_s22 = scalar_lea.vmem %s2846_s1, %s1944_s19  ;;  %s2456_s26 = scalar_lea.vmem %s2845_s0, %s1943_s23 }
   0xf   : > { %368 = vst.msk [vmem:[#allocation4 + $0x20] sm:$0xff] %vm363_vm0, %v2357_v0  ;;  %369 = vst.msk [vmem:[#allocation4 + $0x28] sm:$0xff] %vm363_vm0, %v2357_v0  ;;  %v2217_v1 = vld [vmem:[%s2434_s22 + $0x38] sm:$0xff]   ;;  %v2219_v5 = vld [vmem:[%s2434_s22 + $0x30] sm:$0xff]   ;;  %s2485_s29 = scalar_lea.vmem %s2847_s2, %s1944_s19  ;;  %s330_s6 = scalar_lea.vmem %s2848_s3, %s2855_s15 }
  0x10   : > { %370 = vst.msk [vmem:[#allocation4 + $0x30] sm:$0xff] %vm363_vm0, %v2357_v0  ;;  %371 = vst.msk [vmem:[#allocation4 + $0x38] sm:$0xff] %vm363_vm0, %v2357_v0  ;;  %v2218_v2 = vld [vmem:[%s2434_s22 + $0x78] sm:$0xff]   ;;  %v580_v3 = vsel %vm363_vm0, %v2217_v1, 0  ;;  %v2220_v6 = vld [vmem:[%s2434_s22 + $0x70] sm:$0xff]   ;;  %v577_v7 = vsel %vm363_vm0, %v2219_v5, 0  ;;  %s2818_s9 = scalar_lea.vmem %s2849_s4, %s1943_s23 }
  0x11   : > { %2028 = vmatpush3.bf16.xpose.msra.mxu0 %v580_v3  ;;  %v693_v4 = vsel %vm363_vm0, %v2218_v2, 0  ;;  %v690_v8 = vsel %vm363_vm0, %v2220_v6, 0  ;;  %v2221_v9 = vld [vmem:[%s2434_s22 + $0x28] sm:$0xff]   ;;  %v2223_v13 = vld [vmem:[%s2434_s22 + $0x20] sm:$0xff]   ;;  %v2225_v17 = vld [vmem:[%s2434_s22 + $0x18] sm:$0xff]   ;;  %355 = vst.msk [vmem:[#allocation3] sm:$0xff] %vm346_vm2, %v2357_v0 }
  0x12   : > { %2048 = vmatpush3.bf16.xpose.msra.mxu1 %v693_v4  ;;  %2029 = vmatprep.subr.bf16.mxu0 %v2357_v0  ;;  %v2222_v10 = vld [vmem:[%s2434_s22 + $0x68] sm:$0xff]   ;;  %v574_v11 = vsel %vm363_vm0, %v2221_v9, 0  ;;  %v2224_v14 = vld [vmem:[%s2434_s22 + $0x60] sm:$0xff]   ;;  %v571_v15 = vsel %vm363_vm0, %v2223_v13, 0  ;;  %v2226_v18 = vld [vmem:[%s2434_s22 + $0x58] sm:$0xff]   ;;  %v568_v24 = vsel %vm363_vm0, %v2225_v17, 0 }
  0x13   : > { %2049 = vmatprep.subr.bf16.mxu1 %v2357_v0  ;;  %v687_v12 = vsel %vm363_vm0, %v2222_v10, 0  ;;  %v684_v16 = vsel %vm363_vm0, %v2224_v14, 0  ;;  %v2227_v19 = vld [vmem:[%s2434_s22 + $0x10] sm:$0xff]   ;;  %v2229_v21 = vld [vmem:[%s2434_s22 + $0x8] sm:$0xff]   ;;  %v2231_v23 = vld [vmem:[%s2434_s22] sm:$0xff]   ;;  %v681_v25 = vsel %vm363_vm0, %v2226_v18, 0 }
  0x14   : > { %v2228_v20 = vld [vmem:[%s2434_s22 + $0x50] sm:$0xff]   ;;  %v2230_v22 = vld [vmem:[%s2434_s22 + $0x48] sm:$0xff]   ;;  %v565_v26 = vsel %vm363_vm0, %v2227_v19, 0  ;;  %v562_v28 = vsel %vm363_vm0, %v2229_v21, 0  ;;  %v559_v30 = vsel %vm363_vm0, %v2231_v23, 0  ;;  %v2232_v31 = vld [vmem:[%s2434_s22 + $0x40] sm:$0xff]  }
  0x15   : > { %v678_v27 = vsel %vm363_vm0, %v2228_v20, 0  ;;  %v675_v29 = vsel %vm363_vm0, %v2230_v22, 0  ;;  %v672_v32 = vsel %vm363_vm0, %v2232_v31, 0  ;;  %v2235_v33 = vld [vmem:[%s2434_s22 + $0xb8] sm:$0xff]   ;;  %v2233_v35 = vld [vmem:[%s2456_s26] sm:$0xff]   ;;  %v2234_v36 = vld [vmem:[%s2456_s26 + $0x8] sm:$0xff]  }
  0x16   : > { %v2236_v34 = vld [vmem:[%s2434_s22 + $0xf8] sm:$0xff]   ;;  %v806_v37 = vsel %vm363_vm0, %v2235_v33, 0  ;;  %v2237_v39 = vld [vmem:[%s2434_s22 + $0xb0] sm:$0xff]   ;;  %v2239_v43 = vld [vmem:[%s2434_s22 + $0xa8] sm:$0xff]   ;;  %v2359_v6 = vmov -1e+30  }
  0x17   : > { %v919_v38 = vsel %vm363_vm0, %v2236_v34, 0  ;;  %v2238_v40 = vld [vmem:[%s2434_s22 + $0xf0] sm:$0xff]   ;;  %v803_v41 = vsel %vm363_vm0, %v2237_v39, 0  ;;  %v2240_v44 = vld [vmem:[%s2434_s22 + $0xe8] sm:$0xff]   ;;  %v800_v45 = vsel %vm363_vm0, %v2239_v43, 0  ;;  %v2241_v47 = vld [vmem:[%s2434_s22 + $0xa0] sm:$0xff]  }
  0x18   : > { %v916_v42 = vsel %vm363_vm0, %v2238_v40, 0  ;;  %v913_v46 = vsel %vm363_vm0, %v2240_v44, 0  ;;  %v2242_v48 = vld [vmem:[%s2434_s22 + $0xe0] sm:$0xff]   ;;  %v797_v49 = vsel %vm363_vm0, %v2241_v47, 0  ;;  %v2243_v51 = vld [vmem:[%s2434_s22 + $0x98] sm:$0xff]   ;;  %v2245_v55 = vld [vmem:[%s2434_s22 + $0x90] sm:$0xff]  }
  0x19   : > { %2030 = vmatpush3.bf16.xpose.msra.mxu0 %v577_v7  ;;  %v910_v50 = vsel %vm363_vm0, %v2242_v48, 0  ;;  %v2244_v52 = vld [vmem:[%s2434_s22 + $0xd8] sm:$0xff]   ;;  %v794_v53 = vsel %vm363_vm0, %v2243_v51, 0  ;;  %v2246_v56 = vld [vmem:[%s2434_s22 + $0xd0] sm:$0xff]   ;;  %v791_v57 = vsel %vm363_vm0, %v2245_v55, 0  ;;  %v2247_v59 = vld [vmem:[%s2434_s22 + $0x88] sm:$0xff]  }
  0x1a   : > { %2050 = vmatpush3.bf16.xpose.msra.mxu1 %v690_v8  ;;  %2031 = vmatprep.subr.bf16.mxu0 %v2357_v0  ;;  %v907_v54 = vsel %vm363_vm0, %v2244_v52, 0  ;;  %v904_v58 = vsel %vm363_vm0, %v2246_v56, 0  ;;  %v2248_v60 = vld [vmem:[%s2434_s22 + $0xc8] sm:$0xff]   ;;  %v788_v61 = vsel %vm363_vm0, %v2247_v59, 0  ;;  %v2249_v63 = vld [vmem:[%s2434_s22 + $0x80] sm:$0xff]   ;;  %v2251_v4 = vld [vmem:[%s2456_s26 + $0x10] sm:$0xff]  }
  0x1b   : > { %2051 = vmatprep.subr.bf16.mxu1 %v2357_v0  ;;  %v901_v62 = vsel %vm363_vm0, %v2248_v60, 0  ;;  %v2250_v1 = vld [vmem:[%s2434_s22 + $0xc0] sm:$0xff]   ;;  %v785_v2 = vsel %vm363_vm0, %v2249_v63, 0  ;;  %v2252_v5 = vld [vmem:[%s2456_s26 + $0x18] sm:$0xff]   ;;  %349 = vst.msk [vmem:[#allocation2 + $0x10] sm:$0xff] %vm346_vm2, %v2359_v6  ;;  %347 = vst.msk [vmem:[#allocation2] sm:$0xff] %vm346_vm2, %v2359_v6 }
  0x1c   : > { %v898_v3 = vsel %vm363_vm0, %v2250_v1, 0  ;;  %348 = vst.msk [vmem:[#allocation2 + $0x8] sm:$0xff] %vm346_vm2, %v2359_v6  ;;  %350 = vst.msk [vmem:[#allocation2 + $0x18] sm:$0xff] %vm346_vm2, %v2359_v6  ;;  %v1900_v8 = vld [vmem:[%s330_s6] ss:$0 sm:$0xff]  ;;  %v2254_v43 = vld [vmem:[%s2485_s29 + $0x30] sm:$0xff]  }
  0x1d   : > { %351 = vst.msk [vmem:[#allocation2 + $0x20] sm:$0xff] %vm346_vm2, %v2359_v6  ;;  %352 = vst.msk [vmem:[#allocation2 + $0x28] sm:$0xff] %vm346_vm2, %v2359_v6  ;;  %v2257_v47 = vld [vmem:[%s2485_s29 + $0x70] sm:$0xff]   ;;  %v2258_v55 = vld [vmem:[%s2485_s29 + $0x20] sm:$0xff]  }
  0x1e   : > { %353 = vst.msk [vmem:[#allocation2 + $0x30] sm:$0xff] %vm346_vm2, %v2359_v6  ;;  %354 = vst.msk [vmem:[#allocation2 + $0x38] sm:$0xff] %vm346_vm2, %v2359_v6  ;;  %v2259_v56 = vld [vmem:[%s2485_s29 + $0x68] sm:$0xff]   ;;  %v2260_v63 = vld [vmem:[%s2485_s29 + $0x18] sm:$0xff]  }
  0x1f   : > { %356 = vst.msk [vmem:[#allocation3 + $0x8] sm:$0xff] %vm346_vm2, %v2357_v0  ;;  %357 = vst.msk [vmem:[#allocation3 + $0x10] sm:$0xff] %vm346_vm2, %v2357_v0  ;;  %v2261_v1 = vld [vmem:[%s2485_s29 + $0x60] sm:$0xff]   ;;  %v2265_v6 = vld [vmem:[%s2485_s29 + $0x50] sm:$0xff]  }
  0x20   : > { %358 = vst.msk [vmem:[#allocation3 + $0x18] sm:$0xff] %vm346_vm2, %v2357_v0  ;;  %359 = vst.msk [vmem:[#allocation3 + $0x20] sm:$0xff] %vm346_vm2, %v2357_v0 }
  0x21   : > { %2032 = vmatpush3.bf16.xpose.msra.mxu0 %v574_v11  ;;  %360 = vst.msk [vmem:[#allocation3 + $0x28] sm:$0xff] %vm346_vm2, %v2357_v0  ;;  %361 = vst.msk [vmem:[#allocation3 + $0x30] sm:$0xff] %vm346_vm2, %v2357_v0 }
  0x22   : > { %2052 = vmatpush3.bf16.xpose.msra.mxu1 %v687_v12  ;;  %2033 = vmatprep.subr.bf16.mxu0 %v2357_v0  ;;  %362 = vst.msk [vmem:[#allocation3 + $0x38] sm:$0xff] %vm346_vm2, %v2357_v0  ;;  %v2621_v44 = vld [vmem:[#allocation2] sm:$0xff] }
  0x23   : > { %2053 = vmatprep.subr.bf16.mxu1 %v2357_v0  ;;  %v2633_v52 = vld [vmem:[#allocation2 + $0x8] sm:$0xff] }
  0x29   : > { %2034 = vmatpush3.bf16.xpose.msra.mxu0 %v571_v15 }
  0x2a   : > { %2054 = vmatpush3.bf16.xpose.msra.mxu1 %v684_v16  ;;  %2035 = vmatprep.subr.bf16.mxu0 %v2357_v0 }
  0x2b   : > { %2055 = vmatprep.subr.bf16.mxu1 %v2357_v0 }
  0x31   : > { %2036 = vmatpush3.bf16.xpose.msra.mxu0 %v568_v24  ;;  %v2360_v24 = vmov 0  }
  0x32   : > { %2056 = vmatpush3.bf16.xpose.msra.mxu1 %v681_v25  ;;  %2037 = vmatprep.subr.bf16.mxu0 %v2357_v0 }
  0x33   : > { %2057 = vmatprep.subr.bf16.mxu1 %v2357_v0  ;;  %2216 = vset.pattern.permute.xlu1 %v2360_v24 }
  0x34   : > { %2215 = vset.pattern.permute.xlu0 %v2360_v24  ;;  %v2707_v24 = vld [vmem:[#allocation2 + $0x38] sm:$0xff] }
  0x39   : > { %2038 = vmatpush3.bf16.xpose.msra.mxu0 %v565_v26 }
  0x3a   : > { %2058 = vmatpush3.bf16.xpose.msra.mxu1 %v678_v27  ;;  %2039 = vmatprep.subr.bf16.mxu0 %v2357_v0 }
  0x3b   : > { %2059 = vmatprep.subr.bf16.mxu1 %v2357_v0 }
  0x41   : > { %2040 = vmatpush3.bf16.xpose.msra.mxu0 %v562_v28 }
  0x42   : > { %2060 = vmatpush3.bf16.xpose.msra.mxu1 %v675_v29  ;;  %2041 = vmatprep.subr.bf16.mxu0 %v2357_v0 }
  0x43   : > { %2061 = vmatprep.subr.bf16.mxu1 %v2357_v0 }
  0x49   : > { %2042 = vmatpush3.bf16.xpose.msra.mxu0 %v559_v30 }
  0x4a   : > { %2062 = vmatpush3.bf16.xpose.msra.mxu1 %v672_v32  ;;  %2067 = vmatprep.subr.bf16.mxu0 %v2357_v0 }
  0x4b   : > { %2087 = vmatprep.subr.bf16.mxu1 %v2357_v0 }
  0x50   : > { %2044 = vmatmul.mubr.msk.bf16.vlgmr.msra.gmra.mxu0 %vm363_vm0, %v2233_v35 }
  0x51   : > { %2064 = vmatmul.mubr.msk.bf16.vlgmr.msra.gmra.mxu1 %vm363_vm0, %v2234_v36  ;;  %2068 = vmatpush3.bf16.xpose.msra.mxu0 %v806_v37 }
  0x52   : > { %2088 = vmatpush3.bf16.xpose.msra.mxu1 %v919_v38  ;;  %2069 = vmatprep.subr.bf16.mxu0 %v2357_v0 }
  0x53   : > { %2089 = vmatprep.subr.bf16.mxu1 %v2357_v0  ;;  %2083 = vmatprep.mubr.msk.bf16.mxu0 %vm2358_vm1, %v2357_v0 }
  0x54   : > { %2103 = vmatprep.mubr.msk.bf16.mxu1 %vm2358_vm1, %v2357_v0 }
  0x59   : > { %2070 = vmatpush3.bf16.xpose.msra.mxu0 %v803_v41  ;;  %v2253_v41 = vld [vmem:[%s2485_s29 + $0x38] sm:$0xff]  }
  0x5a   : > { %2090 = vmatpush3.bf16.xpose.msra.mxu1 %v916_v42  ;;  %2071 = vmatprep.subr.bf16.mxu0 %v2357_v0  ;;  %v2255_v42 = vld [vmem:[%s2485_s29 + $0x78] sm:$0xff]  }
  0x5b   : > { %2091 = vmatprep.subr.bf16.mxu1 %v2357_v0 }
  0x61   : > { %2072 = vmatpush3.bf16.xpose.msra.mxu0 %v800_v45  ;;  %v2623_v45 = vld [vmem:[#allocation2 + $0x10] sm:$0xff] }
  0x62   : > { %2092 = vmatpush3.bf16.xpose.msra.mxu1 %v913_v46  ;;  %2073 = vmatprep.subr.bf16.mxu0 %v2357_v0  ;;  %v2256_v46 = vld [vmem:[%s2485_s29 + $0x28] sm:$0xff]  }
  0x63   : > { %2093 = vmatprep.subr.bf16.mxu1 %v2357_v0 }
  0x69   : > { %2074 = vmatpush3.bf16.xpose.msra.mxu0 %v797_v49 }
  0x6a   : > { %2094 = vmatpush3.bf16.xpose.msra.mxu1 %v910_v50  ;;  %2075 = vmatprep.subr.bf16.mxu0 %v2357_v0 }
  0x6b   : > { %2095 = vmatprep.subr.bf16.mxu1 %v2357_v0 }
  0x71   : > { %2076 = vmatpush3.bf16.xpose.msra.mxu0 %v794_v53 }
  0x72   : > { %2096 = vmatpush3.bf16.xpose.msra.mxu1 %v907_v54  ;;  %2077 = vmatprep.subr.bf16.mxu0 %v2357_v0  ;;  %v2642_v54 = vld [vmem:[#allocation2 + $0x18] sm:$0xff] }
  0x73   : > { %2097 = vmatprep.subr.bf16.mxu1 %v2357_v0 }
  0x79   : > { %2078 = vmatpush3.bf16.xpose.msra.mxu0 %v791_v57 }
  0x7a   : > { %2098 = vmatpush3.bf16.xpose.msra.mxu1 %v904_v58  ;;  %2079 = vmatprep.subr.bf16.mxu0 %v2357_v0 }
  0x7b   : > { %2099 = vmatprep.subr.bf16.mxu1 %v2357_v0 }
  0x81   : > { %2080 = vmatpush3.bf16.xpose.msra.mxu0 %v788_v61 }
  0x82   : > { %2100 = vmatpush3.bf16.xpose.msra.mxu1 %v901_v62  ;;  %2081 = vmatprep.subr.bf16.mxu0 %v2357_v0 }
  0x83   : > { %2101 = vmatprep.subr.bf16.mxu1 %v2357_v0 }
  0x89   : > { %2082 = vmatpush3.bf16.xpose.msra.mxu0 %v785_v2 }
  0x8a   : > { %2102 = vmatpush3.bf16.xpose.msra.mxu1 %v898_v3  ;;  %2107 = vmatprep.subr.bf16.mxu0 %v2357_v0  ;;  %v2262_v3 = vld [vmem:[%s2485_s29 + $0x10] sm:$0xff]  }
  0x8b   : > { %2127 = vmatprep.subr.bf16.mxu1 %v2357_v0 }
  0x90   : > { %2084 = vmatmul.mubr.msk.bf16.vlgmr.msra.gmra.mxu0 %vm363_vm0, %v2251_v4  ;;  %v2263_v4 = vld [vmem:[%s2485_s29 + $0x58] sm:$0xff]  }
  0x91   : > { %2104 = vmatmul.mubr.msk.bf16.vlgmr.msra.gmra.mxu1 %vm363_vm0, %v2252_v5  ;;  %2123 = vmatprep.mubr.msk.bf16.mxu0 %vm2358_vm1, %v2357_v0  ;;  %v2264_v5 = vld [vmem:[%s2485_s29 + $0x8] sm:$0xff]  }
  0x92   : > { %2143 = vmatprep.mubr.msk.bf16.mxu1 %vm2358_vm1, %v2357_v0  ;;  %2108 = vmatpush3.bf16.msra.mxu0 %v2253_v41 }
  0x93   : > { %2128 = vmatpush3.bf16.msra.mxu1 %v2255_v42  ;;  %2109 = vmatprep.subr.bf16.mxu0 %v2357_v0 }
  0x94   : > { %2129 = vmatprep.subr.bf16.mxu1 %v2357_v0 }
  0x96   : > { %2110 = vmatpush3.bf16.msra.mxu0 %v2254_v43 }
  0x97   : > { %2111 = vmatprep.subr.bf16.mxu0 %v2357_v0  ;;  %2130 = vmatpush3.bf16.msra.mxu1 %v2257_v47 }
  0x98   : > { %2131 = vmatprep.subr.bf16.mxu1 %v2357_v0 }
  0x9a   : > { %2112 = vmatpush3.bf16.msra.mxu0 %v2256_v46 }
  0x9b   : > { %2113 = vmatprep.subr.bf16.mxu0 %v2357_v0  ;;  %2132 = vmatpush3.bf16.msra.mxu1 %v2259_v56  ;;  %v2270_v56 = vld [vmem:[%s2485_s29 + $0xb0] sm:$0xff]  }
  0x9c   : > { %2133 = vmatprep.subr.bf16.mxu1 %v2357_v0 }
  0x9e   : > { %2114 = vmatpush3.bf16.msra.mxu0 %v2258_v55 }
  0x9f   : > { %2115 = vmatprep.subr.bf16.mxu0 %v2357_v0  ;;  %2134 = vmatpush3.bf16.msra.mxu1 %v2261_v1  ;;  %v2274_v1 = vld [vmem:[%s2485_s29 + $0xa0] sm:$0xff]  }
  0xa0   : > { %2135 = vmatprep.subr.bf16.mxu1 %v2357_v0 }
  0xa2   : > { %2116 = vmatpush3.bf16.msra.mxu0 %v2260_v63  ;;  %v2273_v63 = vld [vmem:[%s2485_s29 + $0xf0] sm:$0xff]  }
  0xa3   : > { %2117 = vmatprep.subr.bf16.mxu0 %v2357_v0  ;;  %2136 = vmatpush3.bf16.msra.mxu1 %v2263_v4  ;;  %v2276_v4 = vld [vmem:[%s2485_s29 + $0x98] sm:$0xff]  }
  0xa4   : > { %2137 = vmatprep.subr.bf16.mxu1 %v2357_v0 }
  0xa6   : > { %2118 = vmatpush3.bf16.msra.mxu0 %v2262_v3  ;;  %v2275_v3 = vld [vmem:[%s2485_s29 + $0xe8] sm:$0xff]  }
  0xa7   : > { %2119 = vmatprep.subr.bf16.mxu0 %v2357_v0  ;;  %2138 = vmatpush3.bf16.msra.mxu1 %v2265_v6  ;;  %v2278_v6 = vld [vmem:[%s2485_s29 + $0x90] sm:$0xff]  }
  0xa8   : > { %2139 = vmatprep.subr.bf16.mxu1 %v2357_v0 }
  0xaa   : > { %2120 = vmatpush3.bf16.msra.mxu0 %v2264_v5  ;;  %v2277_v5 = vld [vmem:[%s2485_s29 + $0xe0] sm:$0xff]  }
  0xab   : > { %2121 = vmatprep.subr.bf16.mxu0 %v2357_v0 }
 0x110   : > { %v616_v7 = vpop.f32.mrf.mxu0 }
 0x111   : > { %v962_v9 = vmul.f32 0.35355338, %v616_v7  ;;  %v729_v10 = vpop.f32.mrf.mxu1  ;;  %v2266_v7 = vld [vmem:[%s2485_s29] sm:$0xff]  }
 0x112   : > { %v964_v11 = vmul.f32 0.35355338, %v729_v10  ;;  %v2045_v12 = vpop.f32.mrf.mxu0  ;;  %2122 = vmatpush3.bf16.msra.mxu0 %v2266_v7  ;;  %v2687_v10 = vld [vmem:[#allocation2 + $0x20] sm:$0xff]  ;;  %v2279_v7 = vld [vmem:[%s2485_s29 + $0xd8] sm:$0xff]  }
 0x113   : > { %v2065_v13 = vpop.f32.mrf.mxu1  ;;  %v2591_v14 = vadd.f32 %v1900_v8, %v962_v9  ;;  %2147 = vmatprep.subr.bf16.mxu0 %v2357_v0  ;;  %v2268_v9 = vld [vmem:[%s2485_s29 + $0x40] sm:$0xff]  }
 0x114   : > { %v619_v15 = vpop.f32.mrf.mxu0  ;;  %v2593_v16 = vadd.f32 %v1900_v8, %v964_v11  ;;  %v2692_v13 = vld [vmem:[#allocation2 + $0x30] sm:$0xff] }
 0x115   : > { %v963_v17 = vmul.f32 0.35355338, %v619_v15  ;;  %v732_v18 = vpop.f32.mrf.mxu1  ;;  %992 = vmax.xlane.f32.xlu0 %v2591_v14  ;;  %v2694_v15 = vld [vmem:[#allocation2 + $0x28] sm:$0xff] }
 0x116   : > { %v965_v19 = vmul.f32 0.35355338, %v732_v18  ;;  %996 = vmax.xlane.f32.xlu1 %v2593_v16  ;;  %v2046_v20 = vpop.f32.mrf.mxu0 }
 0x117   : > { %v2066_v21 = vpop.f32.mrf.mxu1  ;;  %v2597_v22 = vadd.f32 %v1900_v8, %v963_v17 }
 0x118   : > { %v2599_v23 = vadd.f32 %v1900_v8, %v965_v19 }
 0x119   : > { %994 = vmax.xlane.f32.xlu0 %v2597_v22 }
 0x11a   : > { %998 = vmax.xlane.f32.xlu1 %v2599_v23 }
 0x150   : > { %v842_v25 = vpop.f32.mrf.mxu0 }
 0x151   : > { %v966_v26 = vmul.f32 0.35355338, %v842_v25  ;;  %v955_v27 = vpop.f32.mrf.mxu1 }
 0x152   : > { %v968_v28 = vmul.f32 0.35355338, %v955_v27  ;;  %v2085_v29 = vpop.f32.mrf.mxu0 }
 0x153   : > { %v2105_v30 = vpop.f32.mrf.mxu1  ;;  %v2603_v31 = vadd.f32 %v1900_v8, %v966_v26 }
 0x154   : > { %v845_v32 = vpop.f32.mrf.mxu0  ;;  %v2606_v35 = vadd.f32 %v1900_v8, %v968_v28 }
 0x155   : > { %v967_v33 = vmul.f32 0.35355338, %v845_v32  ;;  %v958_v34 = vpop.f32.mrf.mxu1  ;;  %1000 = vmax.xlane.f32.xlu0 %v2603_v31 }
 0x156   : > { %v2086_v36 = vpop.f32.mrf.mxu0  ;;  %v969_v37 = vmul.f32 0.35355338, %v958_v34 }
 0x157   : > { %v2106_v38 = vpop.f32.mrf.mxu1  ;;  %v2608_v39 = vadd.f32 %v1900_v8, %v967_v33 }
 0x158   : > { %v2612_v40 = vadd.f32 %v1900_v8, %v969_v37  ;;  %v2267_v8 = vld [vmem:[%s2485_s29 + $0x48] sm:$0xff]  }
 0x159   : > { %1004 = vmax.xlane.f32.xlu0 %v2606_v35  ;;  %1002 = vmax.xlane.f32.xlu1 %v2608_v39 }
 0x15a   : > { %2140 = vmatpush3.bf16.msra.mxu1 %v2267_v8  ;;  %v2280_v8 = vld [vmem:[%s2485_s29 + $0x88] sm:$0xff]  }
 0x15b   : > { %2141 = vmatprep.subr.bf16.mxu1 %v2357_v0 }
 0x15d   : > { %1006 = vmax.xlane.f32.xlu1 %v2612_v40 }
 0x15e   : > { %2142 = vmatpush3.bf16.msra.mxu1 %v2268_v9  ;;  %v2281_v9 = vld [vmem:[%s2485_s29 + $0xd0] sm:$0xff]  }
 0x15f   : > { %2167 = vmatprep.subr.bf16.mxu1 %v2357_v0 }
 0x19e   : > { %v993_v48 = vpop.xlane.xlu0 %992 }
 0x19f   : > { %v997_v49 = vpop.xlane.xlu1 %996  ;;  %v2628_v50 = vmax.f32 %v2621_v44, %v993_v48 }
 0x1a0   : > { %v2631_v51 = vmax.f32 %v2623_v45, %v997_v49  ;;  %v2269_v49 = vld [vmem:[%s2485_s29 + $0xb8] sm:$0xff]  }
 0x1a1   : > { %v1016_v53 = vsub.f32 %v2621_v44, %v2628_v50  ;;  %1585 = vst.msk [vmem:[#allocation2] sm:$0xff] %vm346_vm2, %v2628_v50  ;;  %1042 = vperm.xlu0 %2215, %v2628_v50  }
 0x1a2   : > { %v1018_v57 = vsub.f32 %v2623_v45, %v2631_v51  ;;  %1587 = vst.msk [vmem:[#allocation2 + $0x10] sm:$0xff] %vm346_vm2, %v2631_v51  ;;  %1052 = vperm.xlu1 %2216, %v2631_v51   ;;  %v995_v58 = vpop.xlane.xlu0 %994 }
 0x1a3   : > { %v2652_v59 = vmax.f32 %v2633_v52, %v995_v58  ;;  %v999_v60 = vpop.xlane.xlu1 %998  ;;  %v2271_v58 = vld [vmem:[%s2485_s29 + $0xf8] sm:$0xff]  }
 0x1a4   : > { %v2655_v61 = vmax.f32 %v2642_v54, %v999_v60  ;;  %v2272_v60 = vld [vmem:[%s2485_s29 + $0xa8] sm:$0xff]   ;;  %v1028_v44 = vmul.f32 1.442695, %v1018_v57 }
 0x1a5   : > { %v1017_v62 = vsub.f32 %v2633_v52, %v2652_v59  ;;  %1586 = vst.msk [vmem:[#allocation2 + $0x8] sm:$0xff] %vm346_vm2, %v2652_v59 }
 0x1a6   : > { %v1019_v2 = vsub.f32 %v2642_v54, %v2655_v61  ;;  %1588 = vst.msk [vmem:[#allocation2 + $0x18] sm:$0xff] %vm346_vm2, %v2655_v61  ;;  %1047 = vperm.xlu1 %2216, %v2652_v59  }
 0x1aa   : > { %1057 = vperm.xlu1 %2216, %v2655_v61  }
 0x1de   : > { %v1001_v11 = vpop.xlane.xlu0 %1000 }
 0x1df   : > { %v2690_v12 = vmax.f32 %v2687_v10, %v1001_v11  ;;  %v2282_v11 = vld [vmem:[%s2485_s29 + $0x80] sm:$0xff]  }
 0x1e1   : > { %v1020_v17 = vsub.f32 %v2687_v10, %v2690_v12  ;;  %1589 = vst.msk [vmem:[#allocation2 + $0x20] sm:$0xff] %vm346_vm2, %v2690_v12  ;;  %1062 = vperm.xlu1 %2216, %v2690_v12   ;;  %v1104_v12 = vld [vmem:[#allocation3] sm:$0xff] }
 0x1e2   : > { %v1005_v18 = vpop.xlane.xlu0 %1004  ;;  %v1003_v19 = vpop.xlane.xlu1 %1002 }
 0x1e3   : > { %v2702_v20 = vmax.f32 %v2692_v13, %v1005_v18  ;;  %v2705_v21 = vmax.f32 %v2694_v15, %v1003_v19  ;;  %v2283_v18 = vld [vmem:[%s2485_s29 + $0xc8] sm:$0xff]   ;;  %v2284_v19 = vld [vmem:[%s2485_s29 + $0xc0] sm:$0xff]   ;;  %v1032_v52 = vmul.f32 1.442695, %v1020_v17 }
 0x1e5   : > { %v1022_v25 = vsub.f32 %v2692_v13, %v2702_v20  ;;  %1591 = vst.msk [vmem:[#allocation2 + $0x30] sm:$0xff] %vm346_vm2, %v2702_v20  ;;  %v1021_v26 = vsub.f32 %v2694_v15, %v2705_v21  ;;  %1590 = vst.msk [vmem:[#allocation2 + $0x28] sm:$0xff] %vm346_vm2, %v2705_v21  ;;  %1072 = vperm.xlu1 %2216, %v2702_v20   ;;  %v1106_v13 = vld [vmem:[#allocation3 + $0x10] sm:$0xff] }
 0x1e6   : > { %v1007_v27 = vpop.xlane.xlu1 %1006 }
 0x1e7   : > { %v2719_v28 = vmax.f32 %v2707_v24, %v1007_v27  ;;  %v1034_v50 = vmul.f32 1.442695, %v1021_v26  ;;  %v1036_v45 = vmul.f32 1.442695, %v1022_v25  ;;  %v1105_v25 = vld [vmem:[#allocation3 + $0x8] sm:$0xff] }
 0x1e9   : > { %v1023_v29 = vsub.f32 %v2707_v24, %v2719_v28  ;;  %1592 = vst.msk [vmem:[#allocation2 + $0x38] sm:$0xff] %vm346_vm2, %v2719_v28  ;;  %1067 = vperm.xlu1 %2216, %v2705_v21  }
 0x1ed   : > { %1077 = vperm.xlu1 %2216, %v2719_v28  }
 0x21c   : > { %v1043_v30 = vpop.permute.xlu0 %1042 }
 0x21d   : > { %v1080_v32 = vsub.f32 %v2591_v14, %v1043_v30  ;;  %v1053_v33 = vpop.permute.xlu1 %1052 }
 0x21e   : > { %v1082_v34 = vsub.f32 %v2593_v16, %v1053_v33 }
 0x21f   : > { %v1088_v36 = vmul.f32 1.442695, %v1080_v32 }
 0x220   : > { %v1092_v37 = vmul.f32 1.442695, %v1082_v34 }
 0x221   : > { %2285 = vpow2.f32 %v1088_v36  ;;  %v1048_v38 = vpop.permute.xlu1 %1047 }
 0x222   : > { %2287 = vpow2.f32 %v1092_v37  ;;  %v1081_v41 = vsub.f32 %v2597_v22, %v1048_v38 }
 0x224   : > { %v1090_v42 = vmul.f32 1.442695, %v1081_v41 }
 0x225   : > { %v1058_v43 = vpop.permute.xlu1 %1057 }
 0x226   : > { %2289 = vpow2.f32 %v1090_v42  ;;  %v1083_v46 = vsub.f32 %v2599_v23, %v1058_v43 }
 0x228   : > { %v1094_v47 = vmul.f32 1.442695, %v1083_v46 }
 0x22a   : > { %2291 = vpow2.f32 %v1094_v47 }
 0x22e   : > { %v2286_v14 = vpop.eup %2285 }
 0x22f   : > { %v2288_v48 = vpop.eup %2287  ;;  %1120 = vadd.xlane.f32.xlu1 %v2286_v14 }
 0x230   : > { %1124 = vadd.xlane.f32.xlu0 %v2288_v48 }
 0x233   : > { %v2290_v16 = vpop.eup %2289 }
 0x234   : > { %1122 = vadd.xlane.f32.xlu0 %v2290_v16  ;;  %v1209_v55 = vpack.c.bf16 %v2290_v16, %v2286_v14 }
 0x236   : > { %2124 = vmatmul.mubr.bf16.vlgmr.msra.gmra.mxu0 %v1209_v55 }
 0x237   : > { %v2292_v22 = vpop.eup %2291  ;;  %2148 = vmatpush3.bf16.msra.mxu0 %v2269_v49  ;;  %2163 = vmatprep.mubr.msk.bf16.mxu0 %vm2358_vm1, %v2357_v0  ;;  %v1107_v49 = vld [vmem:[#allocation3 + $0x18] sm:$0xff] }
 0x238   : > { %1126 = vadd.xlane.f32.xlu1 %v2292_v22  ;;  %v1210_v23 = vpack.c.bf16 %v2292_v22, %v2288_v48  ;;  %2149 = vmatprep.subr.bf16.mxu0 %v2357_v0  ;;  %v1026_v48 = vmul.f32 1.442695, %v1017_v62 }
 0x23a   : > { %2144 = vmatmul.mubr.bf16.vlgmr.msra.gmra.mxu1 %v1210_v23 }
 0x23b   : > { %2150 = vmatpush3.bf16.msra.mxu0 %v2270_v56  ;;  %2168 = vmatpush3.bf16.msra.mxu1 %v2271_v58 }
 0x23c   : > { %2151 = vmatprep.subr.bf16.mxu0 %v2357_v0  ;;  %2169 = vmatprep.subr.bf16.mxu1 %v2357_v0 }
 0x23d   : > { %2183 = vmatprep.mubr.msk.bf16.mxu1 %vm2358_vm1, %v2357_v0 }
 0x23f   : > { %2152 = vmatpush3.bf16.msra.mxu0 %v2272_v60  ;;  %2170 = vmatpush3.bf16.msra.mxu1 %v2273_v63 }
 0x240   : > { %2153 = vmatprep.subr.bf16.mxu0 %v2357_v0  ;;  %2171 = vmatprep.subr.bf16.mxu1 %v2357_v0 }
 0x243   : > { %2154 = vmatpush3.bf16.msra.mxu0 %v2274_v1  ;;  %2172 = vmatpush3.bf16.msra.mxu1 %v2275_v3 }
 0x244   : > { %2155 = vmatprep.subr.bf16.mxu0 %v2357_v0  ;;  %2173 = vmatprep.subr.bf16.mxu1 %v2357_v0 }
 0x247   : > { %2156 = vmatpush3.bf16.msra.mxu0 %v2276_v4  ;;  %2174 = vmatpush3.bf16.msra.mxu1 %v2277_v5 }
 0x248   : > { %2157 = vmatprep.subr.bf16.mxu0 %v2357_v0  ;;  %2175 = vmatprep.subr.bf16.mxu1 %v2357_v0 }
 0x24b   : > { %2158 = vmatpush3.bf16.msra.mxu0 %v2278_v6  ;;  %2176 = vmatpush3.bf16.msra.mxu1 %v2279_v7  ;;  %v1108_v7 = vld [vmem:[#allocation3 + $0x20] sm:$0xff] }
 0x24c   : > { %2159 = vmatprep.subr.bf16.mxu0 %v2357_v0  ;;  %2177 = vmatprep.subr.bf16.mxu1 %v2357_v0 }
 0x24f   : > { %2160 = vmatpush3.bf16.msra.mxu0 %v2280_v8  ;;  %2178 = vmatpush3.bf16.msra.mxu1 %v2281_v9 }
 0x250   : > { %2161 = vmatprep.subr.bf16.mxu0 %v2357_v0  ;;  %2179 = vmatprep.subr.bf16.mxu1 %v2357_v0 }
 0x253   : > { %2162 = vmatpush3.bf16.msra.mxu0 %v2282_v11  ;;  %2180 = vmatpush3.bf16.msra.mxu1 %v2283_v18 }
 0x254   : > { %2181 = vmatprep.subr.bf16.mxu1 %v2357_v0 }
 0x257   : > { %2182 = vmatpush3.bf16.msra.mxu1 %v2284_v19 }
 0x25c   : > { %v1063_v27 = vpop.permute.xlu1 %1062 }
 0x25d   : > { %v1084_v30 = vsub.f32 %v2603_v31, %v1063_v27  ;;  %v1110_v27 = vld [vmem:[#allocation3 + $0x30] sm:$0xff] }
 0x25f   : > { %v1096_v32 = vmul.f32 1.442695, %v1084_v30 }
 0x260   : > { %v1073_v33 = vpop.permute.xlu1 %1072 }
 0x261   : > { %2293 = vpow2.f32 %v1096_v32  ;;  %v1086_v34 = vsub.f32 %v2606_v35, %v1073_v33  ;;  %v1024_v35 = vmul.f32 1.442695, %v1016_v53  ;;  %v1038_v53 = vmul.f32 1.442695, %v1023_v29 }
 0x263   : > { %v1100_v36 = vmul.f32 1.442695, %v1086_v34 }
 0x264   : > { %v1068_v37 = vpop.permute.xlu1 %1067 }
 0x265   : > { %2295 = vpow2.f32 %v1100_v36  ;;  %v1085_v38 = vsub.f32 %v2608_v39, %v1068_v37  ;;  %v1109_v37 = vld [vmem:[#allocation3 + $0x28] sm:$0xff] }
 0x267   : > { %v1098_v41 = vmul.f32 1.442695, %v1085_v38 }
 0x268   : > { %v1078_v42 = vpop.permute.xlu1 %1077 }
 0x269   : > { %2297 = vpow2.f32 %v1098_v41  ;;  %v1087_v43 = vsub.f32 %v2612_v40, %v1078_v42  ;;  %v1030_v40 = vmul.f32 1.442695, %v1019_v2 }
 0x26b   : > { %v1102_v0 = vmul.f32 1.442695, %v1087_v43 }
 0x26d   : > { %2299 = vpow2.f32 %v1102_v0 }
 0x26e   : > { %v2294_v46 = vpop.eup %2293  ;;  %2301 = vpow2.f32 %v1024_v35  ;;  %v1153_v35 = vld [vmem:[#allocation4] sm:$0xff] }
 0x26f   : > { %1128 = vadd.xlane.f32.xlu0 %v2294_v46  ;;  %2303 = vpow2.f32 %v1026_v48 }
 0x270   : > { %2305 = vpow2.f32 %v1030_v40 }
 0x271   : > { %2307 = vpow2.f32 %v1028_v44 }
 0x272   : > { %v2296_v31 = vpop.eup %2295  ;;  %2309 = vpow2.f32 %v1034_v50  ;;  %v1156_v50 = vld [vmem:[#allocation4 + $0x18] sm:$0xff] }
 0x273   : > { %1132 = vadd.xlane.f32.xlu0 %v2296_v31  ;;  %2311 = vpow2.f32 %v1032_v52  ;;  %v1154_v52 = vld [vmem:[#allocation4 + $0x8] sm:$0xff] }
 0x274   : > { %2313 = vpow2.f32 %v1038_v53 }
 0x275   : > { %2315 = vpow2.f32 %v1036_v45 }
 0x276   : > { %v2298_v47 = vpop.eup %2297 }
 0x277   : > { %1130 = vadd.xlane.f32.xlu1 %v2298_v47  ;;  %v1211_v14 = vpack.c.bf16 %v2298_v47, %v2294_v46 }
 0x279   : > { %2164 = vmatmul.mubr.bf16.vlgmr.msra.gmra.mxu0 %v1211_v14 }
 0x27a   : > { %v2300_v39 = vpop.eup %2299 }
 0x27b   : > { %1134 = vadd.xlane.f32.xlu1 %v2300_v39  ;;  %v1212_v16 = vpack.c.bf16 %v2300_v39, %v2296_v31  ;;  %v2302_v51 = vpop.eup %2301  ;;  %v1111_v31 = vld [vmem:[#allocation3 + $0x38] sm:$0xff] }
 0x27c   : > { %v2304_v54 = vpop.eup %2303  ;;  %v1112_v15 = vmul.f32 %v2302_v51, %v1104_v12 }
 0x27d   : > { %2184 = vmatmul.mubr.bf16.vlgmr.msra.gmra.mxu1 %v1212_v16  ;;  %v2306_v57 = vpop.eup %2305  ;;  %v1113_v28 = vmul.f32 %v2304_v54, %v1105_v25 }
 0x27e   : > { %v2308_v59 = vpop.eup %2307  ;;  %v1115_v22 = vmul.f32 %v2306_v57, %v1107_v49 }
 0x27f   : > { %v2310_v61 = vpop.eup %2309  ;;  %v1114_v17 = vmul.f32 %v2308_v59, %v1106_v13 }
 0x280   : > { %v2312_v62 = vpop.eup %2311  ;;  %v1117_v43 = vmul.f32 %v2310_v61, %v1109_v37 }
 0x281   : > { %v2793_v2 = vpop.eup %2313  ;;  %v1116_v9 = vmul.f32 %v2312_v62, %v1108_v7 }
 0x282   : > { %v2316_v10 = vpop.eup %2315  ;;  %v1119_v39 = vmul.f32 %v2793_v2, %v1111_v31 }
 0x283   : > { %v1118_v36 = vmul.f32 %v2316_v10, %v1110_v27 }
 0x289   : > { %1163 = vperm.xlu0 %2215, %v2302_v51  }
 0x28c   : > { %1168 = vperm.xlu1 %2216, %v2304_v54  }
 0x28d   : > { %1178 = vperm.xlu0 %2215, %v2306_v57  }
 0x290   : > { %1173 = vperm.xlu1 %2216, %v2308_v59  }
 0x291   : > { %1188 = vperm.xlu0 %2215, %v2310_v61   ;;  %v1155_v61 = vld [vmem:[#allocation4 + $0x10] sm:$0xff] }
 0x294   : > { %1183 = vperm.xlu1 %2216, %v2312_v62  }
 0x295   : > { %1198 = vperm.xlu0 %2215, %v2793_v2  }
 0x298   : > { %1193 = vperm.xlu1 %2216, %v2316_v10  }
 0x2b8   : > { %v1121_v20 = vpop.xlane.xlu1 %1120 }
 0x2b9   : > { %v1125_v21 = vpop.xlane.xlu0 %1124  ;;  %v1136_v24 = vadd.f32 %v1121_v20, %v1112_v15 }
 0x2ba   : > { %v1138_v26 = vadd.f32 %v1125_v21, %v1114_v17 }
 0x2bb   : > { %1145 = vst.msk [vmem:[#allocation3] sm:$0xff] %vm346_vm2, %v1136_v24 }
 0x2bc   : > { %1147 = vst.msk [vmem:[#allocation3 + $0x10] sm:$0xff] %vm346_vm2, %v1138_v26 }
 0x2bd   : > { %v1123_v29 = vpop.xlane.xlu0 %1122 }
 0x2be   : > { %v1137_v55 = vadd.f32 %v1123_v29, %v1113_v28  ;;  %v1157_v28 = vld [vmem:[#allocation4 + $0x20] sm:$0xff] }
 0x2c0   : > { %1146 = vst.msk [vmem:[#allocation3 + $0x8] sm:$0xff] %vm346_vm2, %v1137_v55  ;;  %v1158_v55 = vld [vmem:[#allocation4 + $0x28] sm:$0xff] }
 0x2c1   : > { %v1127_v56 = vpop.xlane.xlu1 %1126 }
 0x2c2   : > { %v1139_v58 = vadd.f32 %v1127_v56, %v1115_v22  ;;  %v1596_v23 = vld [vmem:[#allocation3] sm:$0xff]  ;;  %v1159_v22 = vld [vmem:[#allocation4 + $0x30] sm:$0xff] }
 0x2c3   : > { %2317 = vrcp.f32 %v1596_v23  ;;  %v1598_v60 = vld [vmem:[#allocation3 + $0x10] sm:$0xff] }
 0x2c4   : > { %1148 = vst.msk [vmem:[#allocation3 + $0x18] sm:$0xff] %vm346_vm2, %v1139_v58  ;;  %2319 = vrcp.f32 %v1598_v60 }
 0x2c7   : > { %v1597_v63 = vld [vmem:[#allocation3 + $0x8] sm:$0xff] }
 0x2c8   : > { %2321 = vrcp.f32 %v1597_v63 }
 0x2cb   : > { %v1599_v1 = vld [vmem:[#allocation3 + $0x18] sm:$0xff] }
 0x2cc   : > { %2323 = vrcp.f32 %v1599_v1 }
 0x2d0   : > { %v2318_v3 = vpop.eup %2317 }
 0x2d1   : > { %1622 = vperm.xlu1 %2216, %v2318_v3   ;;  %v2320_v4 = vpop.eup %2319 }
 0x2d5   : > { %v2322_v5 = vpop.eup %2321  ;;  %1632 = vperm.xlu1 %2216, %v2320_v4   ;;  %v1160_v4 = vld [vmem:[#allocation4 + $0x38] sm:$0xff] }
 0x2d6   : > { %1627 = vperm.xlu0 %2215, %v2322_v5  }
 0x2d9   : > { %v2324_v6 = vpop.eup %2323 }
 0x2da   : > { %1637 = vperm.xlu0 %2215, %v2324_v6  }
 0x2f6   : > { %v1295_v8 = vpop.f32.mrf.mxu0 }
 0x2f8   : > { %v2125_v11 = vpop.f32.mrf.mxu0  ;;  %v1129_v18 = vpop.xlane.xlu0 %1128 }
 0x2f9   : > { %v1140_v19 = vadd.f32 %v1129_v18, %v1116_v9 }
 0x2fa   : > { %v1298_v30 = vpop.f32.mrf.mxu0  ;;  %v1384_v32 = vpop.f32.mrf.mxu1 }
 0x2fb   : > { %1149 = vst.msk [vmem:[#allocation3 + $0x20] sm:$0xff] %vm346_vm2, %v1140_v19 }
 0x2fc   : > { %v2126_v33 = vpop.f32.mrf.mxu0  ;;  %v2145_v34 = vpop.f32.mrf.mxu1 }
 0x2fd   : > { %v1133_v38 = vpop.xlane.xlu0 %1132 }
 0x2fe   : > { %v1142_v41 = vadd.f32 %v1133_v38, %v1118_v36  ;;  %v1387_v42 = vpop.f32.mrf.mxu1 }
 0x300   : > { %1151 = vst.msk [vmem:[#allocation3 + $0x30] sm:$0xff] %vm346_vm2, %v1142_v41  ;;  %v2146_v0 = vpop.f32.mrf.mxu1  ;;  %v1131_v46 = vpop.xlane.xlu1 %1130 }
 0x301   : > { %v1141_v47 = vadd.f32 %v1131_v46, %v1117_v43 }
 0x302   : > { %v1600_v14 = vld [vmem:[#allocation3 + $0x20] sm:$0xff] }
 0x303   : > { %1150 = vst.msk [vmem:[#allocation3 + $0x28] sm:$0xff] %vm346_vm2, %v1141_v47  ;;  %2325 = vrcp.f32 %v1600_v14 }
 0x304   : > { %v1164_v48 = vpop.permute.xlu0 %1163  ;;  %v1135_v40 = vpop.xlane.xlu1 %1134 }
 0x305   : > { %v1201_v16 = vmul.f32 %v1164_v48, %v1153_v35  ;;  %v1143_v44 = vadd.f32 %v1135_v40, %v1119_v39 }
 0x307   : > { %v1569_v53 = vadd.f32 %v1295_v8, %v1201_v16  ;;  %1152 = vst.msk [vmem:[#allocation3 + $0x38] sm:$0xff] %vm346_vm2, %v1143_v44  ;;  %v1602_v45 = vld [vmem:[#allocation3 + $0x30] sm:$0xff] }
 0x308   : > { %v1179_v51 = vpop.permute.xlu0 %1178  ;;  %v1169_v54 = vpop.permute.xlu1 %1168  ;;  %2327 = vrcp.f32 %v1602_v45 }
 0x309   : > { %1577 = vst.msk [vmem:[#allocation4] sm:$0xff] %vm363_vm0, %v1569_v53  ;;  %v1204_v57 = vmul.f32 %v1179_v51, %v1156_v50  ;;  %v1202_v59 = vmul.f32 %v1169_v54, %v1154_v52 }
 0x30a   : > { %v1601_v62 = vld [vmem:[#allocation3 + $0x28] sm:$0xff] }
 0x30b   : > { %v1572_v2 = vadd.f32 %v1387_v42, %v1204_v57  ;;  %v1570_v10 = vadd.f32 %v1298_v30, %v1202_v59  ;;  %2329 = vrcp.f32 %v1601_v62 }
 0x30c   : > { %v1174_v12 = vpop.permute.xlu1 %1173  ;;  %v1189_v29 = vpop.permute.xlu0 %1188 }
 0x30d   : > { %1580 = vst.msk [vmem:[#allocation4 + $0x18] sm:$0xff] %vm363_vm0, %v1572_v2  ;;  %1578 = vst.msk [vmem:[#allocation4 + $0x8] sm:$0xff] %vm363_vm0, %v1570_v10  ;;  %v1203_v13 = vmul.f32 %v1174_v12, %v1155_v61  ;;  %v1206_v63 = vmul.f32 %v1189_v29, %v1158_v55 }
 0x30e   : > { %v1603_v15 = vld [vmem:[#allocation3 + $0x38] sm:$0xff] }
 0x30f   : > { %v1571_v17 = vadd.f32 %v1384_v32, %v1203_v13  ;;  %2331 = vrcp.f32 %v1603_v15 }
 0x310   : > { %v2326_v20 = vpop.eup %2325  ;;  %v1184_v26 = vpop.permute.xlu1 %1183  ;;  %v1612_v33 = vld [vmem:[#allocation4] sm:$0xff] }
 0x311   : > { %1579 = vst.msk [vmem:[#allocation4 + $0x10] sm:$0xff] %vm363_vm0, %v1571_v17  ;;  %1642 = vperm.xlu1 %2216, %v2326_v20   ;;  %v1205_v49 = vmul.f32 %v1184_v26, %v1157_v28  ;;  %v1199_v1 = vpop.permute.xlu0 %1198 }
 0x312   : > { %v1208_v18 = vmul.f32 %v1199_v1, %v1160_v4 }
 0x314   : > { %v1194_v56 = vpop.permute.xlu1 %1193  ;;  %v1613_v42 = vld [vmem:[#allocation4 + $0x8] sm:$0xff]  ;;  %v1615_v47 = vld [vmem:[#allocation4 + $0x18] sm:$0xff] }
 0x315   : > { %v2328_v21 = vpop.eup %2327  ;;  %v1207_v3 = vmul.f32 %v1194_v56, %v1159_v22 }
 0x316   : > { %1652 = vperm.xlu1 %2216, %v2328_v21  }
 0x318   : > { %v2330_v24 = vpop.eup %2329  ;;  %v1614_v37 = vld [vmem:[#allocation4 + $0x10] sm:$0xff] }
 0x319   : > { %1647 = vperm.xlu0 %2215, %v2330_v24  }
 0x31c   : > { %v2332_v25 = vpop.eup %2331 }
 0x31d   : > { %1657 = vperm.xlu0 %2215, %v2332_v25  }
 0x339   : > { %v1473_v58 = vpop.f32.mrf.mxu0 }
 0x33a   : > { %v1573_v23 = vadd.f32 %v1473_v58, %v1205_v49 }
 0x33b   : > { %v2165_v60 = vpop.f32.mrf.mxu0 }
 0x33c   : > { %1581 = vst.msk [vmem:[#allocation4 + $0x20] sm:$0xff] %vm363_vm0, %v1573_v23 }
 0x33d   : > { %v1476_v5 = vpop.f32.mrf.mxu0  ;;  %v1562_v6 = vpop.f32.mrf.mxu1 }
 0x33e   : > { %v1574_v7 = vadd.f32 %v1476_v5, %v1206_v63  ;;  %v1575_v8 = vadd.f32 %v1562_v6, %v1207_v3 }
 0x33f   : > { %v2166_v9 = vpop.f32.mrf.mxu0  ;;  %v2185_v11 = vpop.f32.mrf.mxu1 }
 0x340   : > { %1582 = vst.msk [vmem:[#allocation4 + $0x28] sm:$0xff] %vm363_vm0, %v1574_v7  ;;  %1583 = vst.msk [vmem:[#allocation4 + $0x30] sm:$0xff] %vm363_vm0, %v1575_v8 }
 0x341   : > { %v1565_v19 = vpop.f32.mrf.mxu1 }
 0x342   : > { %v1576_v27 = vadd.f32 %v1565_v19, %v1208_v18 }
 0x343   : > { %v2186_v30 = vpop.f32.mrf.mxu1  ;;  %v1616_v40 = vld [vmem:[#allocation4 + $0x20] sm:$0xff] }
 0x344   : > { %1584 = vst.msk [vmem:[#allocation4 + $0x38] sm:$0xff] %vm363_vm0, %v1576_v27 }
 0x347   : > { %v1618_v50 = vld [vmem:[#allocation4 + $0x30] sm:$0xff]  ;;  %v1617_v54 = vld [vmem:[#allocation4 + $0x28] sm:$0xff] }
 0x34b   : > { %v1619_v61 = vld [vmem:[#allocation4 + $0x38] sm:$0xff] }
 0x34c   : > { %v1623_v32 = vpop.permute.xlu1 %1622 }
 0x34d   : > { %v1660_v34 = vmul.f32 %v1623_v32, %v1612_v33 }
 0x34f   : > { %v1947_v36 = vpack.c.bf16 %v1660_v34, %v1660_v34 }
 0x350   : > { %v1633_v38 = vpop.permute.xlu1 %1632 }
 0x351   : > { %1701 = vst.msk [vmem:[%s2818_s9] sm:$0xf] %vm1700_vm3, %v1947_v36  ;;  %v1628_v41 = vpop.permute.xlu0 %1627  ;;  %v1662_v43 = vmul.f32 %v1633_v38, %v1614_v37 }
 0x352   : > { %v1661_v0 = vmul.f32 %v1628_v41, %v1613_v42 }
 0x353   : > { %v1949_v46 = vpack.c.bf16 %v1662_v43, %v1662_v43 }
 0x354   : > { %v1948_v31 = vpack.c.bf16 %v1661_v0, %v1661_v0 }
 0x355   : > { %1703 = vst.msk [vmem:[%s2818_s9 + $0x8] sm:$0xf] %vm1700_vm3, %v1949_v46  ;;  %v1638_v35 = vpop.permute.xlu0 %1637 }
 0x356   : > { %1702 = vst.msk [vmem:[%s2818_s9 + $0x4] sm:$0xf] %vm1700_vm3, %v1948_v31  ;;  %v1663_v14 = vmul.f32 %v1638_v35, %v1615_v47 }
 0x358   : > { %v1950_v39 = vpack.c.bf16 %v1663_v14, %v1663_v14 }
 0x35a   : > { %1704 = vst.msk [vmem:[%s2818_s9 + $0xc] sm:$0xf] %vm1700_vm3, %v1950_v39 }
 0x38c   : > { %v1643_v48 = vpop.permute.xlu1 %1642 }
 0x38d   : > { %v1664_v16 = vmul.f32 %v1643_v48, %v1616_v40 }
 0x38f   : > { %v1951_v44 = vpack.c.bf16 %v1664_v16, %v1664_v16 }
 0x391   : > { %1705 = vst.msk [vmem:[%s2818_s9 + $0x10] sm:$0xf] %vm1700_vm3, %v1951_v44  ;;  %v1653_v52 = vpop.permute.xlu1 %1652 }
 0x392   : > { %v1666_v53 = vmul.f32 %v1653_v52, %v1618_v50 }
 0x394   : > { %v1953_v45 = vpack.c.bf16 %v1666_v53, %v1666_v53  ;;  %v1648_v51 = vpop.permute.xlu0 %1647 }
 0x395   : > { %v1665_v57 = vmul.f32 %v1648_v51, %v1617_v54 }
 0x396   : > { %1707 = vst.msk [vmem:[%s2818_s9 + $0x18] sm:$0xf] %vm1700_vm3, %v1953_v45 }
 0x397   : > { %v1952_v59 = vpack.c.bf16 %v1665_v57, %v1665_v57 }
 0x398   : > { %v1658_v62 = vpop.permute.xlu0 %1657 }
 0x399   : > { %1706 = vst.msk [vmem:[%s2818_s9 + $0x14] sm:$0xf] %vm1700_vm3, %v1952_v59  ;;  %v1667_v2 = vmul.f32 %v1658_v62, %v1619_v61 }
 0x39b   : > { %v1954_v10 = vpack.c.bf16 %v1667_v2, %v1667_v2 }
 0x39d   : > { %1708 = vst.msk [vmem:[%s2818_s9 + $0x1c] sm:$0xf] %vm1700_vm3, %v1954_v10 }
 0x39e PF: > { %s14_s17 = sadd.s32 1, %s2355_s17   ;;  %s2850_s15 = smov %s2351_s16 }
 0x39f   : > { %p11_p5 = scmp.ge.s32.totalorder %s14_s17, 4   ;;  %s2851_s16 = smov %s2853_s18 }
 0x3a1   :  { %13 = sbr.rel (!%p11_p5) target bundleno = 2 (0x2), region = 83 }

// kernel: vec2wav2_forward.123
= control target key start
LH: loop header
LB: loop body
LE: loop exit
PB: predicated region body
PF: predicated region fallthrough
CT: control target
= control target key end

     0   :  { %s443_s9 = smov 0   ;;  %s445_s10 = smov 0   ;;  %s488_s0 = inlined_call_operand.vmem [shape: f32[2,16,16], index: 0, kind: input, shape index: {}]   ;;  %s489_s1 = inlined_call_operand.vmem [shape: f32[2,16,1], index: 1, kind: input, shape index: {}]   ;;  %s490_s2 = inlined_call_operand.vmem [shape: f32[2,1,16], index: 2, kind: output, shape index: {}]  }
   0x1   :  { %s447_s11 = smov 0  }
   0x2 LB: > { %s24_s12 = sadd.s32 1, %s420_s10  ;;  %p361_p0 = scmp.ge.s32.totalorder %s424_s11, 1  ;;  %s424_s11 = sphi %s447_s11, %s12_s11   ;;  %s420_s10 = sphi %s445_s10, %s492_s10   ;;  %s416_s9 = sphi %s443_s9, %s491_s9  }
   0x3   : > { %p26_p1 = scmp.ge.s32.totalorder %s24_s12, 2  ;;  %p148_p2 = scmp.lt.s32.totalorder %s424_s11, 3 }
   0x5   : > { %s494_s12 = smov (%p26_p1, %s24_s12), 0  ;;  %p149_p3 = pnand %p361_p0, %p148_p2 }
   0x6   : > { %p182_p4 = scmp.lt.s32.totalorder (!%p149_p3), %s416_s9, 1 }
   0x7   : > { %152 = sbr.rel (%p149_p3) target bundleno = 375 (0x177), region = 28 }
   0xc   : > { %s496_s9 = smov (!%p182_p4, %s416_s9), 1  ;;  %vm243_vm0 = vcmask 7168   ;;  %vm208_vm1 = vcmask 122880   ;;  %vm210_vm2 = vcmask 0   ;;  %v426_v5 = vmov 0  }
   0xd   : > { %s368_s13 = sshll.u32 %s496_s9, 4  ;;  %399 = vset.pattern.permute.xlu1 %v426_v5  ;;  %398 = vset.pattern.permute.xlu0 %v426_v5  ;;  %v427_v6 = vmov 0.0   ;;  %vm229_vm3 = vcmask 130048   ;;  %v271_v36 = vlaneseq  ;;  %s203_s23 = scalar_lea.vmem %s490_s2, %s496_s9 }
   0xe   : > { %s199_s16 = scalar_lea.vmem %s489_s1, %s368_s13  ;;  %209 = vst.msk [vmem:[#allocation2] sm:$0x1] %vm208_vm1, %v427_v6  ;;  %s189_s19 = scalar_lea.vmem %s488_s0, %s368_s13 }
   0xf   : > { %v214_v0 = vld [vmem:[%s199_s16] sm:$0xff]  ;;  %v215_v1 = vld [vmem:[%s199_s16 + $0x8] sm:$0xff]  ;;  %211 = vst.msk [vmem:[#allocation3] sm:$0x1] %vm210_vm2, %v427_v6  ;;  %v272_v37 = vshrl.u32 %v271_v36, 7 }
  0x10   : > { %v244_v2 = vsel %vm243_vm0, %v214_v0, 0.0  ;;  %v245_v3 = vsel %vm243_vm0, %v215_v1, 0.0  ;;  %224 = vperm.xlu1 %399, %v215_v1   ;;  %v213_v12 = vld [vmem:[%s189_s19 + $0x8] sm:$0xff]  ;;  %v212_v13 = vld [vmem:[%s189_s19] sm:$0xff] }
  0x11   : > { %v246_v4 = vadd.f32 %v245_v3, %v244_v2  ;;  %v273_v38 = vsub.s32 0, %v272_v37 }
  0x13   : > { %247 = vadd.xlane.f32.xlu0 %v246_v4 }
  0x15   : > { %v216_v28 = vld [vmem:[#allocation2] sm:$0x1] }
  0x16   : > { %v242_v31 = vld [vmem:[#allocation3] sm:$0x1] }
  0x29   : > { %219 = vperm.xlu0 %398, %v214_v0  }
  0x8b   : > { %v225_v15 = vpop.permute.xlu1 %224 }
  0x8c   : > { %v228_v18 = vmul.f32 %v225_v15, %v213_v12 }
  0x8e   : > { %v231_v20 = vsel %vm229_vm3, %v228_v18, 0.0 }
  0x9c   : > { %v248_v7 = vpop.xlane.xlu0 %247 }
  0x9d   : > { %v249_v8 = vrot.slane %v248_v7, 4 }
  0x9f   : > { %v250_v9 = vadd.f32 %v249_v8, %v248_v7 }
  0xa1   : > { %v251_v10 = vrot.slane %v250_v9, 2 }
  0xa3   : > { %v252_v11 = vadd.f32 %v251_v10, %v250_v9 }
  0xa4   : > { %v220_v16 = vpop.permute.xlu0 %219 }
  0xa5   : > { %v253_v14 = vrot.slane %v252_v11, 1  ;;  %v227_v19 = vmul.f32 %v220_v16, %v212_v13 }
  0xa7   : > { %v254_v17 = vadd.f32 %v253_v14, %v252_v11  ;;  %v230_v21 = vsel %vm229_vm3, %v227_v19, 0.0 }
  0xa8   : > { %v232_v22 = vadd.f32 %v231_v20, %v230_v21 }
  0xa9   : > { %370 = vpush %v254_v17 }
  0xaa   : > { %v233_v23 = vrot.slane %v232_v22, 4 }
  0xac   : > { %v234_v24 = vadd.f32 %v233_v23, %v232_v22 }
  0xae   : > { %v235_v25 = vrot.slane %v234_v24, 2 }
  0xb0   : > { %v236_v26 = vadd.f32 %v235_v25, %v234_v24 }
  0xb2   : > { %v237_v27 = vrot.slane %v236_v26, 1 }
  0xb4   : > { %v238_v29 = vadd.f32 %v237_v27, %v236_v26 }
  0xb6   : > { %v239_v30 = vadd.f32 %v238_v29, %v216_v28 }
  0xb8   : > { %241 = vst.msk [vmem:[#allocation2] sm:$0x1] %vm208_vm1, %v239_v30 }
  0xbf   : > { %v265_v42 = vld [vmem:[#allocation2] sm:$0x1] }
  0xda   : > { %s371_s20 = spop %370 }
  0xdb   : > { %v256_v32 = vstv %s371_s20 }
  0xdc   : > { %v257_v33 = vadd.f32 %v256_v32, %v242_v31 }
  0xde   : > { %259 = vst.msk [vmem:[#allocation3] sm:$0x1] %vm210_vm2, %v257_v33 }
  0xe5   : > { %v263_v34 = vld [vmem:[#allocation3] sm:$0x1] }
  0xe6   : > { %v264_v35 = vmax.f32 %v263_v34, 1.0 }
  0xe8   : > { %268 = vperm.xlu1 %399, %v264_v35  }
 0x163   : > { %v269_v39 = vpop.permute.xlu1 %268 }
 0x164   : > { %v274_v40 = vrot.slane %v269_v39, %v273_v38 }
 0x166   : > { %400 = vrcp.f32 %v274_v40 }
 0x173   : > { %v401_v41 = vpop.eup %400 }
 0x174   : > { %v276_v43 = vmul.f32 %v401_v41, %v265_v42 }
 0x176   : > { %277 = vst.msk [vmem:[%s203_s23] sm:$0x1] %vm208_vm1, %v276_v43 }
 0x177 PF: > { %s12_s11 = sadd.s32 1, %s424_s11   ;;  %s491_s9 = smov %s420_s10 }
 0x178   : > { %p9_p5 = scmp.ge.s32.totalorder %s12_s11, 4   ;;  %s492_s10 = smov %s494_s12 }
 0x17a   :  { %11 = sbr.rel (!%p9_p5) target bundleno = 2 (0x2), region = 69 }

// kernel: vec2wav2_forward.124
= control target key start
LH: loop header
LB: loop body
LE: loop exit
PB: predicated region body
PF: predicated region fallthrough
CT: control target
= control target key end

     0   :  { %v194_v0 = vmov 0.0   ;;  %vm195_vm0 = vmmov 0   ;;  %s249_s1 = inlined_call_operand.vmem [shape: bf16[128,128], index: 1, kind: input, shape index: {}]   ;;  %s250_s0 = inlined_call_operand.vmem [shape: bf16[8,128], index: 0, kind: input, shape index: {}]   ;;  %s251_s2 = inlined_call_operand.vmem [shape: f32[1,128], index: 2, kind: input, shape index: {}]   ;;  %s252_s3 = inlined_call_operand.vmem [shape: bf16[8,128], index: 3, kind: output, shape index: {}]  }
   0x1   :  { %164 = vmatprep.subr.bf16.mxu0 %v194_v0  ;;  %v186_v1 = vld [vmem:[%s249_s1 + $0x38] sm:$0xff]   ;;  %180 = vmatprep.mubr.msk.bf16.mxu0 %vm195_vm0, %v194_v0  ;;  %v187_v2 = vld [vmem:[%s249_s1 + $0x30] sm:$0xff]   ;;  %v188_v3 = vld [vmem:[%s249_s1 + $0x28] sm:$0xff]  }
   0x2   :  { %165 = vmatpush3.bf16.msra.mxu0 %v186_v1  ;;  %v189_v4 = vld [vmem:[%s249_s1 + $0x20] sm:$0xff]   ;;  %v190_v5 = vld [vmem:[%s249_s1 + $0x18] sm:$0xff]   ;;  %v191_v6 = vld [vmem:[%s249_s1 + $0x10] sm:$0xff]  }
   0x3   :  { %166 = vmatprep.subr.bf16.mxu0 %v194_v0  ;;  %v192_v7 = vld [vmem:[%s249_s1 + $0x8] sm:$0xff]   ;;  %v193_v8 = vld [vmem:[%s249_s1] sm:$0xff]  }
   0x4   :  { %v21_v9 = vld [vmem:[%s250_s0] sm:$0xf] }
   0x5   :  { %v154_v10 = vld [vmem:[%s251_s2] ss:$0 sm:$0xff] }
   0x6   :  { %167 = vmatpush3.bf16.msra.mxu0 %v187_v2 }
   0x7   :  { %168 = vmatprep.subr.bf16.mxu0 %v194_v0 }
   0xa   :  { %169 = vmatpush3.bf16.msra.mxu0 %v188_v3 }
   0xb   :  { %170 = vmatprep.subr.bf16.mxu0 %v194_v0 }
   0xe   :  { %171 = vmatpush3.bf16.msra.mxu0 %v189_v4 }
   0xf   :  { %172 = vmatprep.subr.bf16.mxu0 %v194_v0 }
  0x12   :  { %173 = vmatpush3.bf16.msra.mxu0 %v190_v5 }
  0x13   :  { %174 = vmatprep.subr.bf16.mxu0 %v194_v0 }
  0x16   :  { %175 = vmatpush3.bf16.msra.mxu0 %v191_v6 }
  0x17   :  { %176 = vmatprep.subr.bf16.mxu0 %v194_v0 }
  0x1a   :  { %177 = vmatpush3.bf16.msra.mxu0 %v192_v7 }
  0x1b   :  { %178 = vmatprep.subr.bf16.mxu0 %v194_v0 }
  0x1e   :  { %179 = vmatpush3.bf16.msra.mxu0 %v193_v8 }
  0x21   :  { %181 = vmatmul.mubr.bf16.vlgmr.msra.gmra.mxu0 %v21_v9 }
  0xe1   :  { %v120_v11 = vpop.f32.mrf.mxu0 }
  0xe2   :  { %v139_v12 = vadd.f32 %v154_v10, %v120_v11 }
  0xe3   :  { %v182_v13 = vpop.f32.mrf.mxu0 }
  0xe4   :  { %v140_v14 = vpack.c.bf16 %v139_v12, %v139_v12 }
  0xe5   :  { %v123_v15 = vpop.f32.mrf.mxu0 }
  0xe6   :  { %141 = vst [vmem:[%s252_s3] sm:$0xf] %v140_v14 }
  0xe7   :  { %v183_v16 = vpop.f32.mrf.mxu0 }

// kernel: vec2wav2_forward.125
= control target key start
LH: loop header
LB: loop body
LE: loop exit
PB: predicated region body
PF: predicated region fallthrough
CT: control target
= control target key end

     0   :  { %s1207_s15 = smov 0   ;;  %s1209_s16 = smov 0   ;;  %s1344_s0 = inlined_call_operand.vmem [shape: bf16[2,32,32], index: 0, kind: input, shape index: {}, may-alias: {0,1}]   ;;  %s1345_s1 = inlined_call_operand.vmem [shape: bf16[2,32,32], index: 1, kind: input, shape index: {}, may-alias: {0,1}]   ;;  %s1346_s2 = inlined_call_operand.vmem [shape: bf16[7,32,128], index: 2, kind: input, shape index: {}]   ;;  %s1347_s3 = inlined_call_operand.vmem [shape: f32[1,128], index: 3, kind: input, shape index: {}]   ;;  %s1348_s4 = inlined_call_operand.vmem [shape: bf16[2,16,128], index: 4, kind: output, shape index: {}]  }
   0x1   :  { %s1211_s17 = smov 0  }
   0x2 LB: > { %s33_s18 = sadd.s32 1, %s1174_s16  ;;  %p990_p0 = scmp.ge.s32.totalorder %s1178_s17, 1  ;;  %s1178_s17 = sphi %s1211_s17, %s14_s17   ;;  %s1174_s16 = sphi %s1209_s16, %s1350_s16   ;;  %s1170_s15 = sphi %s1207_s15, %s1349_s15  }
   0x3   : > { %p35_p1 = scmp.ge.s32.totalorder %s33_s18, 2  ;;  %p230_p2 = scmp.lt.s32.totalorder %s1178_s17, 3 }
   0x5   : > { %s1352_s18 = smov (%p35_p1, %s33_s18), 0  ;;  %p231_p3 = pnand %p990_p0, %p230_p2 }
   0x6   : > { %p285_p4 = scmp.lt.s32.totalorder (!%p231_p3), %s1170_s15, 1 }
   0x7   : > { %234 = sbr.rel (%p231_p3) target bundleno = 255 (0xff), region = 36 }
   0xc   : > { %v1140_v0 = vld [vmem:[%s1346_s2 + $0x18] sm:$0xff]   ;;  %v1180_v1 = vmov 0.0   ;;  %v1141_v2 = vld [vmem:[%s1346_s2 + $0x8] sm:$0xff]   ;;  %v1142_v3 = vld [vmem:[%s1346_s2 + $0x10] sm:$0xff]   ;;  %vm1181_vm0 = vmmov 0   ;;  %s1354_s15 = smov (!%p285_p4, %s1170_s15), 1 }
   0xd   : > { %1058 = vmatprep.subr.bf16.mxu0 %v1180_v1  ;;  %1066 = vmatprep.subr.bf16.mxu1 %v1180_v1  ;;  %v1143_v4 = vld [vmem:[%s1346_s2] sm:$0xff]   ;;  %s1025_s27 = sshll.u32 %s1354_s15, 4  ;;  %vm394_vm1 = vcmask 261120   ;;  %v1147_v5 = vld [vmem:[%s1346_s2 + $0x38] sm:$0xff]   ;;  %vm369_vm2 = vsmask.f32 7424 }
   0xe   : > { %1059 = vmatpush3.bf16.msra.mxu0 %v1140_v0  ;;  %1062 = vmatprep.mubr.msk.bf16.mxu0 %vm1181_vm0, %v1180_v1  ;;  %s292_s30 = scalar_lea.vmem %s1344_s0, %s1025_s27  ;;  %s1027_s5 = sadd.s32 8, %s1025_s27  ;;  %v1149_v10 = vld [vmem:[%s1346_s2 + $0x30] sm:$0xff]   ;;  %vm556_vm3 = vsmask.f32 6400  ;;  %v1146_v17 = vld [vmem:[%s1346_s2 + $0x28] sm:$0xff]   ;;  %v1151_v24 = vld [vmem:[%s1346_s2 + $0x58] sm:$0xff]  }
   0xf   : > { %1067 = vmatpush3.bf16.msra.mxu1 %v1141_v2  ;;  %1060 = vmatprep.subr.bf16.mxu0 %v1180_v1  ;;  %s303_s10 = scalar_lea.vmem %s1345_s1, %s1027_s5  ;;  %v1258_v6 = vld [vmem:[%s292_s30] sm:$0xff]   ;;  %vm494_vm4 = vcmask 1046528   ;;  %v1153_v33 = vld [vmem:[%s1346_s2 + $0x50] sm:$0xff]   ;;  %vm686_vm5 = vsmask.f32 5376  ;;  %v1150_v37 = vld [vmem:[%s1346_s2 + $0x48] sm:$0xff]  }
  0x10   : > { %1068 = vmatprep.subr.bf16.mxu1 %v1180_v1  ;;  %1070 = vmatprep.mubr.msk.bf16.mxu1 %vm1181_vm0, %v1180_v1  ;;  %v1261_v7 = vld [vmem:[%s303_s10] sm:$0xff]   ;;  %v371_v8 = vshrl.u32 %v1258_v6, 16  ;;  %v373_v9 = vshll.u32 %v1258_v6, 16  ;;  %v495_v31 = vrot.slane %v1258_v6, 1  ;;  %v625_v40 = vrot.slane %v1258_v6, 2  ;;  %v1154_v43 = vld [vmem:[%s1346_s2 + $0x68] sm:$0xff]  }
  0x11   : > { %v378_v11 = vshll.u32 %v1261_v7, 16  ;;  %v560_v12 = vshrl.u32 %v1261_v7, 16  ;;  %v1148_v26 = vld [vmem:[%s1346_s2 + $0x20] sm:$0xff]   ;;  %v496_v32 = vrot.slane %v1261_v7, 1  ;;  %v626_v41 = vrot.slane %v1261_v7, 2  ;;  %s1028_s9 = sshll.u32 %s1354_s15, 3 }
  0x12   : > { %1061 = vmatpush3.bf16.msra.mxu0 %v1142_v3  ;;  %v375_v13 = vrot.slane %v373_v9, 1  ;;  %v557_v14 = vrot.slane %v371_v8, 1  ;;  %v558_v15 = vrot.slane %v373_v9, 2  ;;  %v687_v25 = vrot.slane %v371_v8, 2  ;;  %v1152_v39 = vld [vmem:[%s1346_s2 + $0x40] sm:$0xff]   ;;  %s324_s12 = scalar_lea.vmem %s1348_s4, %s1028_s9 }
  0x13   : > { %1069 = vmatpush3.bf16.msra.mxu1 %v1143_v4  ;;  %1074 = vmatprep.subr.bf16.mxu0 %v1180_v1  ;;  %v380_v16 = vrot.slane %v378_v11, 1  ;;  %v562_v18 = vrot.slane %v560_v12, 1  ;;  %v563_v19 = vrot.slane %v378_v11, 2  ;;  %v688_v28 = vrot.slane %v373_v9, 3  ;;  %v1155_v44 = vld [vmem:[%s1346_s2 + $0x60] sm:$0xff]  }
  0x14   : > { %1082 = vmatprep.subr.bf16.mxu1 %v1180_v1  ;;  %v376_v20 = vor.u32 %v375_v13, %v371_v8  ;;  %v559_v21 = vor.u32 %v558_v15, %v557_v14  ;;  %v690_v29 = vrot.slane %v560_v12, 2  ;;  %v691_v30 = vrot.slane %v378_v11, 3 }
  0x15   : > { %v564_v22 = vor.u32 %v563_v19, %v562_v18  ;;  %v689_v34 = vor.u32 %v688_v28, %v687_v25  ;;  %v497_v36 = vsel %vm494_vm4, %v495_v31, %v496_v32  ;;  %vm624_vm6 = vcmask 1045504   ;;  %v1020_v18 = vld [vmem:[%s1347_s3] ss:$0 sm:$0xff] }
  0x16   : > { %1071 = vmatmul.mubr.msk.bf16.vlgmr.msra.gmra.mxu1 %vm394_vm1, %v1258_v6  ;;  %v381_v23 = vsel %vm369_vm2, %v376_v20, %v380_v16  ;;  %v692_v35 = vor.u32 %v691_v30, %v690_v29  ;;  %v627_v42 = vsel %vm624_vm6, %v625_v40, %v626_v41  ;;  %v753_v45 = vrot.slane %v1258_v6, 3 }
  0x17   : > { %1083 = vmatpush3.bf16.msra.mxu1 %v1147_v5  ;;  %1086 = vmatprep.mubr.msk.bf16.mxu1 %vm1181_vm0, %v1180_v1  ;;  %v565_v27 = vsel %vm556_vm3, %v559_v21, %v564_v22  ;;  %v754_v46 = vrot.slane %v1261_v7, 3  ;;  %vm752_vm7 = vcmask 1044480  }
  0x18   : > { %1084 = vmatprep.subr.bf16.mxu1 %v1180_v1  ;;  %1063 = vmatmul.mubr.msk.bf16.vlgmr.msra.gmra.mxu0 %vm394_vm1, %v381_v23  ;;  %v693_v38 = vsel %vm686_vm5, %v689_v34, %v692_v35 }
  0x19   : > { %1075 = vmatpush3.bf16.msra.mxu0 %v1146_v17  ;;  %1078 = vmatprep.mubr.msk.bf16.mxu0 %vm1181_vm0, %v1180_v1  ;;  %v755_v47 = vsel %vm752_vm7, %v753_v45, %v754_v46 }
  0x1a   : > { %1076 = vmatprep.subr.bf16.mxu0 %v1180_v1 }
  0x1b   : > { %1085 = vmatpush3.bf16.msra.mxu1 %v1149_v10 }
  0x1c   : > { %1098 = vmatprep.subr.bf16.mxu1 %v1180_v1 }
  0x1d   : > { %1077 = vmatpush3.bf16.msra.mxu0 %v1148_v26 }
  0x1e   : > { %1087 = vmatmul.mubr.msk.bf16.vlgmr.msra.gmra.mxu1 %vm394_vm1, %v565_v27  ;;  %1090 = vmatprep.subr.bf16.mxu0 %v1180_v1 }
  0x1f   : > { %1099 = vmatpush3.bf16.msra.mxu1 %v1151_v24  ;;  %1102 = vmatprep.mubr.msk.bf16.mxu1 %vm1181_vm0, %v1180_v1 }
  0x20   : > { %1100 = vmatprep.subr.bf16.mxu1 %v1180_v1  ;;  %1079 = vmatmul.mubr.msk.bf16.vlgmr.msra.gmra.mxu0 %vm394_vm1, %v497_v36 }
  0x21   : > { %1091 = vmatpush3.bf16.msra.mxu0 %v1150_v37  ;;  %1094 = vmatprep.mubr.msk.bf16.mxu0 %vm1181_vm0, %v1180_v1 }
  0x22   : > { %1092 = vmatprep.subr.bf16.mxu0 %v1180_v1 }
  0x23   : > { %1101 = vmatpush3.bf16.msra.mxu1 %v1153_v33 }
  0x25   : > { %1093 = vmatpush3.bf16.msra.mxu0 %v1152_v39 }
  0x26   : > { %1103 = vmatmul.mubr.msk.bf16.vlgmr.msra.gmra.mxu1 %vm394_vm1, %v693_v38  ;;  %1106 = vmatprep.subr.bf16.mxu0 %v1180_v1 }
  0x28   : > { %1095 = vmatmul.mubr.msk.bf16.vlgmr.msra.gmra.mxu0 %vm394_vm1, %v627_v42 }
  0x29   : > { %1107 = vmatpush3.bf16.msra.mxu0 %v1154_v43  ;;  %1110 = vmatprep.mubr.msk.bf16.mxu0 %vm1181_vm0, %v1180_v1 }
  0x2a   : > { %1108 = vmatprep.subr.bf16.mxu0 %v1180_v1 }
  0x2d   : > { %1109 = vmatpush3.bf16.msra.mxu0 %v1155_v44 }
  0x30   : > { %1111 = vmatmul.mubr.msk.bf16.vlgmr.msra.gmra.mxu0 %vm394_vm1, %v755_v47 }
  0xd6   : > { %v487_v48 = vpop.f32.mrf.mxu1 }
  0xd8   : > { %v1072_v49 = vpop.f32.mrf.mxu1  ;;  %v432_v52 = vpop.f32.mrf.mxu0 }
  0xd9   : > { %v488_v63 = vadd.f32 %v487_v48, %v432_v52 }
  0xda   : > { %v490_v50 = vpop.f32.mrf.mxu1  ;;  %v1064_v53 = vpop.f32.mrf.mxu0 }
  0xdc   : > { %v1073_v51 = vpop.f32.mrf.mxu1  ;;  %v435_v55 = vpop.f32.mrf.mxu0 }
  0xdd   : > { %v491_v5 = vadd.f32 %v490_v50, %v435_v55 }
  0xde   : > { %v615_v54 = vpop.f32.mrf.mxu1  ;;  %v1065_v57 = vpop.f32.mrf.mxu0 }
  0xe0   : > { %v1088_v56 = vpop.f32.mrf.mxu1  ;;  %v547_v59 = vpop.f32.mrf.mxu0 }
  0xe1   : > { %v554_v2 = vadd.f32 %v547_v59, %v488_v63 }
  0xe2   : > { %v618_v58 = vpop.f32.mrf.mxu1  ;;  %v1080_v61 = vpop.f32.mrf.mxu0 }
  0xe3   : > { %v622_v8 = vadd.f32 %v615_v54, %v554_v2 }
  0xe4   : > { %v1089_v60 = vpop.f32.mrf.mxu1  ;;  %v550_v0 = vpop.f32.mrf.mxu0 }
  0xe5   : > { %v555_v9 = vadd.f32 %v550_v0, %v491_v5 }
  0xe6   : > { %v743_v62 = vpop.f32.mrf.mxu1  ;;  %v1081_v3 = vpop.f32.mrf.mxu0 }
  0xe7   : > { %v623_v13 = vadd.f32 %v618_v58, %v555_v9 }
  0xe8   : > { %v1104_v1 = vpop.f32.mrf.mxu1  ;;  %v677_v6 = vpop.f32.mrf.mxu0 }
  0xe9   : > { %v684_v11 = vadd.f32 %v677_v6, %v622_v8 }
  0xea   : > { %v746_v4 = vpop.f32.mrf.mxu1  ;;  %v1096_v10 = vpop.f32.mrf.mxu0 }
  0xeb   : > { %v750_v15 = vadd.f32 %v743_v62, %v684_v11 }
  0xec   : > { %v1105_v7 = vpop.f32.mrf.mxu1  ;;  %v680_v12 = vpop.f32.mrf.mxu0 }
  0xed   : > { %v685_v16 = vadd.f32 %v680_v12, %v623_v13 }
  0xee   : > { %v1097_v14 = vpop.f32.mrf.mxu0 }
  0xef   : > { %v751_v21 = vadd.f32 %v746_v4, %v685_v16 }
  0xf0   : > { %v805_v17 = vpop.f32.mrf.mxu0 }
  0xf1   : > { %v812_v19 = vadd.f32 %v805_v17, %v750_v15 }
  0xf2   : > { %v1112_v20 = vpop.f32.mrf.mxu0 }
  0xf3   : > { %v821_v22 = vadd.f32 %v1020_v18, %v812_v19 }
  0xf4   : > { %v808_v23 = vpop.f32.mrf.mxu0 }
  0xf5   : > { %v813_v24 = vadd.f32 %v808_v23, %v751_v21  ;;  %v825_v26 = vmul.f32 0.1, %v821_v22  ;;  %vm823_vm8 = vcmp.gt.f32.partialorder %v821_v22, 0.0 }
  0xf6   : > { %v1113_v25 = vpop.f32.mrf.mxu0 }
  0xf7   : > { %v822_v27 = vadd.f32 %v1020_v18, %v813_v24  ;;  %v827_v29 = vsel %vm823_vm8, %v821_v22, %v825_v26 }
  0xf9   : > { %vm824_vm9 = vcmp.gt.f32.partialorder %v822_v27, 0.0  ;;  %v826_v28 = vmul.f32 0.1, %v822_v27 }
  0xfb   : > { %v828_v30 = vsel %vm824_vm9, %v822_v27, %v826_v28 }
  0xfc   : > { %v1034_v31 = vpack.c.bf16 %v828_v30, %v827_v29 }
  0xfe   : > { %1035 = vst [vmem:[%s324_s12] sm:$0xff] %v1034_v31  }
  0xff PF: > { %s14_s17 = sadd.s32 1, %s1178_s17   ;;  %s1349_s15 = smov %s1174_s16 }
 0x100   : > { %p11_p5 = scmp.ge.s32.totalorder %s14_s17, 4   ;;  %s1350_s16 = smov %s1352_s18 }
 0x102   :  { %13 = sbr.rel (!%p11_p5) target bundleno = 2 (0x2), region = 75 }

// kernel: vec2wav2_forward.127
= control target key start
LH: loop header
LB: loop body
LE: loop exit
PB: predicated region body
PF: predicated region fallthrough
CT: control target
= control target key end

     0   :  { %s1327_s15 = smov 0   ;;  %s1329_s16 = smov 0   ;;  %s1460_s0 = inlined_call_operand.vmem [shape: bf16[2,64,32], index: 0, kind: input, shape index: {}, may-alias: {0,1}]   ;;  %s1461_s1 = inlined_call_operand.vmem [shape: bf16[2,64,32], index: 1, kind: input, shape index: {}, may-alias: {0,1}]   ;;  %s1462_s2 = inlined_call_operand.vmem [shape: bf16[7,32,128], index: 2, kind: input, shape index: {}]   ;;  %s1463_s3 = inlined_call_operand.vmem [shape: f32[1,128], index: 3, kind: input, shape index: {}]   ;;  %s1464_s4 = inlined_call_operand.vmem [shape: f32[2,32,128], index: 4, kind: output, shape index: {}]  }
   0x1   :  { %s1331_s17 = smov 0  }
   0x2 LB: > { %s33_s18 = sadd.s32 1, %s1296_s16  ;;  %p1099_p0 = scmp.ge.s32.totalorder %s1300_s17, 1  ;;  %s1300_s17 = sphi %s1331_s17, %s14_s17   ;;  %s1296_s16 = sphi %s1329_s16, %s1466_s16   ;;  %s1292_s15 = sphi %s1327_s15, %s1465_s15  }
   0x3   : > { %p35_p1 = scmp.ge.s32.totalorder %s33_s18, 2  ;;  %p230_p2 = scmp.lt.s32.totalorder %s1300_s17, 3 }
   0x5   : > { %s1468_s18 = smov (%p35_p1, %s33_s18), 0  ;;  %p231_p3 = pnand %p1099_p0, %p230_p2 }
   0x6   : > { %p285_p4 = scmp.lt.s32.totalorder (!%p231_p3), %s1292_s15, 1 }
   0x7   : > { %234 = sbr.rel (%p231_p3) target bundleno = 266 (0x10a), region = 36 }
   0xc   : > { %v1253_v0 = vld [vmem:[%s1462_s2 + $0x18] sm:$0xff]   ;;  %v1254_v1 = vld [vmem:[%s1462_s2 + $0x8] sm:$0xff]   ;;  %v1255_v2 = vld [vmem:[%s1462_s2 + $0x10] sm:$0xff]   ;;  %s1470_s15 = smov (!%p285_p4, %s1292_s15), 1  ;;  %vm409_vm0 = vcmask 261120   ;;  %vm530_vm3 = vcmask 1046528  }
   0xd   : > { %1173 = vmatprep.subr.bf16.mxu0 %v1253_v0  ;;  %1181 = vmatprep.subr.bf16.mxu1 %v1254_v1  ;;  %v1256_v3 = vld [vmem:[%s1462_s2] sm:$0xff]   ;;  %s1357_s27 = sshll.u32 %s1470_s15, 5  ;;  %vm376_vm1 = vsmask.f32 7424  ;;  %v1259_v4 = vld [vmem:[%s1462_s2 + $0x28] sm:$0xff]   ;;  %v1261_v5 = vld [vmem:[%s1462_s2 + $0x38] sm:$0xff]  }
   0xe   : > { %1174 = vmatpush3.bf16.msra.mxu0 %v1253_v0  ;;  %1182 = vmatpush3.bf16.msra.mxu1 %v1254_v1  ;;  %s292_s6 = scalar_lea.vmem %s1460_s0, %s1357_s27  ;;  %s1142_s7 = sadd.s32 16, %s1357_s27  ;;  %vm607_vm2 = vsmask.f32 6400  ;;  %v1263_v17 = vld [vmem:[%s1462_s2 + $0x30] sm:$0xff]   ;;  %v1265_v28 = vld [vmem:[%s1462_s2 + $0x58] sm:$0xff]   ;;  %v1262_v31 = vld [vmem:[%s1462_s2 + $0x20] sm:$0xff]  }
   0xf   : > { %1175 = vmatprep.subr.bf16.mxu0 %v1255_v2  ;;  %1183 = vmatprep.subr.bf16.mxu1 %v1256_v3  ;;  %s303_s12 = scalar_lea.vmem %s1461_s1, %s1142_s7  ;;  %v1373_v6 = vld [vmem:[%s292_s6] sm:$0xff]   ;;  %v1375_v7 = vld [vmem:[%s292_s6 + $0x8] sm:$0xff]   ;;  %v1267_v38 = vld [vmem:[%s1462_s2 + $0x50] sm:$0xff]   ;;  %vm769_vm4 = vsmask.f32 5376  ;;  %vm692_vm5 = vcmask 1045504   ;;  %s324_s11 = scalar_lea.vmem %s1464_s4, %s1357_s27 }
  0x10   : > { %v1377_v8 = vld [vmem:[%s303_s12] sm:$0xff]   ;;  %v378_v9 = vshrl.u32 %v1373_v6, 16  ;;  %v380_v10 = vshll.u32 %v1373_v6, 16  ;;  %v385_v11 = vshll.u32 %v1375_v7, 16  ;;  %v389_v12 = vshrl.u32 %v1375_v7, 16  ;;  %1185 = vmatprep.mubr.msk.bf16.mxu1 %vm409_vm0, %v1373_v6  ;;  %v1264_v36 = vld [vmem:[%s1462_s2 + $0x48] sm:$0xff]  }
  0x11   : > { %v393_v13 = vshll.u32 %v1377_v8, 16  ;;  %v531_v18 = vrot.slane %v1373_v6, 1  ;;  %v532_v19 = vrot.slane %v1375_v7, 1  ;;  %v615_v27 = vshrl.u32 %v1377_v8, 16  ;;  %v1266_v54 = vld [vmem:[%s1462_s2 + $0x40] sm:$0xff]   ;;  %v1268_v59 = vld [vmem:[%s1462_s2 + $0x68] sm:$0xff]  }
  0x12   : > { %1176 = vmatpush3.bf16.msra.mxu0 %v1255_v2  ;;  %1184 = vmatpush3.bf16.msra.mxu1 %v1256_v3  ;;  %v382_v14 = vrot.slane %v380_v10, 1  ;;  %v387_v15 = vrot.slane %v385_v11, 1  ;;  %v608_v20 = vrot.slane %v378_v9, 1  ;;  %v609_v23 = vrot.slane %v380_v10, 2  ;;  %v1269_v63 = vld [vmem:[%s1462_s2 + $0x60] sm:$0xff]  }
  0x13   : > { %1189 = vmatprep.subr.bf16.mxu0 %v1259_v4  ;;  %1197 = vmatprep.subr.bf16.mxu1 %v1261_v5  ;;  %v395_v16 = vrot.slane %v393_v13, 1  ;;  %v611_v24 = vrot.slane %v389_v12, 1  ;;  %v533_v25 = vsel %vm530_vm3, %v531_v18, %v532_v19  ;;  %v612_v26 = vrot.slane %v385_v11, 2 }
  0x14   : > { %v383_v21 = vor.u32 %v382_v14, %v378_v9  ;;  %v391_v22 = vor.u32 %v389_v12, %v387_v15  ;;  %v610_v32 = vor.u32 %v609_v23, %v608_v20  ;;  %v618_v33 = vrot.slane %v393_v13, 2 }
  0x15   : > { %1186 = vmatmul.mubr.msk.bf16.vlgmr.msra.gmra.mxu1 %vm409_vm0, %v1375_v7  ;;  %v613_v34 = vor.u32 %v612_v26, %v611_v24  ;;  %v617_v35 = vrot.slane %v615_v27, 1  ;;  %v534_v37 = vrot.slane %v1377_v8, 1  ;;  %v693_v39 = vrot.slane %v1373_v6, 2 }
  0x16   : > { %1198 = vmatpush3.bf16.msra.mxu1 %v1261_v5  ;;  %v388_v29 = vsel %vm376_vm1, %v383_v21, %v387_v15  ;;  %v396_v30 = vsel %vm376_vm1, %v391_v22, %v395_v16  ;;  %v694_v40 = vrot.slane %v1375_v7, 2  ;;  %v770_v43 = vrot.slane %v378_v9, 2 }
  0x17   : > { %1199 = vmatprep.subr.bf16.mxu1 %v1263_v17  ;;  %1177 = vmatprep.mubr.msk.bf16.mxu0 %vm409_vm0, %v388_v29  ;;  %v614_v41 = vsel %vm607_vm2, %v610_v32, %v613_v34  ;;  %v619_v42 = vor.u32 %v618_v33, %v617_v35  ;;  %v771_v44 = vrot.slane %v380_v10, 3  ;;  %v773_v45 = vrot.slane %v389_v12, 2 }
  0x18   : > { %1178 = vmatmul.mubr.msk.bf16.vlgmr.msra.gmra.mxu0 %vm409_vm0, %v396_v30  ;;  %1201 = vmatprep.mubr.msk.bf16.mxu1 %vm409_vm0, %v614_v41  ;;  %v774_v46 = vrot.slane %v385_v11, 3  ;;  %v777_v49 = vrot.slane %v615_v27, 2  ;;  %v778_v50 = vrot.slane %v393_v13, 3  ;;  %v535_v52 = vsel %vm530_vm3, %v532_v19, %v534_v37 }
  0x19   : > { %1190 = vmatpush3.bf16.msra.mxu0 %v1259_v4  ;;  %1193 = vmatprep.mubr.msk.bf16.mxu0 %vm409_vm0, %v533_v25  ;;  %v620_v47 = vsel %vm607_vm2, %v613_v34, %v619_v42  ;;  %v772_v48 = vor.u32 %v771_v44, %v770_v43  ;;  %v695_v56 = vsel %vm692_vm5, %v693_v39, %v694_v40  ;;  %v696_v57 = vrot.slane %v1377_v8, 2  ;;  %v1137_v43 = vld [vmem:[%s1463_s3] ss:$0 sm:$0xff] }
  0x1a   : > { %1200 = vmatpush3.bf16.msra.mxu1 %v1263_v17  ;;  %1191 = vmatprep.subr.bf16.mxu0 %v1262_v31  ;;  %v775_v51 = vor.u32 %v774_v46, %v773_v45  ;;  %v779_v53 = vor.u32 %v778_v50, %v777_v49  ;;  %v853_v60 = vrot.slane %v1373_v6, 3  ;;  %v854_v61 = vrot.slane %v1375_v7, 3 }
  0x1b   : > { %1213 = vmatprep.subr.bf16.mxu1 %v1265_v28  ;;  %vm852_vm6 = vcmask 1044480   ;;  %v697_v62 = vsel %vm692_vm5, %v694_v40, %v696_v57  ;;  %v856_v1 = vrot.slane %v1377_v8, 3 }
  0x1c   : > { %v776_v55 = vsel %vm769_vm4, %v772_v48, %v775_v51  ;;  %v780_v58 = vsel %vm769_vm4, %v775_v51, %v779_v53  ;;  %v855_v0 = vsel %vm852_vm6, %v853_v60, %v854_v61 }
  0x1d   : > { %1202 = vmatmul.mubr.msk.bf16.vlgmr.msra.gmra.mxu1 %vm409_vm0, %v620_v47  ;;  %1192 = vmatpush3.bf16.msra.mxu0 %v1262_v31  ;;  %v857_v2 = vsel %vm852_vm6, %v854_v61, %v856_v1 }
  0x1e   : > { %1214 = vmatpush3.bf16.msra.mxu1 %v1265_v28  ;;  %1205 = vmatprep.subr.bf16.mxu0 %v1264_v36 }
  0x1f   : > { %1215 = vmatprep.subr.bf16.mxu1 %v1267_v38  ;;  %1217 = vmatprep.mubr.msk.bf16.mxu1 %vm409_vm0, %v776_v55 }
  0x20   : > { %1194 = vmatmul.mubr.msk.bf16.vlgmr.msra.gmra.mxu0 %vm409_vm0, %v535_v52 }
  0x21   : > { %1206 = vmatpush3.bf16.msra.mxu0 %v1264_v36  ;;  %1209 = vmatprep.mubr.msk.bf16.mxu0 %vm409_vm0, %v695_v56 }
  0x22   : > { %1216 = vmatpush3.bf16.msra.mxu1 %v1267_v38  ;;  %1207 = vmatprep.subr.bf16.mxu0 %v1266_v54 }
  0x25   : > { %1218 = vmatmul.mubr.msk.bf16.vlgmr.msra.gmra.mxu1 %vm409_vm0, %v780_v58  ;;  %1208 = vmatpush3.bf16.msra.mxu0 %v1266_v54 }
  0x26   : > { %1221 = vmatprep.subr.bf16.mxu0 %v1268_v59 }
  0x28   : > { %1210 = vmatmul.mubr.msk.bf16.vlgmr.msra.gmra.mxu0 %vm409_vm0, %v697_v62 }
  0x29   : > { %1222 = vmatpush3.bf16.msra.mxu0 %v1268_v59  ;;  %1225 = vmatprep.mubr.msk.bf16.mxu0 %vm409_vm0, %v855_v0 }
  0x2a   : > { %1223 = vmatprep.subr.bf16.mxu0 %v1269_v63 }
  0x2d   : > { %1224 = vmatpush3.bf16.msra.mxu0 %v1269_v63 }
  0x30   : > { %1226 = vmatmul.mubr.msk.bf16.vlgmr.msra.gmra.mxu0 %vm409_vm0, %v857_v2 }
  0xd5   : > { %v1187_v3 = vpop.f32.mrf.mxu1 }
  0xd7   : > { %v515_v4 = vpop.f32.mrf.mxu1 }
  0xd8   : > { %v1179_v6 = vpop.f32.mrf.mxu0 }
  0xd9   : > { %v1188_v5 = vpop.f32.mrf.mxu1  ;;  %v524_v17 = vadd.f32 %v1187_v3, %v1179_v6 }
  0xda   : > { %v450_v9 = vpop.f32.mrf.mxu0 }
  0xdb   : > { %v518_v7 = vpop.f32.mrf.mxu1  ;;  %v516_v19 = vadd.f32 %v515_v4, %v450_v9 }
  0xdc   : > { %v1180_v10 = vpop.f32.mrf.mxu0 }
  0xdd   : > { %v1203_v11 = vpop.f32.mrf.mxu1  ;;  %v527_v22 = vadd.f32 %v1188_v5, %v1180_v10 }
  0xde   : > { %v453_v12 = vpop.f32.mrf.mxu0 }
  0xdf   : > { %v673_v13 = vpop.f32.mrf.mxu1  ;;  %v519_v26 = vadd.f32 %v518_v7, %v453_v12 }
  0xe0   : > { %v1195_v14 = vpop.f32.mrf.mxu0 }
  0xe1   : > { %v1204_v15 = vpop.f32.mrf.mxu1  ;;  %v605_v20 = vadd.f32 %v1195_v14, %v524_v17 }
  0xe2   : > { %v588_v16 = vpop.f32.mrf.mxu0 }
  0xe3   : > { %v676_v18 = vpop.f32.mrf.mxu1  ;;  %v603_v23 = vadd.f32 %v588_v16, %v516_v19  ;;  %v690_v27 = vadd.f32 %v1203_v11, %v605_v20 }
  0xe4   : > { %v1196_v8 = vpop.f32.mrf.mxu0 }
  0xe5   : > { %v1219_v25 = vpop.f32.mrf.mxu1  ;;  %v606_v28 = vadd.f32 %v1196_v8, %v527_v22  ;;  %v688_v30 = vadd.f32 %v673_v13, %v603_v23 }
  0xe6   : > { %v591_v21 = vpop.f32.mrf.mxu0 }
  0xe7   : > { %v604_v31 = vadd.f32 %v591_v21, %v519_v26  ;;  %v833_v33 = vpop.f32.mrf.mxu1  ;;  %v691_v35 = vadd.f32 %v1204_v15, %v606_v28 }
  0xe8   : > { %v1211_v24 = vpop.f32.mrf.mxu0 }
  0xe9   : > { %v767_v32 = vadd.f32 %v1211_v24, %v690_v27  ;;  %v689_v38 = vadd.f32 %v676_v18, %v604_v31  ;;  %v1220_v41 = vpop.f32.mrf.mxu1 }
  0xea   : > { %v750_v29 = vpop.f32.mrf.mxu0 }
  0xeb   : > { %v765_v36 = vadd.f32 %v750_v29, %v688_v30  ;;  %v850_v39 = vadd.f32 %v1219_v25, %v767_v32  ;;  %v836_v51 = vpop.f32.mrf.mxu1 }
  0xec   : > { %v1212_v34 = vpop.f32.mrf.mxu0 }
  0xed   : > { %v768_v40 = vadd.f32 %v1212_v34, %v691_v35  ;;  %v848_v44 = vadd.f32 %v833_v33, %v765_v36 }
  0xee   : > { %v753_v37 = vpop.f32.mrf.mxu0 }
  0xef   : > { %v766_v45 = vadd.f32 %v753_v37, %v689_v38  ;;  %v851_v48 = vadd.f32 %v1220_v41, %v768_v40 }
  0xf0   : > { %v1227_v42 = vpop.f32.mrf.mxu0 }
  0xf1   : > { %v927_v46 = vadd.f32 %v1227_v42, %v850_v39  ;;  %v849_v53 = vadd.f32 %v836_v51, %v766_v45 }
  0xf2   : > { %v910_v47 = vpop.f32.mrf.mxu0 }
  0xf3   : > { %v938_v49 = vadd.f32 %v1137_v43, %v927_v46  ;;  %v925_v50 = vadd.f32 %v910_v47, %v848_v44 }
  0xf4   : > { %v1228_v52 = vpop.f32.mrf.mxu0 }
  0xf5   : > { %1270 = vtanh.f32 %v938_v49  ;;  %v936_v54 = vadd.f32 %v1137_v43, %v925_v50  ;;  %v928_v55 = vadd.f32 %v1228_v52, %v851_v48 }
  0xf6   : > { %v913_v56 = vpop.f32.mrf.mxu0 }
  0xf7   : > { %1272 = vtanh.f32 %v936_v54  ;;  %v939_v57 = vadd.f32 %v1137_v43, %v928_v55  ;;  %v926_v58 = vadd.f32 %v913_v56, %v849_v53 }
  0xf9   : > { %1274 = vtanh.f32 %v939_v57  ;;  %v937_v59 = vadd.f32 %v1137_v43, %v926_v58 }
  0xfb   : > { %1276 = vtanh.f32 %v937_v59 }
 0x102   : > { %v1271_v60 = vpop.eup %1270 }
 0x103   : > { %946 = vst [vmem:[%s324_s11 + $0x10] sm:$0xff] %v1271_v60 }
 0x104   : > { %v1273_v61 = vpop.eup %1272 }
 0x105   : > { %944 = vst [vmem:[%s324_s11] sm:$0xff] %v1273_v61 }
 0x106   : > { %v1275_v62 = vpop.eup %1274 }
 0x107   : > { %947 = vst [vmem:[%s324_s11 + $0x18] sm:$0xff] %v1275_v62 }
 0x108   : > { %v1277_v63 = vpop.eup %1276 }
 0x109   : > { %945 = vst [vmem:[%s324_s11 + $0x8] sm:$0xff] %v1277_v63 }
 0x10a PF: > { %s14_s17 = sadd.s32 1, %s1300_s17   ;;  %s1465_s15 = smov %s1296_s16 }
 0x10b   : > { %p11_p5 = scmp.ge.s32.totalorder %s14_s17, 4   ;;  %s1466_s16 = smov %s1468_s18 }
 0x10d   :  { %13 = sbr.rel (!%p11_p5) target bundleno = 2 (0x2), region = 75 }

// kernel: vec2wav2_forward.126
= control target key start
LH: loop header
LB: loop body
LE: loop exit
PB: predicated region body
PF: predicated region fallthrough
CT: control target
= control target key end

     0   :  { %s1510_s15 = smov 0   ;;  %s1512_s16 = smov 0   ;;  %s1725_s0 = inlined_call_operand.vmem [shape: bf16[2,32,32], index: 0, kind: input, shape index: {}, may-alias: {0,1}]   ;;  %s1726_s1 = inlined_call_operand.vmem [shape: bf16[2,32,32], index: 1, kind: input, shape index: {}, may-alias: {0,1}]   ;;  %s1727_s2 = inlined_call_operand.vmem [shape: bf16[3,32,128], index: 2, kind: input, shape index: {}]   ;;  %s1728_s3 = inlined_call_operand.vmem [shape: f32[1,128], index: 3, kind: input, shape index: {}]   ;;  %s1729_s4 = inlined_call_operand.vmem [shape: bf16[2,32,128], index: 4, kind: output, shape index: {}]  }
   0x1   :  { %s1514_s17 = smov 0  }
   0x2 LB: > { %s33_s18 = sadd.s32 1, %s1478_s16  ;;  %p1331_p0 = scmp.ge.s32.totalorder %s1482_s17, 1  ;;  %s1482_s17 = sphi %s1514_s17, %s14_s17   ;;  %s1478_s16 = sphi %s1512_s16, %s1731_s16   ;;  %s1474_s15 = sphi %s1510_s15, %s1730_s15  }
   0x3   : > { %p35_p1 = scmp.ge.s32.totalorder %s33_s18, 2  ;;  %p230_p2 = scmp.lt.s32.totalorder %s1482_s17, 3 }
   0x5   : > { %s1733_s18 = smov (%p35_p1, %s33_s18), 0  ;;  %p231_p3 = pnand %p1331_p0, %p230_p2 }
   0x6   : > { %p285_p4 = scmp.lt.s32.totalorder (!%p231_p3), %s1474_s15, 1 }
   0x7   : > { %234 = sbr.rel (%p231_p3) target bundleno = 284 (0x11c), region = 36 }
   0xc   : > { %v1450_v0 = vld [vmem:[%s1727_s2 + $0x18] sm:$0xff]   ;;  %v345_v1 = vlaneseq  ;;  %v1451_v2 = vld [vmem:[%s1727_s2 + $0x10] sm:$0xff]   ;;  %s1735_s15 = smov (!%p285_p4, %s1474_s15), 1  ;;  %v1484_v3 = vmov 1966171168   ;;  %v1454_v6 = vld [vmem:[%s1727_s2 + $0x8] sm:$0xff]  }
   0xd   : > { %1401 = vmatprep.subr.bf16.mxu0 %v1450_v0  ;;  %v343_v4 = vunpack.c.l.s4 %v1484_v3  ;;  %s1537_s25 = sshll.u32 %s1735_s15, 4  ;;  %v1542_v7 = vld [vmem:[%s1727_s2 + $0x28] sm:$0xff]   ;;  %v1457_v8 = vld [vmem:[%s1727_s2] sm:$0xff]   ;;  %1409 = vmatprep.subr.bf16.mxu1 %v1454_v6  ;;  %vm776_vm0 = vcmask 261120   ;;  %vm945_vm1 = vsmask.f32 7424 }
   0xe   : > { %1402 = vmatpush3.bf16.msra.mxu0 %v1450_v0  ;;  %v346_v5 = vshrl.u32 %v345_v1, 7  ;;  %s292_s6 = scalar_lea.vmem %s1725_s0, %s1537_s25  ;;  %s1371_s7 = sadd.s32 8, %s1537_s25  ;;  %1410 = vmatpush3.bf16.msra.mxu1 %v1454_v6 }
   0xf   : > { %1403 = vmatprep.subr.bf16.mxu0 %v1451_v2  ;;  %v344_v9 = vunpack.c.0.s8 %v343_v4  ;;  %v327_v10 = vld [vmem:[%s292_s6] sm:$0xf]  ;;  %v328_v11 = vld [vmem:[%s292_s6 + $0x4] sm:$0xf]  ;;  %s303_s10 = scalar_lea.vmem %s1726_s1, %s1371_s7  ;;  %1411 = vmatprep.subr.bf16.mxu1 %v1457_v8  ;;  %s324_s20 = scalar_lea.vmem %s1729_s4, %s1537_s25 }
  0x10   : > { %v1338_v12 = vcombine.low %v327_v10, %v328_v11  ;;  %v1340_v13 = vcombine.low %v328_v11, %v328_v11  ;;  %v1459_v15 = vld.sshfl [vmem:[%s303_s10] sm:$0xff pattern:$0x75316420]  ;;  %v1564_v22 = vsub.s32 0, %v346_v5 }
  0x11   : > { %v1555_v14 = vsub.s32 %v344_v9, %v346_v5 }
  0x12   : > { %1404 = vmatpush3.bf16.msra.mxu0 %v1451_v2  ;;  %1412 = vmatpush3.bf16.msra.mxu1 %v1457_v8 }
  0x13   : > { %1417 = vmatprep.subr.bf16.mxu0 %v1542_v7  ;;  %v348_v16 = vrot.slane %v1338_v12, %v1555_v14  ;;  %v355_v17 = vrot.slane %v1340_v13, %v1555_v14  ;;  %v1567_v23 = vrot.slane %v1459_v15, %v1555_v14 }
  0x15   : > { %v356_v18 = vcombine.high %v348_v16, %v348_v16  ;;  %v357_v19 = vcombine.high %v355_v17, %v355_v17  ;;  %v364_v20 = vrot.slane %v348_v16, %v1555_v14  ;;  %v1562_v21 = vrot.slane %v355_v17, %v1555_v14 }
  0x17   : > { %v378_v24 = vrot.slane %v356_v18, %v1555_v14  ;;  %v386_v25 = vcombine.high %v364_v20, %v364_v20  ;;  %v405_v26 = vunpack.i.h.s16 %v364_v20  ;;  %v1341_v27 = vpack.i.b16 %v364_v20, %v364_v20 }
  0x18   : > { %v1345_v28 = vpack.i.b16 %v1562_v21, %v1562_v21  ;;  %v1573_v29 = vrot.slane %v357_v19, %v1555_v14  ;;  %v1577_v30 = vcombine.high %v1562_v21, %v1562_v21  ;;  %v413_v31 = vunpack.i.h.s16 %v1562_v21 }
  0x19   : > { %v388_v32 = vcombine.high %v378_v24, %v378_v24  ;;  %v407_v33 = vunpack.i.h.s16 %v378_v24  ;;  %v409_v34 = vunpack.i.h.s16 %v386_v25  ;;  %v423_v35 = vpack.i.b16 %v405_v26, %v405_v26 }
  0x1a   : > { %v1342_v36 = vpack.i.b16 %v378_v24, %v378_v24  ;;  %v1343_v37 = vpack.i.b16 %v386_v25, %v386_v25  ;;  %v443_v38 = vrot.slane %v1341_v27, %v1564_v22  ;;  %v475_v39 = vrot.slane %v1345_v28, %v1564_v22 }
  0x1b   : > { %v411_v40 = vunpack.i.h.s16 %v388_v32  ;;  %v425_v41 = vpack.i.b16 %v407_v33, %v407_v33  ;;  %v427_v42 = vpack.i.b16 %v409_v34, %v409_v34  ;;  %v1344_v43 = vpack.i.b16 %v388_v32, %v388_v32 }
  0x1c   : > { %v447_v44 = vrot.slane %v423_v35, %v1564_v22  ;;  %v451_v45 = vrot.slane %v1342_v36, %v1564_v22  ;;  %v459_v46 = vrot.slane %v1343_v37, %v1564_v22  ;;  %v513_v47 = vpack.i.b16 %v443_v38, %v443_v38 }
  0x1d   : > { %v429_v48 = vpack.i.b16 %v411_v40, %v411_v40  ;;  %v455_v49 = vrot.slane %v425_v41, %v1564_v22  ;;  %v463_v50 = vrot.slane %v427_v42, %v1564_v22  ;;  %v467_v51 = vrot.slane %v1344_v43, %v1564_v22 }
  0x1e   : > { %v1589_v52 = vrot.slane %v513_v47, %v1564_v22  ;;  %v520_v53 = vpack.i.b16 %v447_v44, %v447_v44  ;;  %v527_v54 = vpack.i.b16 %v451_v45, %v451_v45  ;;  %v541_v55 = vpack.i.b16 %v459_v46, %v459_v46 }
  0x1f   : > { %v471_v56 = vrot.slane %v429_v48, %v1564_v22  ;;  %v534_v57 = vpack.i.b16 %v455_v49, %v455_v49  ;;  %v548_v58 = vpack.i.b16 %v463_v50, %v463_v50  ;;  %v555_v59 = vpack.i.b16 %v467_v51, %v467_v51 }
  0x20   : > { %v1593_v60 = vrot.slane %v520_v53, %v1564_v22  ;;  %v1596_v61 = vrot.slane %v527_v54, %v1564_v22  ;;  %v1599_v62 = vrot.slane %v541_v55, %v1564_v22  ;;  %v569_v63 = vpack.i.b16 %v475_v39, %v475_v39 }
  0x21   : > { %v1602_v0 = vrot.slane %v534_v57, %v1564_v22  ;;  %v1605_v1 = vrot.slane %v548_v58, %v1564_v22  ;;  %v1608_v2 = vrot.slane %v555_v59, %v1564_v22  ;;  %v562_v3 = vpack.i.b16 %v471_v56, %v471_v56 }
  0x22   : > { %v1611_v4 = vrot.slane %v569_v63, %v1564_v22  ;;  %v666_v5 = vcombine.low %v1593_v60, %v1596_v61  ;;  %v833_v6 = vcombine.low %v1589_v52, %v1593_v60  ;;  %v389_v8 = vcombine.high %v1573_v29, %v1573_v29 }
  0x23   : > { %v1620_v9 = vrot.slane %v562_v3, %v1564_v22  ;;  %v667_v10 = vcombine.low %v1602_v0, %v1599_v62  ;;  %v668_v11 = vcombine.low %v1605_v1, %v1608_v2  ;;  %v834_v12 = vcombine.low %v1596_v61, %v1602_v0 }
  0x24   : > { %v676_v13 = vrot.slane %v666_v5, %v1555_v14  ;;  %v835_v15 = vcombine.low %v1599_v62, %v1605_v1  ;;  %v415_v16 = vunpack.i.h.s16 %v1573_v29  ;;  %v417_v17 = vunpack.i.h.s16 %v1577_v30 }
  0x25   : > { %v669_v18 = vcombine.low %v1620_v9, %v1611_v4  ;;  %v683_v19 = vrot.slane %v667_v10, %v1555_v14  ;;  %v690_v20 = vrot.slane %v668_v11, %v1555_v14  ;;  %v836_v21 = vcombine.low %v1608_v2, %v1620_v9 }
  0x26   : > { %v419_v24 = vunpack.i.h.s16 %v389_v8  ;;  %v431_v25 = vpack.i.b16 %v413_v31, %v413_v31  ;;  %v1346_v26 = vpack.i.b16 %v1573_v29, %v1573_v29  ;;  %v433_v27 = vpack.i.b16 %v415_v16, %v415_v16 }
  0x27   : > { %v697_v28 = vrot.slane %v669_v18, %v1555_v14  ;;  %v698_v32 = vcombine.low %v676_v13, %v683_v19  ;;  %v1347_v33 = vpack.i.b16 %v1577_v30, %v1577_v30  ;;  %v435_v34 = vpack.i.b16 %v417_v17, %v417_v17 }
  0x28   : > { %v1348_v35 = vpack.i.b16 %v389_v8, %v389_v8  ;;  %v437_v36 = vpack.i.b16 %v419_v24, %v419_v24  ;;  %v1349_v37 = vpack.i.b16 %v1567_v23, %v1567_v23  ;;  %v479_v38 = vrot.slane %v431_v25, %v1564_v22 }
  0x29   : > { %v699_v39 = vcombine.low %v690_v20, %v697_v28  ;;  %v706_v31 = vrot.slane %v698_v32, %v1555_v14  ;;  %v483_v29 = vrot.slane %v1346_v26, %v1564_v22  ;;  %v487_v40 = vrot.slane %v433_v27, %v1564_v22 }
  0x2a   : > { %v491_v41 = vrot.slane %v1347_v33, %v1564_v22  ;;  %v495_v42 = vrot.slane %v435_v34, %v1564_v22  ;;  %v499_v30 = vrot.slane %v1348_v35, %v1564_v22  ;;  %v503_v43 = vrot.slane %v437_v36, %v1564_v22 }
  0x2b   : > { %v713_v44 = vrot.slane %v699_v39, %v1555_v14  ;;  %v507_v45 = vrot.slane %v1349_v37, %v1564_v22  ;;  %v576_v46 = vpack.i.b16 %v479_v38, %v479_v38  ;;  %v583_v47 = vpack.i.b16 %v483_v29, %v483_v29 }
  0x2c   : > { %v590_v48 = vpack.i.b16 %v487_v40, %v487_v40  ;;  %v597_v49 = vpack.i.b16 %v491_v41, %v491_v41  ;;  %v604_v50 = vpack.i.b16 %v495_v42, %v495_v42  ;;  %v611_v51 = vpack.i.b16 %v499_v30, %v499_v30 }
  0x2d   : > { %v1656_v52 = vcombine.low %v706_v31, %v713_v44  ;;  %v581_v53 = vrot.slane %v576_v46, %v1564_v22  ;;  %v588_v54 = vrot.slane %v583_v47, %v1564_v22  ;;  %v618_v55 = vpack.i.b16 %v503_v43, %v503_v43  ;;  %v1458_v46 = vld [vmem:[%s1727_s2 + $0x20] sm:$0xff]  }
  0x2e   : > { %v595_v56 = vrot.slane %v590_v48, %v1564_v22  ;;  %v602_v57 = vrot.slane %v597_v49, %v1564_v22  ;;  %v609_v58 = vrot.slane %v604_v50, %v1564_v22  ;;  %v616_v59 = vrot.slane %v611_v51, %v1564_v22 }
  0x2f   : > { %1405 = vmatprep.mubr.msk.bf16.mxu0 %vm776_vm0, %v1656_v52  ;;  %v623_v60 = vrot.slane %v618_v55, %v1564_v22  ;;  %v625_v61 = vpack.i.b16 %v507_v45, %v507_v45  ;;  %v715_v62 = vcombine.low %v581_v53, %v588_v54  ;;  %v843_v1 = vrot.slane %v833_v6, %v1555_v14 }
  0x30   : > { %v716_v63 = vcombine.low %v595_v56, %v602_v57  ;;  %v717_v0 = vcombine.low %v609_v58, %v616_v59  ;;  %v1050_v2 = vshll.u32 %v1656_v52, 16  ;;  %v850_v5 = vrot.slane %v834_v12, %v1555_v14 }
  0x31   : > { %v630_v3 = vrot.slane %v625_v61, %v1564_v22  ;;  %v857_v8 = vrot.slane %v835_v15, %v1555_v14  ;;  %v725_v9 = vrot.slane %v715_v62, %v1555_v14  ;;  %v864_v13 = vrot.slane %v836_v21, %v1555_v14 }
  0x32   : > { %v732_v10 = vrot.slane %v716_v63, %v1555_v14  ;;  %v739_v11 = vrot.slane %v717_v0, %v1555_v14  ;;  %v865_v17 = vcombine.low %v843_v1, %v850_v5  ;;  %v882_v6 = vcombine.low %v1611_v4, %v581_v53 }
  0x33   : > { %v718_v16 = vcombine.low %v623_v60, %v630_v3  ;;  %v883_v18 = vcombine.low %v588_v54, %v595_v56  ;;  %v866_v20 = vcombine.low %v857_v8, %v864_v13  ;;  %v884_v24 = vcombine.low %v602_v57, %v609_v58 }
  0x34   : > { %v747_v19 = vcombine.low %v725_v9, %v732_v10  ;;  %v885_v25 = vcombine.low %v616_v59, %v623_v60  ;;  %v873_v15 = vrot.slane %v865_v17, %v1555_v14  ;;  %v892_v26 = vrot.slane %v882_v6, %v1555_v14 }
  0x35   : > { %v746_v12 = vrot.slane %v718_v16, %v1555_v14  ;;  %v899_v27 = vrot.slane %v883_v18, %v1555_v14  ;;  %v880_v28 = vrot.slane %v866_v20, %v1555_v14  ;;  %v906_v21 = vrot.slane %v884_v24, %v1555_v14 }
  0x36   : > { %v913_v32 = vrot.slane %v885_v25, %v1555_v14  ;;  %v755_v33 = vrot.slane %v747_v19, %v1555_v14  ;;  %v937_v35 = vrot.slane %v630_v3, %v1555_v14  ;;  %v1048_v36 = vshrl.u32 %v1656_v52, 16 }
  0x37   : > { %v748_v4 = vcombine.low %v739_v11, %v746_v12  ;;  %v914_v34 = vcombine.low %v892_v26, %v899_v27  ;;  %v881_v37 = vcombine.low %v873_v15, %v880_v28  ;;  %v421_v39 = vunpack.i.h.s16 %v1567_v23 }
  0x38   : > { %v915_v38 = vcombine.low %v906_v21, %v913_v32  ;;  %v1052_v31 = vrot.slane %v1050_v2, 1  ;;  %v944_v41 = vrot.slane %v937_v35, %v1555_v14 }
  0x39   : > { %v762_v29 = vrot.slane %v748_v4, %v1555_v14  ;;  %v922_v40 = vrot.slane %v914_v34, %v1555_v14  ;;  %v947_v30 = vshrl.u32 %v881_v37, 16  ;;  %v949_v43 = vshll.u32 %v881_v37, 16 }
  0x3a   : > { %v929_v42 = vrot.slane %v915_v38, %v1555_v14  ;;  %v439_v44 = vpack.i.b16 %v421_v39, %v421_v39  ;;  %v962_v23 = vshll.u32 %v944_v41, 16  ;;  %v1053_v50 = vor.u32 %v1052_v31, %v1048_v36 }
  0x3b   : > { %v763_v45 = vcombine.low %v755_v33, %v762_v29  ;;  %v951_v48 = vrot.slane %v949_v43, 1 }
  0x3c   : > { %v930_v47 = vcombine.low %v922_v40, %v929_v42  ;;  %v511_v49 = vrot.slane %v439_v44, %v1564_v22  ;;  %v964_v58 = vrot.slane %v962_v23, 1 }
  0x3d   : > { %1406 = vmatmul.mubr.msk.bf16.vlgmr.msra.gmra.mxu0 %vm776_vm0, %v763_v45  ;;  %v1054_v51 = vshll.u32 %v763_v45, 16  ;;  %v952_v52 = vor.u32 %v951_v48, %v947_v30  ;;  %v1058_v63 = vshrl.u32 %v763_v45, 16 }
  0x3e   : > { %1418 = vmatpush3.bf16.msra.mxu0 %v1542_v7  ;;  %v954_v53 = vshll.u32 %v930_v47, 16  ;;  %v958_v54 = vshrl.u32 %v930_v47, 16  ;;  %v632_v55 = vpack.i.b16 %v511_v49, %v511_v49 }
  0x3f   : > { %1419 = vmatprep.subr.bf16.mxu0 %v1458_v46  ;;  %v1056_v56 = vrot.slane %v1054_v51, 1 }
  0x40   : > { %v956_v57 = vrot.slane %v954_v53, 1  ;;  %v637_v59 = vrot.slane %v632_v55, %v1564_v22 }
  0x41   : > { %v1057_v60 = vsel %vm945_vm1, %v1053_v50, %v1056_v56  ;;  %v1060_v22 = vor.u32 %v1058_v63, %v1056_v56 }
  0x42   : > { %1420 = vmatpush3.bf16.msra.mxu0 %v1458_v46  ;;  %v957_v61 = vsel %vm945_vm1, %v952_v52, %v956_v57  ;;  %v960_v62 = vor.u32 %v958_v54, %v956_v57  ;;  %1421 = vmatprep.mubr.msk.bf16.mxu0 %vm776_vm0, %v1057_v60  ;;  %v1040_v7 = vrot.slane %v637_v59, %v1555_v14 }
  0x43   : > { %1413 = vmatprep.mubr.msk.bf16.mxu1 %vm776_vm0, %v957_v61 }
  0x44   : > { %v965_v0 = vsel %vm945_vm1, %v960_v62, %v964_v58  ;;  %v1047_v1 = vrot.slane %v1040_v7, %v1555_v14  ;;  %v1362_v14 = vld [vmem:[%s1728_s3] ss:$0 sm:$0xff] }
  0x45   : > { %1414 = vmatmul.mubr.msk.bf16.vlgmr.msra.gmra.mxu1 %vm776_vm0, %v965_v0 }
  0x46   : > { %v1062_v2 = vshll.u32 %v1047_v1, 16 }
  0x48   : > { %v1064_v3 = vrot.slane %v1062_v2, 1 }
  0x4a   : > { %v1065_v5 = vsel %vm945_vm1, %v1060_v22, %v1064_v3 }
  0x4b   : > { %1422 = vmatmul.mubr.msk.bf16.vlgmr.msra.gmra.mxu0 %vm776_vm0, %v1065_v5 }
  0xfd   : > { %v1407_v8 = vpop.f32.mrf.mxu0 }
  0xff   : > { %v817_v9 = vpop.f32.mrf.mxu0 }
 0x101   : > { %v1408_v10 = vpop.f32.mrf.mxu0 }
 0x103   : > { %v820_v13 = vpop.f32.mrf.mxu0 }
 0x105   : > { %v1415_v11 = vpop.f32.mrf.mxu1 }
 0x106   : > { %v1027_v17 = vadd.f32 %v1415_v11, %v1407_v8 }
 0x107   : > { %v1018_v16 = vpop.f32.mrf.mxu1 }
 0x108   : > { %v1019_v18 = vadd.f32 %v1018_v16, %v817_v9 }
 0x109   : > { %v1416_v6 = vpop.f32.mrf.mxu1 }
 0x10a   : > { %v1030_v24 = vadd.f32 %v1416_v6, %v1408_v10 }
 0x10b   : > { %v1423_v19 = vpop.f32.mrf.mxu0  ;;  %v1021_v25 = vpop.f32.mrf.mxu1 }
 0x10c   : > { %v1135_v20 = vadd.f32 %v1423_v19, %v1027_v17  ;;  %v1022_v28 = vadd.f32 %v1021_v25, %v820_v13 }
 0x10d   : > { %v1118_v12 = vpop.f32.mrf.mxu0 }
 0x10e   : > { %v1146_v15 = vadd.f32 %v1362_v14, %v1135_v20  ;;  %v1133_v26 = vadd.f32 %v1118_v12, %v1019_v18 }
 0x10f   : > { %v1424_v27 = vpop.f32.mrf.mxu0 }
 0x110   : > { %v1136_v21 = vadd.f32 %v1424_v27, %v1030_v24  ;;  %v1144_v32 = vadd.f32 %v1362_v14, %v1133_v26  ;;  %v1154_v33 = vmul.f32 0.1, %v1146_v15  ;;  %vm1150_vm2 = vcmp.gt.f32.partialorder %v1146_v15, 0.0 }
 0x111   : > { %v1121_v4 = vpop.f32.mrf.mxu0 }
 0x112   : > { %v1147_v34 = vadd.f32 %v1362_v14, %v1136_v21  ;;  %v1134_v35 = vadd.f32 %v1121_v4, %v1022_v28  ;;  %v1152_v37 = vmul.f32 0.1, %v1144_v32  ;;  %v1158_v39 = vsel %vm1150_vm2, %v1146_v15, %v1154_v33 }
 0x113   : > { %vm1148_vm4 = vcmp.gt.f32.partialorder %v1144_v32, 0.0 }
 0x114   : > { %vm1151_vm3 = vcmp.gt.f32.partialorder %v1147_v34, 0.0  ;;  %v1155_v36 = vmul.f32 0.1, %v1147_v34  ;;  %v1145_v38 = vadd.f32 %v1362_v14, %v1134_v35  ;;  %v1156_v41 = vsel %vm1148_vm4, %v1144_v32, %v1152_v37 }
 0x116   : > { %v1159_v31 = vsel %vm1151_vm3, %v1147_v34, %v1155_v36  ;;  %vm1149_vm5 = vcmp.gt.f32.partialorder %v1145_v38, 0.0  ;;  %v1153_v40 = vmul.f32 0.1, %v1145_v38 }
 0x117   : > { %v1385_v29 = vpack.c.bf16 %v1159_v31, %v1158_v39 }
 0x118   : > { %v1157_v42 = vsel %vm1149_vm5, %v1145_v38, %v1153_v40 }
 0x119   : > { %1388 = vst [vmem:[%s324_s20 + $0x8] sm:$0xff] %v1385_v29   ;;  %v1380_v30 = vpack.c.bf16 %v1157_v42, %v1156_v41 }
 0x11b   : > { %1381 = vst [vmem:[%s324_s20] sm:$0xff] %v1380_v30  }
 0x11c PF: > { %s14_s17 = sadd.s32 1, %s1482_s17   ;;  %s1730_s15 = smov %s1478_s16 }
 0x11d   : > { %p11_p5 = scmp.ge.s32.totalorder %s14_s17, 4   ;;  %s1731_s16 = smov %s1733_s18 }
 0x11f   :  { %13 = sbr.rel (!%p11_p5) target bundleno = 2 (0x2), region = 75 }

// kernel: vec2wav2_forward.122
= control target key start
LH: loop header
LB: loop body
LE: loop exit
PB: predicated region body
PF: predicated region fallthrough
CT: control target
= control target key end

     0   :  { %s338_s0 = inlined_call_operand.vmem [shape: bf16[32,128], index: 0, kind: input, shape index: {}]   ;;  %s339_s1 = inlined_call_operand.vmem [shape: bf16[128,128], index: 1, kind: input, shape index: {}]   ;;  %s340_s2 = inlined_call_operand.vmem [shape: f32[1,128], index: 2, kind: input, shape index: {}]   ;;  %s341_s3 = inlined_call_operand.hbm [shape: f32[32,128], index: 3, kind: output, shape index: {}]  }
   0x1   :  { %v247_v0 = vld [vmem:[%s339_s1 + $0x38] sm:$0xff]   ;;  %v248_v1 = vld [vmem:[%s339_s1 + $0x30] sm:$0xff]   ;;  %v249_v2 = vld [vmem:[%s339_s1 + $0x28] sm:$0xff]  }
   0x2   :  { %224 = vmatprep.subr.bf16.mxu0 %v247_v0  ;;  %v250_v3 = vld [vmem:[%s339_s1 + $0x20] sm:$0xff]  }
   0x3   :  { %225 = vmatpush3.bf16.msra.mxu0 %v247_v0  ;;  %v255_v4 = vld [vmem:[%s338_s0] sm:$0xff]  }
   0x4   :  { %226 = vmatprep.subr.bf16.mxu0 %v248_v1  ;;  %240 = vmatprep.mubr.bf16.mxu0 %v255_v4 }
   0x7   :  { %227 = vmatpush3.bf16.msra.mxu0 %v248_v1 }
   0x8   :  { %228 = vmatprep.subr.bf16.mxu0 %v249_v2 }
   0x9   :  { %8 = vsyncpa [#allocation4], 0  ;;  %v251_v5 = vld [vmem:[%s339_s1 + $0x18] sm:$0xff]   ;;  %v252_v6 = vld [vmem:[%s339_s1 + $0x10] sm:$0xff]   ;;  %s279_s7 = smov [#allocation3]  }
   0xa   :  { %v253_v7 = vld [vmem:[%s339_s1 + $0x8] sm:$0xff]   ;;  %v254_v8 = vld [vmem:[%s339_s1] sm:$0xff]   ;;  %s192_s8 = sshll.u32 %s279_s7, 4  ;;  %s193_s8 = int_to_ptr.vmem [resolvable:$true] %s192_s8 }
   0xb   :  { %229 = vmatpush3.bf16.msra.mxu0 %v249_v2  ;;  %v256_v9 = vld [vmem:[%s338_s0 + $0x8] sm:$0xff]   ;;  %v213_v10 = vld [vmem:[%s340_s2] ss:$0 sm:$0xff]  ;;  %s257_s0 = scalar_lea.vmem %s193_s8, 512  ;;  %p262_p1 = scmp.lt.s32.totalorder %s193_s8, %s193_s8 }
   0xc   :  { %230 = vmatprep.subr.bf16.mxu0 %v250_v3  ;;  %p258_p0 = scmp.ne.s32.totalorder %s193_s8, %s257_s0  ;;  %p263_p2 = scmp.lt.s32.totalorder %s257_s0, %s257_s0 }
   0xe   :  { %p264_p3 = por %p263_p2, %p262_p1 }
   0xf   :  { %231 = vmatpush3.bf16.msra.mxu0 %v250_v3 }
  0x10   :  { %232 = vmatprep.subr.bf16.mxu0 %v251_v5  ;;  %p265_p4 = pnand %p264_p3, %p258_p0 }
  0x13   :  { %233 = vmatpush3.bf16.msra.mxu0 %v251_v5 }
  0x14   :  { %234 = vmatprep.subr.bf16.mxu0 %v252_v6 }
  0x17   :  { %235 = vmatpush3.bf16.msra.mxu0 %v252_v6 }
  0x18   :  { %236 = vmatprep.subr.bf16.mxu0 %v253_v7 }
  0x1b   :  { %237 = vmatpush3.bf16.msra.mxu0 %v253_v7 }
  0x1c   :  { %238 = vmatprep.subr.bf16.mxu0 %v254_v8 }
  0x1f   :  { %239 = vmatpush3.bf16.msra.mxu0 %v254_v8 }
  0x22   :  { %241 = vmatmul.mubr.bf16.vlgmr.msra.gmra.mxu0 %v256_v9 }
  0xe2   :  { %v242_v11 = vpop.f32.mrf.mxu0 }
  0xe3   :  { %v181_v12 = vadd.f32 %v242_v11, %v213_v10 }
  0xe4   :  { %v142_v13 = vpop.f32.mrf.mxu0 }
  0xe5   :  { %185 = vst [vmem:[#allocation3 + $0x10] sm:$0xff] %v181_v12  ;;  %v179_v14 = vadd.f32 %v213_v10, %v142_v13 }
  0xe6   :  { %v243_v15 = vpop.f32.mrf.mxu0 }
  0xe7   :  { %183 = vst [vmem:[#allocation3] sm:$0xff] %v179_v14  ;;  %v182_v16 = vadd.f32 %v243_v15, %v213_v10 }
  0xe8   :  { %v145_v17 = vpop.f32.mrf.mxu0 }
  0xe9   :  { %186 = vst [vmem:[#allocation3 + $0x18] sm:$0xff] %v182_v16  ;;  %v180_v18 = vadd.f32 %v213_v10, %v145_v17 }
  0xeb   :  { %184 = vst [vmem:[#allocation3 + $0x8] sm:$0xff] %v180_v18 }
  0xec   :  { %268 = shalt.err (!%p265_p4)
}
  0xed   :  { %s280_s1 = smov 128   ;;  %s281_s2 = smov 8  }
  0xee   :  { %198 = dma.vmem_to_hbm [thread:$0]  %s193_s8, 512, %s341_s3, [#allocation4], %s280_s1, %s280_s1, %s281_s2  }
  0xef   :  { %277 = dma.done.wait [#allocation4], 512  }
  0xf0   :  { %278 = vsyncadd [#allocation4], 4294966784 }
  0xf1   :  { %202 = vsyncpa [#allocation4], 1 }

</bundles_post_ra>
